<compile_context>
chip_gen: v6e
topology: v6e:2x2x1
jax: 0.10.0
libtpu: 0.0.40
codegen_flags: <defaults>
</compile_context>

<pallas_src>
from functools import partial

import jax
import jax.numpy as jnp
import numpy as np
from jax import lax
from jax.experimental import pallas as pl
from jax.experimental.pallas import tpu as pltpu


def _cnn_head_kernel(W,
                     x_ref, w1_ref, s1_ref, t1_ref,
                     w2_hbm, s2_ref, t2_ref,
                     w3_ref, b3_ref, mask_ref,
                     out_ref,
                     w2_vmem, w2_sem):
    """Single-invocation fused head.

    x_ref   : (M, 9E)  bf16  VMEM  -- conv1 im2col of (a - b) grid, M = B*H*W
    w1_ref  : (9E, C1) bf16  VMEM ; s1/t1: (1, C1) f32 (folded BN scale/shift)
    w2_hbm  : (9, C1, C2) bf16 HBM -- per-tap chunks, manually DMA'd [R1]
    s2/t2   : (1, C2) f32
    w3_ref  : (C2, NCpad) bf16 ; b3_ref: (1, NCpad) f32
    mask_ref: (M, 9) f32 -- trace-time zero-padding validity masks [R4]
    out_ref : (M, NCpad) f32 (lane-dense; sliced to num_classes outside)
    w2_vmem : (9, C1, C2) bf16 scratch ; w2_sem: DMA semaphores (9,)
    """
    M = x_ref.shape[0]

    # [R1] Kick off all 9 conv2 weight-chunk DMAs immediately; they overlap
    # conv1 and the tap construction below and are waited on per chunk.
    w2_cp = [pltpu.make_async_copy(w2_hbm.at[t], w2_vmem.at[t], w2_sem.at[t])
             for t in range(9)]
    for cp in w2_cp:
        cp.start()

    # ---- Conv1: one im2col matmul (K = 9E) + folded BN + ReLU ----
    acc1 = jnp.dot(x_ref[...], w1_ref[...], preferred_element_type=jnp.float32)
    h1 = jnp.maximum(acc1 * s1_ref[...] + t1_ref[...], 0.0)        # (M, C1) f32

    # ---- Conv2: 9 accumulating matmuls [R5]; each tap is h1 rolled by its
    # flat offset on the XLU [R2] and zeroed at image borders via the
    # trace-time mask (wrap-around rows land only on masked positions). ----
    acc2 = None
    offsets = [dy * W + dx for dy in (-1, 0, 1) for dx in (-1, 0, 1)]
    for t, o in enumerate(offsets):
        if o == 0:
            tap = h1                                       # center tap: no shift
        else:
            tap = pltpu.roll(h1, (-o) % M, 0) * mask_ref[:, t:t + 1]
        w2_cp[t].wait()                                    # [R1] per-chunk wait
        part = jnp.dot(tap.astype(jnp.bfloat16), w2_vmem[t],
                       preferred_element_type=jnp.float32)
        acc2 = part if acc2 is None else acc2 + part
    h2 = jnp.maximum(acc2 * s2_ref[...] + t2_ref[...], 0.0)        # (M, C2) f32

    # ---- Conv3 (1x1): lane-dense padded matmul + bias (unmasked vst). ----
    out_ref[...] = jnp.dot(h2.astype(jnp.bfloat16), w3_ref[...],
                           preferred_element_type=jnp.float32) + b3_ref[...]


def prepare_params(params, num_classes):
    """[R9] One-time weight layout prep (bf16 cast / reshape / lane padding),
    hoisted out of the per-call jitted forward path."""
    w1, s1, t1, w2, s2, t2, w3, b3 = params
    E, C1 = w1.shape[2], w1.shape[3]
    C2 = w2.shape[3]
    ncpad = max(128, -(-num_classes // 128) * 128)
    w1r = jnp.asarray(w1).reshape(9 * E, C1).astype(jnp.bfloat16)
    # (3,3,C1,C2) -> (9,C1,C2): tap-major so the kernel DMAs one chunk per tap.
    w2r = jnp.asarray(w2).reshape(9, C1, C2).astype(jnp.bfloat16)
    w3p = jnp.pad(w3, ((0, 0), (0, ncpad - num_classes))).astype(jnp.bfloat16)
    b3p = jnp.pad(b3, ((0, 0), (0, ncpad - num_classes))).astype(jnp.float32)
    return (w1r, s1, t1, w2r, s2, t2, w3p, b3p)


@partial(jax.jit, static_argnums=(3, 4, 5))
def cnn_classifier_forward(a, b, prepped, height, width, num_classes):
    """a, b: (B, 1 + H*W, E) float32 (ViT tokens incl. CLS). Returns (B, NC, H, W)."""
    w1r, s1, t1, w2r, s2, t2, w3p, b3p = prepped
    B, _, E = a.shape
    C1, C2, NCpad = w2r.shape[1], w2r.shape[2], w3p.shape[1]
    H, W = height, width
    M = B * H * W

    # --- per-call JAX glue (fused by XLA): subtract, drop CLS, grid-ify,
    # conv1 im2col ---
    x = (a - b)[:, 1:, :].reshape(B, H, W, E)
    xp = jnp.pad(x, ((0, 0), (1, 1), (1, 1), (0, 0)))
    x_win = jnp.concatenate(
        [xp[:, ky:ky + H, kx:kx + W, :] for ky in range(3) for kx in range(3)],
        axis=-1).reshape(M, 9 * E).astype(jnp.bfloat16)

    # [R4] Trace-time zero-padding validity masks, one column per tap.
    rr = np.arange(M) % (H * W)
    yy, xx = rr // W, rr % W
    masks = np.stack(
        [((yy + dy >= 0) & (yy + dy < H) & (xx + dx >= 0) & (xx + dx < W))
         for dy in (-1, 0, 1) for dx in (-1, 0, 1)],
        axis=1).astype(np.float32)                                  # (M, 9)

    flops = 2 * M * (9 * E * C1 + 9 * C1 * C2 + C2 * NCpad)
    bytes_accessed = (x_win.size * 2 + w1r.size * 2 + w2r.size * 2 +
                      w3p.size * 2 + masks.size * 4 +
                      (s1.size + t1.size + s2.size + t2.size + b3p.size) * 4 +
                      M * NCpad * 4)

    # TODO(synk): for larger B or ViT grids (M >> 128), add an M-tiled grid
    # (weights pinned via constant index_map, dimension_semantics=("parallel",))
    # so v7x's second TensorCore is used, M fills the 256-wide MXU rows on
    # v6e/v7x, and VMEM stays within v7x's 64 MiB.  At M = B*H*W = 128 a
    # single invocation avoids per-step grid overhead and is the best option.
    vmem = pl.BlockSpec(memory_space=pltpu.MemorySpace.VMEM)
    any_ = pl.BlockSpec(memory_space=pl.ANY)
    out_flat = pl.pallas_call(
        partial(_cnn_head_kernel, W),
        out_shape=jax.ShapeDtypeStruct((M, NCpad), jnp.float32),
        in_specs=[vmem, vmem, vmem, vmem, any_, vmem, vmem, vmem, vmem, vmem],
        out_specs=vmem,
        scratch_shapes=[pltpu.VMEM((9, C1, C2), jnp.bfloat16),
                        pltpu.SemaphoreType.DMA((9,))],
        cost_estimate=pl.CostEstimate(flops=flops, transcendentals=0,
                                      bytes_accessed=bytes_accessed),
    )(x_win, w1r, s1, t1, w2r, s2, t2, w3p, b3p, jnp.asarray(masks))

    # Slice padded classes, restore PyTorch NCHW output convention.
    out = out_flat[:, :num_classes].reshape(B, H, W, num_classes)
    return jnp.transpose(out, (0, 3, 1, 2))


def init_params(key, embedding_size, num_classes):
    """Deterministic synthetic parameters (shapes per the nn.Module __init__)."""
    eps = 1e-5
    ks = jax.random.split(key, 14)
    E, C1, C2 = embedding_size, 256, 128

    def fold_bn(conv_b, gamma, beta, rmean, rvar):
        scale = gamma / jnp.sqrt(rvar + eps)
        shift = (conv_b - rmean) * scale + beta
        return scale, shift

    # Conv1 (PyTorch OIHW (256,E,3,3)) stored as HWIO (3,3,E,256).
    w1 = jax.random.normal(ks[0], (3, 3, E, C1), jnp.float32) / np.sqrt(9 * E)
    b1 = 0.1 * jax.random.normal(ks[1], (C1,), jnp.float32)
    g1 = 1.0 + 0.1 * jax.random.normal(ks[2], (C1,), jnp.float32)
    be1 = 0.1 * jax.random.normal(ks[3], (C1,), jnp.float32)
    rm1 = 0.1 * jax.random.normal(ks[4], (C1,), jnp.float32)
    rv1 = 1.0 + 0.5 * jax.random.uniform(ks[5], (C1,), jnp.float32)
    s1, t1 = fold_bn(b1, g1, be1, rm1, rv1)

    w2 = jax.random.normal(ks[6], (3, 3, C1, C2), jnp.float32) / np.sqrt(9 * C1)
    b2 = 0.1 * jax.random.normal(ks[7], (C2,), jnp.float32)
    g2 = 1.0 + 0.1 * jax.random.normal(ks[8], (C2,), jnp.float32)
    be2 = 0.1 * jax.random.normal(ks[9], (C2,), jnp.float32)
    rm2 = 0.1 * jax.random.normal(ks[10], (C2,), jnp.float32)
    rv2 = 1.0 + 0.5 * jax.random.uniform(ks[11], (C2,), jnp.float32)
    s2, t2 = fold_bn(b2, g2, be2, rm2, rv2)

    # Conv3 1x1: (nc,128,1,1) -> (128, nc)
    w3 = jax.random.normal(ks[12], (C2, num_classes), jnp.float32) / np.sqrt(C2)
    b3 = 0.1 * jax.random.normal(ks[13], (num_classes,), jnp.float32)

    return (w1, s1.reshape(1, C1), t1.reshape(1, C1),
            w2, s2.reshape(1, C2), t2.reshape(1, C2),
            w3, b3.reshape(1, num_classes))


def reference_forward(a, b, params, H, W, match_bf16=False):
    """Pure-JAX reference (same eval-mode BN folding).

    match_bf16=True rounds the matmul operands to bf16 exactly like the kernel's
    MXU inputs (f32 accumulation), giving a tight apples-to-apples check.
    """
    w1, s1, t1, w2, s2, t2, w3, b3 = params
    B, _, E = a.shape
    q = ((lambda v: v.astype(jnp.bfloat16).astype(jnp.float32))
         if match_bf16 else (lambda v: v))
    dn = ('NHWC', 'HWIO', 'NHWC')
    hi = lax.Precision.HIGHEST
    x = (a - b)[:, 1:, :].reshape(B, H, W, E)
    y = lax.conv_general_dilated(q(x), q(w1), (1, 1), 'SAME',
                                 dimension_numbers=dn, precision=hi)
    y = jnp.maximum(y * s1.reshape(1, 1, 1, -1) + t1.reshape(1, 1, 1, -1), 0.0)
    y = lax.conv_general_dilated(q(y), q(w2), (1, 1), 'SAME',
                                 dimension_numbers=dn, precision=hi)
    y = jnp.maximum(y * s2.reshape(1, 1, 1, -1) + t2.reshape(1, 1, 1, -1), 0.0)
    y = jnp.einsum('bhwc,cn->bhwn', q(y), q(w3),
                   precision=hi) + b3.reshape(1, 1, 1, -1)
    return jnp.transpose(y, (0, 3, 1, 2))


if __name__ == "__main__":
    B, E, H, W, NC = 2, 32, 8, 8, 2   # small shapes consistent with the module
    key = jax.random.PRNGKey(0)
    ka, kb, kp = jax.random.split(key, 3)
    a = jax.random.normal(ka, (B, 1 + H * W, E), jnp.float32)  # ViT tokens incl. CLS
    b = jax.random.normal(kb, (B, 1 + H * W, E), jnp.float32)
    params = init_params(kp, E, NC)
    prepped = prepare_params(params, NC)   # [R9] once, outside the hot path

    out = cnn_classifier_forward(a, b, prepped, H, W, NC)
    out = jax.block_until_ready(out)
    assert out.shape == (B, NC, H, W) and out.dtype == jnp.float32

    # Strict check against a precision-matched (bf16 matmul operands, f32
    # accumulation) reference.
    ref_matched = reference_forward(a, b, params, H, W, match_bf16=True)
    np.testing.assert_allclose(np.asarray(out), np.asarray(ref_matched),
                               atol=2e-3, rtol=2e-3)

    # Sanity check against the full-f32 reference (catches structural errors;
    # tolerance covers bf16 operand rounding).
    ref_f32 = reference_forward(a, b, params, H, W, match_bf16=False)
    np.testing.assert_allclose(np.asarray(out), np.asarray(ref_f32),
                               atol=2e-2, rtol=2e-2)
    print("KERNEL_OK")
</pallas_src>

<mosaic_0001>
module attributes {stable_mosaic.version = 11 : i64} {
  func.func @_cnn_head_kernel(%arg0: memref<128x288xbf16, #tpu.memory_space<vmem>>, %arg1: memref<288x256xbf16, #tpu.memory_space<vmem>>, %arg2: memref<1x256xf32, #tpu.memory_space<vmem>>, %arg3: memref<1x256xf32, #tpu.memory_space<vmem>>, %arg4: memref<9x256x128xbf16, #tpu.memory_space<any>>, %arg5: memref<1x128xf32, #tpu.memory_space<vmem>>, %arg6: memref<1x128xf32, #tpu.memory_space<vmem>>, %arg7: memref<128x128xbf16, #tpu.memory_space<vmem>>, %arg8: memref<1x128xf32, #tpu.memory_space<vmem>>, %arg9: memref<128x9xf32, #tpu.memory_space<vmem>>, %arg10: memref<128x128xf32, #tpu.memory_space<vmem>>, %arg11: memref<9x256x128xbf16, #tpu.memory_space<vmem>>, %arg12: memref<9x!tpu.dma_semaphore, #tpu.memory_space<semaphore_mem>>) attributes {dimension_semantics = [], scalar_prefetch = 0 : i64, scratch_operands = 2 : i64, tpu.core_type = #tpu.core_type<tc>} {
    %c0_i32 = arith.constant 0 : i32
    %c0_i32_0 = arith.constant 0 : i32
    %c0_i32_1 = arith.constant 0 : i32
    %c0_i32_2 = arith.constant 0 : i32
    %c0_i32_3 = arith.constant 0 : i32
    %0 = tpu.memref_slice %arg4[%c0_i32, %c0_i32_2, %c0_i32_3] : memref<9x256x128xbf16, #tpu.memory_space<any>> -> memref<1x256x128xbf16, #tpu.memory_space<any>>
    %1 = tpu.memref_squeeze %0 : memref<1x256x128xbf16, #tpu.memory_space<any>> -> memref<256x128xbf16, #tpu.memory_space<any>>
    %c0_i32_4 = arith.constant 0 : i32
    %c0_i32_5 = arith.constant 0 : i32
    %2 = tpu.memref_slice %arg11[%c0_i32_0, %c0_i32_4, %c0_i32_5] : memref<9x256x128xbf16, #tpu.memory_space<vmem>> -> memref<1x256x128xbf16, #tpu.memory_space<vmem>>
    %3 = tpu.memref_squeeze %2 : memref<1x256x128xbf16, #tpu.memory_space<vmem>> -> memref<256x128xbf16, #tpu.memory_space<vmem>>
    %4 = tpu.memref_slice %arg12[%c0_i32_1] : memref<9x!tpu.dma_semaphore, #tpu.memory_space<semaphore_mem>> -> memref<1x!tpu.dma_semaphore, #tpu.memory_space<semaphore_mem>>
    %5 = tpu.memref_squeeze %4 : memref<1x!tpu.dma_semaphore, #tpu.memory_space<semaphore_mem>> -> memref<!tpu.dma_semaphore, #tpu.memory_space<semaphore_mem>>
    tpu.enqueue_dma source(%1 : memref<256x128xbf16, #tpu.memory_space<any>>) target(%3 : memref<256x128xbf16, #tpu.memory_space<vmem>>) target_semaphore(%5 : memref<!tpu.dma_semaphore, #tpu.memory_space<semaphore_mem>>)
    %c1_i32 = arith.constant 1 : i32
    %c1_i32_6 = arith.constant 1 : i32
    %c1_i32_7 = arith.constant 1 : i32
    %c0_i32_8 = arith.constant 0 : i32
    %c0_i32_9 = arith.constant 0 : i32
    %6 = tpu.memref_slice %arg4[%c1_i32, %c0_i32_8, %c0_i32_9] : memref<9x256x128xbf16, #tpu.memory_space<any>> -> memref<1x256x128xbf16, #tpu.memory_space<any>>
    %7 = tpu.memref_squeeze %6 : memref<1x256x128xbf16, #tpu.memory_space<any>> -> memref<256x128xbf16, #tpu.memory_space<any>>
    %c0_i32_10 = arith.constant 0 : i32
    %c0_i32_11 = arith.constant 0 : i32
    %8 = tpu.memref_slice %arg11[%c1_i32_6, %c0_i32_10, %c0_i32_11] : memref<9x256x128xbf16, #tpu.memory_space<vmem>> -> memref<1x256x128xbf16, #tpu.memory_space<vmem>>
    %9 = tpu.memref_squeeze %8 : memref<1x256x128xbf16, #tpu.memory_space<vmem>> -> memref<256x128xbf16, #tpu.memory_space<vmem>>
    %10 = tpu.memref_slice %arg12[%c1_i32_7] : memref<9x!tpu.dma_semaphore, #tpu.memory_space<semaphore_mem>> -> memref<1x!tpu.dma_semaphore, #tpu.memory_space<semaphore_mem>>
    %11 = tpu.memref_squeeze %10 : memref<1x!tpu.dma_semaphore, #tpu.memory_space<semaphore_mem>> -> memref<!tpu.dma_semaphore, #tpu.memory_space<semaphore_mem>>
    tpu.enqueue_dma source(%7 : memref<256x128xbf16, #tpu.memory_space<any>>) target(%9 : memref<256x128xbf16, #tpu.memory_space<vmem>>) target_semaphore(%11 : memref<!tpu.dma_semaphore, #tpu.memory_space<semaphore_mem>>)
    %c2_i32 = arith.constant 2 : i32
    %c2_i32_12 = arith.constant 2 : i32
    %c2_i32_13 = arith.constant 2 : i32
    %c0_i32_14 = arith.constant 0 : i32
    %c0_i32_15 = arith.constant 0 : i32
    %12 = tpu.memref_slice %arg4[%c2_i32, %c0_i32_14, %c0_i32_15] : memref<9x256x128xbf16, #tpu.memory_space<any>> -> memref<1x256x128xbf16, #tpu.memory_space<any>>
    %13 = tpu.memref_squeeze %12 : memref<1x256x128xbf16, #tpu.memory_space<any>> -> memref<256x128xbf16, #tpu.memory_space<any>>
    %c0_i32_16 = arith.constant 0 : i32
    %c0_i32_17 = arith.constant 0 : i32
    %14 = tpu.memref_slice %arg11[%c2_i32_12, %c0_i32_16, %c0_i32_17] : memref<9x256x128xbf16, #tpu.memory_space<vmem>> -> memref<1x256x128xbf16, #tpu.memory_space<vmem>>
    %15 = tpu.memref_squeeze %14 : memref<1x256x128xbf16, #tpu.memory_space<vmem>> -> memref<256x128xbf16, #tpu.memory_space<vmem>>
    %16 = tpu.memref_slice %arg12[%c2_i32_13] : memref<9x!tpu.dma_semaphore, #tpu.memory_space<semaphore_mem>> -> memref<1x!tpu.dma_semaphore, #tpu.memory_space<semaphore_mem>>
    %17 = tpu.memref_squeeze %16 : memref<1x!tpu.dma_semaphore, #tpu.memory_space<semaphore_mem>> -> memref<!tpu.dma_semaphore, #tpu.memory_space<semaphore_mem>>
    tpu.enqueue_dma source(%13 : memref<256x128xbf16, #tpu.memory_space<any>>) target(%15 : memref<256x128xbf16, #tpu.memory_space<vmem>>) target_semaphore(%17 : memref<!tpu.dma_semaphore, #tpu.memory_space<semaphore_mem>>)
    %c3_i32 = arith.constant 3 : i32
    %c3_i32_18 = arith.constant 3 : i32
    %c3_i32_19 = arith.constant 3 : i32
    %c0_i32_20 = arith.constant 0 : i32
    %c0_i32_21 = arith.constant 0 : i32
    %18 = tpu.memref_slice %arg4[%c3_i32, %c0_i32_20, %c0_i32_21] : memref<9x256x128xbf16, #tpu.memory_space<any>> -> memref<1x256x128xbf16, #tpu.memory_space<any>>
    %19 = tpu.memref_squeeze %18 : memref<1x256x128xbf16, #tpu.memory_space<any>> -> memref<256x128xbf16, #tpu.memory_space<any>>
    %c0_i32_22 = arith.constant 0 : i32
    %c0_i32_23 = arith.constant 0 : i32
    %20 = tpu.memref_slice %arg11[%c3_i32_18, %c0_i32_22, %c0_i32_23] : memref<9x256x128xbf16, #tpu.memory_space<vmem>> -> memref<1x256x128xbf16, #tpu.memory_space<vmem>>
    %21 = tpu.memref_squeeze %20 : memref<1x256x128xbf16, #tpu.memory_space<vmem>> -> memref<256x128xbf16, #tpu.memory_space<vmem>>
    %22 = tpu.memref_slice %arg12[%c3_i32_19] : memref<9x!tpu.dma_semaphore, #tpu.memory_space<semaphore_mem>> -> memref<1x!tpu.dma_semaphore, #tpu.memory_space<semaphore_mem>>
    %23 = tpu.memref_squeeze %22 : memref<1x!tpu.dma_semaphore, #tpu.memory_space<semaphore_mem>> -> memref<!tpu.dma_semaphore, #tpu.memory_space<semaphore_mem>>
    tpu.enqueue_dma source(%19 : memref<256x128xbf16, #tpu.memory_space<any>>) target(%21 : memref<256x128xbf16, #tpu.memory_space<vmem>>) target_semaphore(%23 : memref<!tpu.dma_semaphore, #tpu.memory_space<semaphore_mem>>)
    %c4_i32 = arith.constant 4 : i32
    %c4_i32_24 = arith.constant 4 : i32
    %c4_i32_25 = arith.constant 4 : i32
    %c0_i32_26 = arith.constant 0 : i32
    %c0_i32_27 = arith.constant 0 : i32
    %24 = tpu.memref_slice %arg4[%c4_i32, %c0_i32_26, %c0_i32_27] : memref<9x256x128xbf16, #tpu.memory_space<any>> -> memref<1x256x128xbf16, #tpu.memory_space<any>>
    %25 = tpu.memref_squeeze %24 : memref<1x256x128xbf16, #tpu.memory_space<any>> -> memref<256x128xbf16, #tpu.memory_space<any>>
    %c0_i32_28 = arith.constant 0 : i32
    %c0_i32_29 = arith.constant 0 : i32
    %26 = tpu.memref_slice %arg11[%c4_i32_24, %c0_i32_28, %c0_i32_29] : memref<9x256x128xbf16, #tpu.memory_space<vmem>> -> memref<1x256x128xbf16, #tpu.memory_space<vmem>>
    %27 = tpu.memref_squeeze %26 : memref<1x256x128xbf16, #tpu.memory_space<vmem>> -> memref<256x128xbf16, #tpu.memory_space<vmem>>
    %28 = tpu.memref_slice %arg12[%c4_i32_25] : memref<9x!tpu.dma_semaphore, #tpu.memory_space<semaphore_mem>> -> memref<1x!tpu.dma_semaphore, #tpu.memory_space<semaphore_mem>>
    %29 = tpu.memref_squeeze %28 : memref<1x!tpu.dma_semaphore, #tpu.memory_space<semaphore_mem>> -> memref<!tpu.dma_semaphore, #tpu.memory_space<semaphore_mem>>
    tpu.enqueue_dma source(%25 : memref<256x128xbf16, #tpu.memory_space<any>>) target(%27 : memref<256x128xbf16, #tpu.memory_space<vmem>>) target_semaphore(%29 : memref<!tpu.dma_semaphore, #tpu.memory_space<semaphore_mem>>)
    %c5_i32 = arith.constant 5 : i32
    %c5_i32_30 = arith.constant 5 : i32
    %c5_i32_31 = arith.constant 5 : i32
    %c0_i32_32 = arith.constant 0 : i32
    %c0_i32_33 = arith.constant 0 : i32
    %30 = tpu.memref_slice %arg4[%c5_i32, %c0_i32_32, %c0_i32_33] : memref<9x256x128xbf16, #tpu.memory_space<any>> -> memref<1x256x128xbf16, #tpu.memory_space<any>>
    %31 = tpu.memref_squeeze %30 : memref<1x256x128xbf16, #tpu.memory_space<any>> -> memref<256x128xbf16, #tpu.memory_space<any>>
    %c0_i32_34 = arith.constant 0 : i32
    %c0_i32_35 = arith.constant 0 : i32
    %32 = tpu.memref_slice %arg11[%c5_i32_30, %c0_i32_34, %c0_i32_35] : memref<9x256x128xbf16, #tpu.memory_space<vmem>> -> memref<1x256x128xbf16, #tpu.memory_space<vmem>>
    %33 = tpu.memref_squeeze %32 : memref<1x256x128xbf16, #tpu.memory_space<vmem>> -> memref<256x128xbf16, #tpu.memory_space<vmem>>
    %34 = tpu.memref_slice %arg12[%c5_i32_31] : memref<9x!tpu.dma_semaphore, #tpu.memory_space<semaphore_mem>> -> memref<1x!tpu.dma_semaphore, #tpu.memory_space<semaphore_mem>>
    %35 = tpu.memref_squeeze %34 : memref<1x!tpu.dma_semaphore, #tpu.memory_space<semaphore_mem>> -> memref<!tpu.dma_semaphore, #tpu.memory_space<semaphore_mem>>
    tpu.enqueue_dma source(%31 : memref<256x128xbf16, #tpu.memory_space<any>>) target(%33 : memref<256x128xbf16, #tpu.memory_space<vmem>>) target_semaphore(%35 : memref<!tpu.dma_semaphore, #tpu.memory_space<semaphore_mem>>)
    %c6_i32 = arith.constant 6 : i32
    %c6_i32_36 = arith.constant 6 : i32
    %c6_i32_37 = arith.constant 6 : i32
    %c0_i32_38 = arith.constant 0 : i32
    %c0_i32_39 = arith.constant 0 : i32
    %36 = tpu.memref_slice %arg4[%c6_i32, %c0_i32_38, %c0_i32_39] : memref<9x256x128xbf16, #tpu.memory_space<any>> -> memref<1x256x128xbf16, #tpu.memory_space<any>>
    %37 = tpu.memref_squeeze %36 : memref<1x256x128xbf16, #tpu.memory_space<any>> -> memref<256x128xbf16, #tpu.memory_space<any>>
    %c0_i32_40 = arith.constant 0 : i32
    %c0_i32_41 = arith.constant 0 : i32
    %38 = tpu.memref_slice %arg11[%c6_i32_36, %c0_i32_40, %c0_i32_41] : memref<9x256x128xbf16, #tpu.memory_space<vmem>> -> memref<1x256x128xbf16, #tpu.memory_space<vmem>>
    %39 = tpu.memref_squeeze %38 : memref<1x256x128xbf16, #tpu.memory_space<vmem>> -> memref<256x128xbf16, #tpu.memory_space<vmem>>
    %40 = tpu.memref_slice %arg12[%c6_i32_37] : memref<9x!tpu.dma_semaphore, #tpu.memory_space<semaphore_mem>> -> memref<1x!tpu.dma_semaphore, #tpu.memory_space<semaphore_mem>>
    %41 = tpu.memref_squeeze %40 : memref<1x!tpu.dma_semaphore, #tpu.memory_space<semaphore_mem>> -> memref<!tpu.dma_semaphore, #tpu.memory_space<semaphore_mem>>
    tpu.enqueue_dma source(%37 : memref<256x128xbf16, #tpu.memory_space<any>>) target(%39 : memref<256x128xbf16, #tpu.memory_space<vmem>>) target_semaphore(%41 : memref<!tpu.dma_semaphore, #tpu.memory_space<semaphore_mem>>)
    %c7_i32 = arith.constant 7 : i32
    %c7_i32_42 = arith.constant 7 : i32
    %c7_i32_43 = arith.constant 7 : i32
    %c0_i32_44 = arith.constant 0 : i32
    %c0_i32_45 = arith.constant 0 : i32
    %42 = tpu.memref_slice %arg4[%c7_i32, %c0_i32_44, %c0_i32_45] : memref<9x256x128xbf16, #tpu.memory_space<any>> -> memref<1x256x128xbf16, #tpu.memory_space<any>>
    %43 = tpu.memref_squeeze %42 : memref<1x256x128xbf16, #tpu.memory_space<any>> -> memref<256x128xbf16, #tpu.memory_space<any>>
    %c0_i32_46 = arith.constant 0 : i32
    %c0_i32_47 = arith.constant 0 : i32
    %44 = tpu.memref_slice %arg11[%c7_i32_42, %c0_i32_46, %c0_i32_47] : memref<9x256x128xbf16, #tpu.memory_space<vmem>> -> memref<1x256x128xbf16, #tpu.memory_space<vmem>>
    %45 = tpu.memref_squeeze %44 : memref<1x256x128xbf16, #tpu.memory_space<vmem>> -> memref<256x128xbf16, #tpu.memory_space<vmem>>
    %46 = tpu.memref_slice %arg12[%c7_i32_43] : memref<9x!tpu.dma_semaphore, #tpu.memory_space<semaphore_mem>> -> memref<1x!tpu.dma_semaphore, #tpu.memory_space<semaphore_mem>>
    %47 = tpu.memref_squeeze %46 : memref<1x!tpu.dma_semaphore, #tpu.memory_space<semaphore_mem>> -> memref<!tpu.dma_semaphore, #tpu.memory_space<semaphore_mem>>
    tpu.enqueue_dma source(%43 : memref<256x128xbf16, #tpu.memory_space<any>>) target(%45 : memref<256x128xbf16, #tpu.memory_space<vmem>>) target_semaphore(%47 : memref<!tpu.dma_semaphore, #tpu.memory_space<semaphore_mem>>)
    %c8_i32 = arith.constant 8 : i32
    %c8_i32_48 = arith.constant 8 : i32
    %c8_i32_49 = arith.constant 8 : i32
    %c0_i32_50 = arith.constant 0 : i32
    %c0_i32_51 = arith.constant 0 : i32
    %48 = tpu.memref_slice %arg4[%c8_i32, %c0_i32_50, %c0_i32_51] : memref<9x256x128xbf16, #tpu.memory_space<any>> -> memref<1x256x128xbf16, #tpu.memory_space<any>>
    %49 = tpu.memref_squeeze %48 : memref<1x256x128xbf16, #tpu.memory_space<any>> -> memref<256x128xbf16, #tpu.memory_space<any>>
    %c0_i32_52 = arith.constant 0 : i32
    %c0_i32_53 = arith.constant 0 : i32
    %50 = tpu.memref_slice %arg11[%c8_i32_48, %c0_i32_52, %c0_i32_53] : memref<9x256x128xbf16, #tpu.memory_space<vmem>> -> memref<1x256x128xbf16, #tpu.memory_space<vmem>>
    %51 = tpu.memref_squeeze %50 : memref<1x256x128xbf16, #tpu.memory_space<vmem>> -> memref<256x128xbf16, #tpu.memory_space<vmem>>
    %52 = tpu.memref_slice %arg12[%c8_i32_49] : memref<9x!tpu.dma_semaphore, #tpu.memory_space<semaphore_mem>> -> memref<1x!tpu.dma_semaphore, #tpu.memory_space<semaphore_mem>>
    %53 = tpu.memref_squeeze %52 : memref<1x!tpu.dma_semaphore, #tpu.memory_space<semaphore_mem>> -> memref<!tpu.dma_semaphore, #tpu.memory_space<semaphore_mem>>
    tpu.enqueue_dma source(%49 : memref<256x128xbf16, #tpu.memory_space<any>>) target(%51 : memref<256x128xbf16, #tpu.memory_space<vmem>>) target_semaphore(%53 : memref<!tpu.dma_semaphore, #tpu.memory_space<semaphore_mem>>)
    %c0 = arith.constant 0 : index
    %c0_54 = arith.constant 0 : index
    %54 = vector.load %arg0[%c0, %c0_54] : memref<128x288xbf16, #tpu.memory_space<vmem>>, vector<128x288xbf16>
    %c0_55 = arith.constant 0 : index
    %c0_56 = arith.constant 0 : index
    %55 = vector.load %arg1[%c0_55, %c0_56] : memref<288x256xbf16, #tpu.memory_space<vmem>>, vector<288x256xbf16>
    %cst = arith.constant dense<0.000000e+00> : vector<128x256xf32>
    %56 = tpu.matmul %54, %55, %cst {dimension_numbers = #tpu.dot_dimension_numbers<[1], [0], [0], [1], [0, 0, 1, 1], [], []>} : vector<128x288xbf16>, vector<288x256xbf16>, vector<128x256xf32> -> vector<128x256xf32>
    %c0_57 = arith.constant 0 : index
    %c0_58 = arith.constant 0 : index
    %57 = vector.load %arg2[%c0_57, %c0_58] : memref<1x256xf32, #tpu.memory_space<vmem>>, vector<1x256xf32>
    %58 = vector.broadcast %57 : vector<1x256xf32> to vector<128x256xf32>
    %59 = arith.mulf %56, %58 : vector<128x256xf32>
    %c0_59 = arith.constant 0 : index
    %c0_60 = arith.constant 0 : index
    %60 = vector.load %arg3[%c0_59, %c0_60] : memref<1x256xf32, #tpu.memory_space<vmem>>, vector<1x256xf32>
    %61 = vector.broadcast %60 : vector<1x256xf32> to vector<128x256xf32>
    %62 = arith.addf %59, %61 : vector<128x256xf32>
    %cst_61 = arith.constant 0.000000e+00 : f32
    %63 = vector.broadcast %cst_61 : f32 to vector<128x256xf32>
    %64 = arith.maximumf %62, %63 : vector<128x256xf32>
    %c9_i32 = arith.constant 9 : i32
    %65 = tpu.dynamic_rotate %64 by %c9_i32 dim 0 : vector<128x256xf32>, i32 -> vector<128x256xf32>
    %c0_62 = arith.constant 0 : index
    %c0_63 = arith.constant 0 : index
    %66 = vector.load %arg9[%c0_62, %c0_63] : memref<128x9xf32, #tpu.memory_space<vmem>>, vector<128x1xf32>
    %67 = vector.broadcast %66 : vector<128x1xf32> to vector<128x256xf32>
    %68 = arith.mulf %65, %67 : vector<128x256xf32>
    %c0_i32_64 = arith.constant 0 : i32
    %c0_i32_65 = arith.constant 0 : i32
    %c0_i32_66 = arith.constant 0 : i32
    %c0_i32_67 = arith.constant 0 : i32
    %c0_i32_68 = arith.constant 0 : i32
    %69 = tpu.memref_slice %arg4[%c0_i32_64, %c0_i32_67, %c0_i32_68] : memref<9x256x128xbf16, #tpu.memory_space<any>> -> memref<1x256x128xbf16, #tpu.memory_space<any>>
    %70 = tpu.memref_squeeze %69 : memref<1x256x128xbf16, #tpu.memory_space<any>> -> memref<256x128xbf16, #tpu.memory_space<any>>
    %c0_i32_69 = arith.constant 0 : i32
    %c0_i32_70 = arith.constant 0 : i32
    %71 = tpu.memref_slice %arg11[%c0_i32_65, %c0_i32_69, %c0_i32_70] : memref<9x256x128xbf16, #tpu.memory_space<vmem>> -> memref<1x256x128xbf16, #tpu.memory_space<vmem>>
    %72 = tpu.memref_squeeze %71 : memref<1x256x128xbf16, #tpu.memory_space<vmem>> -> memref<256x128xbf16, #tpu.memory_space<vmem>>
    %73 = tpu.memref_slice %arg12[%c0_i32_66] : memref<9x!tpu.dma_semaphore, #tpu.memory_space<semaphore_mem>> -> memref<1x!tpu.dma_semaphore, #tpu.memory_space<semaphore_mem>>
    %74 = tpu.memref_squeeze %73 : memref<1x!tpu.dma_semaphore, #tpu.memory_space<semaphore_mem>> -> memref<!tpu.dma_semaphore, #tpu.memory_space<semaphore_mem>>
    tpu.wait_dma2 semaphore(%74 : memref<!tpu.dma_semaphore, #tpu.memory_space<semaphore_mem>>) src(%70 : memref<256x128xbf16, #tpu.memory_space<any>>) dst(%72 : memref<256x128xbf16, #tpu.memory_space<vmem>>)
    %75 = arith.truncf %68 : vector<128x256xf32> to vector<128x256xbf16>
    %c0_71 = arith.constant 0 : index
    %c0_72 = arith.constant 0 : index
    %c0_73 = arith.constant 0 : index
    %76 = vector.load %arg11[%c0_71, %c0_72, %c0_73] : memref<9x256x128xbf16, #tpu.memory_space<vmem>>, vector<1x256x128xbf16>
    %77 = vector.shape_cast %76 : vector<1x256x128xbf16> to vector<256x128xbf16>
    %cst_74 = arith.constant dense<0.000000e+00> : vector<128x128xf32>
    %78 = tpu.matmul %75, %77, %cst_74 {dimension_numbers = #tpu.dot_dimension_numbers<[1], [0], [0], [1], [0, 0, 1, 1], [], []>} : vector<128x256xbf16>, vector<256x128xbf16>, vector<128x128xf32> -> vector<128x128xf32>
    %c8_i32_75 = arith.constant 8 : i32
    %79 = tpu.dynamic_rotate %64 by %c8_i32_75 dim 0 : vector<128x256xf32>, i32 -> vector<128x256xf32>
    %c0_76 = arith.constant 0 : index
    %c1 = arith.constant 1 : index
    %80 = vector.load %arg9[%c0_76, %c1] : memref<128x9xf32, #tpu.memory_space<vmem>>, vector<128x1xf32>
    %81 = vector.broadcast %80 : vector<128x1xf32> to vector<128x256xf32>
    %82 = arith.mulf %79, %81 : vector<128x256xf32>
    %c1_i32_77 = arith.constant 1 : i32
    %c1_i32_78 = arith.constant 1 : i32
    %c1_i32_79 = arith.constant 1 : i32
    %c0_i32_80 = arith.constant 0 : i32
    %c0_i32_81 = arith.constant 0 : i32
    %83 = tpu.memref_slice %arg4[%c1_i32_77, %c0_i32_80, %c0_i32_81] : memref<9x256x128xbf16, #tpu.memory_space<any>> -> memref<1x256x128xbf16, #tpu.memory_space<any>>
    %84 = tpu.memref_squeeze %83 : memref<1x256x128xbf16, #tpu.memory_space<any>> -> memref<256x128xbf16, #tpu.memory_space<any>>
    %c0_i32_82 = arith.constant 0 : i32
    %c0_i32_83 = arith.constant 0 : i32
    %85 = tpu.memref_slice %arg11[%c1_i32_78, %c0_i32_82, %c0_i32_83] : memref<9x256x128xbf16, #tpu.memory_space<vmem>> -> memref<1x256x128xbf16, #tpu.memory_space<vmem>>
    %86 = tpu.memref_squeeze %85 : memref<1x256x128xbf16, #tpu.memory_space<vmem>> -> memref<256x128xbf16, #tpu.memory_space<vmem>>
    %87 = tpu.memref_slice %arg12[%c1_i32_79] : memref<9x!tpu.dma_semaphore, #tpu.memory_space<semaphore_mem>> -> memref<1x!tpu.dma_semaphore, #tpu.memory_space<semaphore_mem>>
    %88 = tpu.memref_squeeze %87 : memref<1x!tpu.dma_semaphore, #tpu.memory_space<semaphore_mem>> -> memref<!tpu.dma_semaphore, #tpu.memory_space<semaphore_mem>>
    tpu.wait_dma2 semaphore(%88 : memref<!tpu.dma_semaphore, #tpu.memory_space<semaphore_mem>>) src(%84 : memref<256x128xbf16, #tpu.memory_space<any>>) dst(%86 : memref<256x128xbf16, #tpu.memory_space<vmem>>)
    %89 = arith.truncf %82 : vector<128x256xf32> to vector<128x256xbf16>
    %c1_84 = arith.constant 1 : index
    %c0_85 = arith.constant 0 : index
    %c0_86 = arith.constant 0 : index
    %90 = vector.load %arg11[%c1_84, %c0_85, %c0_86] : memref<9x256x128xbf16, #tpu.memory_space<vmem>>, vector<1x256x128xbf16>
    %91 = vector.shape_cast %90 : vector<1x256x128xbf16> to vector<256x128xbf16>
    %cst_87 = arith.constant dense<0.000000e+00> : vector<128x128xf32>
    %92 = tpu.matmul %89, %91, %cst_87 {dimension_numbers = #tpu.dot_dimension_numbers<[1], [0], [0], [1], [0, 0, 1, 1], [], []>} : vector<128x256xbf16>, vector<256x128xbf16>, vector<128x128xf32> -> vector<128x128xf32>
    %93 = arith.addf %78, %92 : vector<128x128xf32>
    %c7_i32_88 = arith.constant 7 : i32
    %94 = tpu.dynamic_rotate %64 by %c7_i32_88 dim 0 : vector<128x256xf32>, i32 -> vector<128x256xf32>
    %c0_89 = arith.constant 0 : index
    %c2 = arith.constant 2 : index
    %95 = vector.load %arg9[%c0_89, %c2] : memref<128x9xf32, #tpu.memory_space<vmem>>, vector<128x1xf32>
    %96 = vector.broadcast %95 : vector<128x1xf32> to vector<128x256xf32>
    %97 = arith.mulf %94, %96 : vector<128x256xf32>
    %c2_i32_90 = arith.constant 2 : i32
    %c2_i32_91 = arith.constant 2 : i32
    %c2_i32_92 = arith.constant 2 : i32
    %c0_i32_93 = arith.constant 0 : i32
    %c0_i32_94 = arith.constant 0 : i32
    %98 = tpu.memref_slice %arg4[%c2_i32_90, %c0_i32_93, %c0_i32_94] : memref<9x256x128xbf16, #tpu.memory_space<any>> -> memref<1x256x128xbf16, #tpu.memory_space<any>>
    %99 = tpu.memref_squeeze %98 : memref<1x256x128xbf16, #tpu.memory_space<any>> -> memref<256x128xbf16, #tpu.memory_space<any>>
    %c0_i32_95 = arith.constant 0 : i32
    %c0_i32_96 = arith.constant 0 : i32
    %100 = tpu.memref_slice %arg11[%c2_i32_91, %c0_i32_95, %c0_i32_96] : memref<9x256x128xbf16, #tpu.memory_space<vmem>> -> memref<1x256x128xbf16, #tpu.memory_space<vmem>>
    %101 = tpu.memref_squeeze %100 : memref<1x256x128xbf16, #tpu.memory_space<vmem>> -> memref<256x128xbf16, #tpu.memory_space<vmem>>
    %102 = tpu.memref_slice %arg12[%c2_i32_92] : memref<9x!tpu.dma_semaphore, #tpu.memory_space<semaphore_mem>> -> memref<1x!tpu.dma_semaphore, #tpu.memory_space<semaphore_mem>>
    %103 = tpu.memref_squeeze %102 : memref<1x!tpu.dma_semaphore, #tpu.memory_space<semaphore_mem>> -> memref<!tpu.dma_semaphore, #tpu.memory_space<semaphore_mem>>
    tpu.wait_dma2 semaphore(%103 : memref<!tpu.dma_semaphore, #tpu.memory_space<semaphore_mem>>) src(%99 : memref<256x128xbf16, #tpu.memory_space<any>>) dst(%101 : memref<256x128xbf16, #tpu.memory_space<vmem>>)
    %104 = arith.truncf %97 : vector<128x256xf32> to vector<128x256xbf16>
    %c2_97 = arith.constant 2 : index
    %c0_98 = arith.constant 0 : index
    %c0_99 = arith.constant 0 : index
    %105 = vector.load %arg11[%c2_97, %c0_98, %c0_99] : memref<9x256x128xbf16, #tpu.memory_space<vmem>>, vector<1x256x128xbf16>
    %106 = vector.shape_cast %105 : vector<1x256x128xbf16> to vector<256x128xbf16>
    %cst_100 = arith.constant dense<0.000000e+00> : vector<128x128xf32>
    %107 = tpu.matmul %104, %106, %cst_100 {dimension_numbers = #tpu.dot_dimension_numbers<[1], [0], [0], [1], [0, 0, 1, 1], [], []>} : vector<128x256xbf16>, vector<256x128xbf16>, vector<128x128xf32> -> vector<128x128xf32>
    %108 = arith.addf %93, %107 : vector<128x128xf32>
    %c1_i32_101 = arith.constant 1 : i32
    %109 = tpu.dynamic_rotate %64 by %c1_i32_101 dim 0 : vector<128x256xf32>, i32 -> vector<128x256xf32>
    %c0_102 = arith.constant 0 : index
    %c3 = arith.constant 3 : index
    %110 = vector.load %arg9[%c0_102, %c3] : memref<128x9xf32, #tpu.memory_space<vmem>>, vector<128x1xf32>
    %111 = vector.broadcast %110 : vector<128x1xf32> to vector<128x256xf32>
    %112 = arith.mulf %109, %111 : vector<128x256xf32>
    %c3_i32_103 = arith.constant 3 : i32
    %c3_i32_104 = arith.constant 3 : i32
    %c3_i32_105 = arith.constant 3 : i32
    %c0_i32_106 = arith.constant 0 : i32
    %c0_i32_107 = arith.constant 0 : i32
    %113 = tpu.memref_slice %arg4[%c3_i32_103, %c0_i32_106, %c0_i32_107] : memref<9x256x128xbf16, #tpu.memory_space<any>> -> memref<1x256x128xbf16, #tpu.memory_space<any>>
    %114 = tpu.memref_squeeze %113 : memref<1x256x128xbf16, #tpu.memory_space<any>> -> memref<256x128xbf16, #tpu.memory_space<any>>
    %c0_i32_108 = arith.constant 0 : i32
    %c0_i32_109 = arith.constant 0 : i32
    %115 = tpu.memref_slice %arg11[%c3_i32_104, %c0_i32_108, %c0_i32_109] : memref<9x256x128xbf16, #tpu.memory_space<vmem>> -> memref<1x256x128xbf16, #tpu.memory_space<vmem>>
    %116 = tpu.memref_squeeze %115 : memref<1x256x128xbf16, #tpu.memory_space<vmem>> -> memref<256x128xbf16, #tpu.memory_space<vmem>>
    %117 = tpu.memref_slice %arg12[%c3_i32_105] : memref<9x!tpu.dma_semaphore, #tpu.memory_space<semaphore_mem>> -> memref<1x!tpu.dma_semaphore, #tpu.memory_space<semaphore_mem>>
    %118 = tpu.memref_squeeze %117 : memref<1x!tpu.dma_semaphore, #tpu.memory_space<semaphore_mem>> -> memref<!tpu.dma_semaphore, #tpu.memory_space<semaphore_mem>>
    tpu.wait_dma2 semaphore(%118 : memref<!tpu.dma_semaphore, #tpu.memory_space<semaphore_mem>>) src(%114 : memref<256x128xbf16, #tpu.memory_space<any>>) dst(%116 : memref<256x128xbf16, #tpu.memory_space<vmem>>)
    %119 = arith.truncf %112 : vector<128x256xf32> to vector<128x256xbf16>
    %c3_110 = arith.constant 3 : index
    %c0_111 = arith.constant 0 : index
    %c0_112 = arith.constant 0 : index
    %120 = vector.load %arg11[%c3_110, %c0_111, %c0_112] : memref<9x256x128xbf16, #tpu.memory_space<vmem>>, vector<1x256x128xbf16>
    %121 = vector.shape_cast %120 : vector<1x256x128xbf16> to vector<256x128xbf16>
    %cst_113 = arith.constant dense<0.000000e+00> : vector<128x128xf32>
    %122 = tpu.matmul %119, %121, %cst_113 {dimension_numbers = #tpu.dot_dimension_numbers<[1], [0], [0], [1], [0, 0, 1, 1], [], []>} : vector<128x256xbf16>, vector<256x128xbf16>, vector<128x128xf32> -> vector<128x128xf32>
    %123 = arith.addf %108, %122 : vector<128x128xf32>
    %c4_i32_114 = arith.constant 4 : i32
    %c4_i32_115 = arith.constant 4 : i32
    %c4_i32_116 = arith.constant 4 : i32
    %c0_i32_117 = arith.constant 0 : i32
    %c0_i32_118 = arith.constant 0 : i32
    %124 = tpu.memref_slice %arg4[%c4_i32_114, %c0_i32_117, %c0_i32_118] : memref<9x256x128xbf16, #tpu.memory_space<any>> -> memref<1x256x128xbf16, #tpu.memory_space<any>>
    %125 = tpu.memref_squeeze %124 : memref<1x256x128xbf16, #tpu.memory_space<any>> -> memref<256x128xbf16, #tpu.memory_space<any>>
    %c0_i32_119 = arith.constant 0 : i32
    %c0_i32_120 = arith.constant 0 : i32
    %126 = tpu.memref_slice %arg11[%c4_i32_115, %c0_i32_119, %c0_i32_120] : memref<9x256x128xbf16, #tpu.memory_space<vmem>> -> memref<1x256x128xbf16, #tpu.memory_space<vmem>>
    %127 = tpu.memref_squeeze %126 : memref<1x256x128xbf16, #tpu.memory_space<vmem>> -> memref<256x128xbf16, #tpu.memory_space<vmem>>
    %128 = tpu.memref_slice %arg12[%c4_i32_116] : memref<9x!tpu.dma_semaphore, #tpu.memory_space<semaphore_mem>> -> memref<1x!tpu.dma_semaphore, #tpu.memory_space<semaphore_mem>>
    %129 = tpu.memref_squeeze %128 : memref<1x!tpu.dma_semaphore, #tpu.memory_space<semaphore_mem>> -> memref<!tpu.dma_semaphore, #tpu.memory_space<semaphore_mem>>
    tpu.wait_dma2 semaphore(%129 : memref<!tpu.dma_semaphore, #tpu.memory_space<semaphore_mem>>) src(%125 : memref<256x128xbf16, #tpu.memory_space<any>>) dst(%127 : memref<256x128xbf16, #tpu.memory_space<vmem>>)
    %130 = arith.truncf %64 : vector<128x256xf32> to vector<128x256xbf16>
    %c4 = arith.constant 4 : index
    %c0_121 = arith.constant 0 : index
    %c0_122 = arith.constant 0 : index
    %131 = vector.load %arg11[%c4, %c0_121, %c0_122] : memref<9x256x128xbf16, #tpu.memory_space<vmem>>, vector<1x256x128xbf16>
    %132 = vector.shape_cast %131 : vector<1x256x128xbf16> to vector<256x128xbf16>
    %cst_123 = arith.constant dense<0.000000e+00> : vector<128x128xf32>
    %133 = tpu.matmul %130, %132, %cst_123 {dimension_numbers = #tpu.dot_dimension_numbers<[1], [0], [0], [1], [0, 0, 1, 1], [], []>} : vector<128x256xbf16>, vector<256x128xbf16>, vector<128x128xf32> -> vector<128x128xf32>
    %134 = arith.addf %123, %133 : vector<128x128xf32>
    %c127_i32 = arith.constant 127 : i32
    %135 = tpu.dynamic_rotate %64 by %c127_i32 dim 0 : vector<128x256xf32>, i32 -> vector<128x256xf32>
    %c0_124 = arith.constant 0 : index
    %c5 = arith.constant 5 : index
    %136 = vector.load %arg9[%c0_124, %c5] : memref<128x9xf32, #tpu.memory_space<vmem>>, vector<128x1xf32>
    %137 = vector.broadcast %136 : vector<128x1xf32> to vector<128x256xf32>
    %138 = arith.mulf %135, %137 : vector<128x256xf32>
    %c5_i32_125 = arith.constant 5 : i32
    %c5_i32_126 = arith.constant 5 : i32
    %c5_i32_127 = arith.constant 5 : i32
    %c0_i32_128 = arith.constant 0 : i32
    %c0_i32_129 = arith.constant 0 : i32
    %139 = tpu.memref_slice %arg4[%c5_i32_125, %c0_i32_128, %c0_i32_129] : memref<9x256x128xbf16, #tpu.memory_space<any>> -> memref<1x256x128xbf16, #tpu.memory_space<any>>
    %140 = tpu.memref_squeeze %139 : memref<1x256x128xbf16, #tpu.memory_space<any>> -> memref<256x128xbf16, #tpu.memory_space<any>>
    %c0_i32_130 = arith.constant 0 : i32
    %c0_i32_131 = arith.constant 0 : i32
    %141 = tpu.memref_slice %arg11[%c5_i32_126, %c0_i32_130, %c0_i32_131] : memref<9x256x128xbf16, #tpu.memory_space<vmem>> -> memref<1x256x128xbf16, #tpu.memory_space<vmem>>
    %142 = tpu.memref_squeeze %141 : memref<1x256x128xbf16, #tpu.memory_space<vmem>> -> memref<256x128xbf16, #tpu.memory_space<vmem>>
    %143 = tpu.memref_slice %arg12[%c5_i32_127] : memref<9x!tpu.dma_semaphore, #tpu.memory_space<semaphore_mem>> -> memref<1x!tpu.dma_semaphore, #tpu.memory_space<semaphore_mem>>
    %144 = tpu.memref_squeeze %143 : memref<1x!tpu.dma_semaphore, #tpu.memory_space<semaphore_mem>> -> memref<!tpu.dma_semaphore, #tpu.memory_space<semaphore_mem>>
    tpu.wait_dma2 semaphore(%144 : memref<!tpu.dma_semaphore, #tpu.memory_space<semaphore_mem>>) src(%140 : memref<256x128xbf16, #tpu.memory_space<any>>) dst(%142 : memref<256x128xbf16, #tpu.memory_space<vmem>>)
    %145 = arith.truncf %138 : vector<128x256xf32> to vector<128x256xbf16>
    %c5_132 = arith.constant 5 : index
    %c0_133 = arith.constant 0 : index
    %c0_134 = arith.constant 0 : index
    %146 = vector.load %arg11[%c5_132, %c0_133, %c0_134] : memref<9x256x128xbf16, #tpu.memory_space<vmem>>, vector<1x256x128xbf16>
    %147 = vector.shape_cast %146 : vector<1x256x128xbf16> to vector<256x128xbf16>
    %cst_135 = arith.constant dense<0.000000e+00> : vector<128x128xf32>
    %148 = tpu.matmul %145, %147, %cst_135 {dimension_numbers = #tpu.dot_dimension_numbers<[1], [0], [0], [1], [0, 0, 1, 1], [], []>} : vector<128x256xbf16>, vector<256x128xbf16>, vector<128x128xf32> -> vector<128x128xf32>
    %149 = arith.addf %134, %148 : vector<128x128xf32>
    %c121_i32 = arith.constant 121 : i32
    %150 = tpu.dynamic_rotate %64 by %c121_i32 dim 0 : vector<128x256xf32>, i32 -> vector<128x256xf32>
    %c0_136 = arith.constant 0 : index
    %c6 = arith.constant 6 : index
    %151 = vector.load %arg9[%c0_136, %c6] : memref<128x9xf32, #tpu.memory_space<vmem>>, vector<128x1xf32>
    %152 = vector.broadcast %151 : vector<128x1xf32> to vector<128x256xf32>
    %153 = arith.mulf %150, %152 : vector<128x256xf32>
    %c6_i32_137 = arith.constant 6 : i32
    %c6_i32_138 = arith.constant 6 : i32
    %c6_i32_139 = arith.constant 6 : i32
    %c0_i32_140 = arith.constant 0 : i32
    %c0_i32_141 = arith.constant 0 : i32
    %154 = tpu.memref_slice %arg4[%c6_i32_137, %c0_i32_140, %c0_i32_141] : memref<9x256x128xbf16, #tpu.memory_space<any>> -> memref<1x256x128xbf16, #tpu.memory_space<any>>
    %155 = tpu.memref_squeeze %154 : memref<1x256x128xbf16, #tpu.memory_space<any>> -> memref<256x128xbf16, #tpu.memory_space<any>>
    %c0_i32_142 = arith.constant 0 : i32
    %c0_i32_143 = arith.constant 0 : i32
    %156 = tpu.memref_slice %arg11[%c6_i32_138, %c0_i32_142, %c0_i32_143] : memref<9x256x128xbf16, #tpu.memory_space<vmem>> -> memref<1x256x128xbf16, #tpu.memory_space<vmem>>
    %157 = tpu.memref_squeeze %156 : memref<1x256x128xbf16, #tpu.memory_space<vmem>> -> memref<256x128xbf16, #tpu.memory_space<vmem>>
    %158 = tpu.memref_slice %arg12[%c6_i32_139] : memref<9x!tpu.dma_semaphore, #tpu.memory_space<semaphore_mem>> -> memref<1x!tpu.dma_semaphore, #tpu.memory_space<semaphore_mem>>
    %159 = tpu.memref_squeeze %158 : memref<1x!tpu.dma_semaphore, #tpu.memory_space<semaphore_mem>> -> memref<!tpu.dma_semaphore, #tpu.memory_space<semaphore_mem>>
    tpu.wait_dma2 semaphore(%159 : memref<!tpu.dma_semaphore, #tpu.memory_space<semaphore_mem>>) src(%155 : memref<256x128xbf16, #tpu.memory_space<any>>) dst(%157 : memref<256x128xbf16, #tpu.memory_space<vmem>>)
    %160 = arith.truncf %153 : vector<128x256xf32> to vector<128x256xbf16>
    %c6_144 = arith.constant 6 : index
    %c0_145 = arith.constant 0 : index
    %c0_146 = arith.constant 0 : index
    %161 = vector.load %arg11[%c6_144, %c0_145, %c0_146] : memref<9x256x128xbf16, #tpu.memory_space<vmem>>, vector<1x256x128xbf16>
    %162 = vector.shape_cast %161 : vector<1x256x128xbf16> to vector<256x128xbf16>
    %cst_147 = arith.constant dense<0.000000e+00> : vector<128x128xf32>
    %163 = tpu.matmul %160, %162, %cst_147 {dimension_numbers = #tpu.dot_dimension_numbers<[1], [0], [0], [1], [0, 0, 1, 1], [], []>} : vector<128x256xbf16>, vector<256x128xbf16>, vector<128x128xf32> -> vector<128x128xf32>
    %164 = arith.addf %149, %163 : vector<128x128xf32>
    %c120_i32 = arith.constant 120 : i32
    %165 = tpu.dynamic_rotate %64 by %c120_i32 dim 0 : vector<128x256xf32>, i32 -> vector<128x256xf32>
    %c0_148 = arith.constant 0 : index
    %c7 = arith.constant 7 : index
    %166 = vector.load %arg9[%c0_148, %c7] : memref<128x9xf32, #tpu.memory_space<vmem>>, vector<128x1xf32>
    %167 = vector.broadcast %166 : vector<128x1xf32> to vector<128x256xf32>
    %168 = arith.mulf %165, %167 : vector<128x256xf32>
    %c7_i32_149 = arith.constant 7 : i32
    %c7_i32_150 = arith.constant 7 : i32
    %c7_i32_151 = arith.constant 7 : i32
    %c0_i32_152 = arith.constant 0 : i32
    %c0_i32_153 = arith.constant 0 : i32
    %169 = tpu.memref_slice %arg4[%c7_i32_149, %c0_i32_152, %c0_i32_153] : memref<9x256x128xbf16, #tpu.memory_space<any>> -> memref<1x256x128xbf16, #tpu.memory_space<any>>
    %170 = tpu.memref_squeeze %169 : memref<1x256x128xbf16, #tpu.memory_space<any>> -> memref<256x128xbf16, #tpu.memory_space<any>>
    %c0_i32_154 = arith.constant 0 : i32
    %c0_i32_155 = arith.constant 0 : i32
    %171 = tpu.memref_slice %arg11[%c7_i32_150, %c0_i32_154, %c0_i32_155] : memref<9x256x128xbf16, #tpu.memory_space<vmem>> -> memref<1x256x128xbf16, #tpu.memory_space<vmem>>
    %172 = tpu.memref_squeeze %171 : memref<1x256x128xbf16, #tpu.memory_space<vmem>> -> memref<256x128xbf16, #tpu.memory_space<vmem>>
    %173 = tpu.memref_slice %arg12[%c7_i32_151] : memref<9x!tpu.dma_semaphore, #tpu.memory_space<semaphore_mem>> -> memref<1x!tpu.dma_semaphore, #tpu.memory_space<semaphore_mem>>
    %174 = tpu.memref_squeeze %173 : memref<1x!tpu.dma_semaphore, #tpu.memory_space<semaphore_mem>> -> memref<!tpu.dma_semaphore, #tpu.memory_space<semaphore_mem>>
    tpu.wait_dma2 semaphore(%174 : memref<!tpu.dma_semaphore, #tpu.memory_space<semaphore_mem>>) src(%170 : memref<256x128xbf16, #tpu.memory_space<any>>) dst(%172 : memref<256x128xbf16, #tpu.memory_space<vmem>>)
    %175 = arith.truncf %168 : vector<128x256xf32> to vector<128x256xbf16>
    %c7_156 = arith.constant 7 : index
    %c0_157 = arith.constant 0 : index
    %c0_158 = arith.constant 0 : index
    %176 = vector.load %arg11[%c7_156, %c0_157, %c0_158] : memref<9x256x128xbf16, #tpu.memory_space<vmem>>, vector<1x256x128xbf16>
    %177 = vector.shape_cast %176 : vector<1x256x128xbf16> to vector<256x128xbf16>
    %cst_159 = arith.constant dense<0.000000e+00> : vector<128x128xf32>
    %178 = tpu.matmul %175, %177, %cst_159 {dimension_numbers = #tpu.dot_dimension_numbers<[1], [0], [0], [1], [0, 0, 1, 1], [], []>} : vector<128x256xbf16>, vector<256x128xbf16>, vector<128x128xf32> -> vector<128x128xf32>
    %179 = arith.addf %164, %178 : vector<128x128xf32>
    %c119_i32 = arith.constant 119 : i32
    %180 = tpu.dynamic_rotate %64 by %c119_i32 dim 0 : vector<128x256xf32>, i32 -> vector<128x256xf32>
    %c0_160 = arith.constant 0 : index
    %c8 = arith.constant 8 : index
    %181 = vector.load %arg9[%c0_160, %c8] : memref<128x9xf32, #tpu.memory_space<vmem>>, vector<128x1xf32>
    %182 = vector.broadcast %181 : vector<128x1xf32> to vector<128x256xf32>
    %183 = arith.mulf %180, %182 : vector<128x256xf32>
    %c8_i32_161 = arith.constant 8 : i32
    %c8_i32_162 = arith.constant 8 : i32
    %c8_i32_163 = arith.constant 8 : i32
    %c0_i32_164 = arith.constant 0 : i32
    %c0_i32_165 = arith.constant 0 : i32
    %184 = tpu.memref_slice %arg4[%c8_i32_161, %c0_i32_164, %c0_i32_165] : memref<9x256x128xbf16, #tpu.memory_space<any>> -> memref<1x256x128xbf16, #tpu.memory_space<any>>
    %185 = tpu.memref_squeeze %184 : memref<1x256x128xbf16, #tpu.memory_space<any>> -> memref<256x128xbf16, #tpu.memory_space<any>>
    %c0_i32_166 = arith.constant 0 : i32
    %c0_i32_167 = arith.constant 0 : i32
    %186 = tpu.memref_slice %arg11[%c8_i32_162, %c0_i32_166, %c0_i32_167] : memref<9x256x128xbf16, #tpu.memory_space<vmem>> -> memref<1x256x128xbf16, #tpu.memory_space<vmem>>
    %187 = tpu.memref_squeeze %186 : memref<1x256x128xbf16, #tpu.memory_space<vmem>> -> memref<256x128xbf16, #tpu.memory_space<vmem>>
    %188 = tpu.memref_slice %arg12[%c8_i32_163] : memref<9x!tpu.dma_semaphore, #tpu.memory_space<semaphore_mem>> -> memref<1x!tpu.dma_semaphore, #tpu.memory_space<semaphore_mem>>
    %189 = tpu.memref_squeeze %188 : memref<1x!tpu.dma_semaphore, #tpu.memory_space<semaphore_mem>> -> memref<!tpu.dma_semaphore, #tpu.memory_space<semaphore_mem>>
    tpu.wait_dma2 semaphore(%189 : memref<!tpu.dma_semaphore, #tpu.memory_space<semaphore_mem>>) src(%185 : memref<256x128xbf16, #tpu.memory_space<any>>) dst(%187 : memref<256x128xbf16, #tpu.memory_space<vmem>>)
    %190 = arith.truncf %183 : vector<128x256xf32> to vector<128x256xbf16>
    %c8_168 = arith.constant 8 : index
    %c0_169 = arith.constant 0 : index
    %c0_170 = arith.constant 0 : index
    %191 = vector.load %arg11[%c8_168, %c0_169, %c0_170] : memref<9x256x128xbf16, #tpu.memory_space<vmem>>, vector<1x256x128xbf16>
    %192 = vector.shape_cast %191 : vector<1x256x128xbf16> to vector<256x128xbf16>
    %cst_171 = arith.constant dense<0.000000e+00> : vector<128x128xf32>
    %193 = tpu.matmul %190, %192, %cst_171 {dimension_numbers = #tpu.dot_dimension_numbers<[1], [0], [0], [1], [0, 0, 1, 1], [], []>} : vector<128x256xbf16>, vector<256x128xbf16>, vector<128x128xf32> -> vector<128x128xf32>
    %194 = arith.addf %179, %193 : vector<128x128xf32>
    %c0_172 = arith.constant 0 : index
    %c0_173 = arith.constant 0 : index
    %195 = vector.load %arg5[%c0_172, %c0_173] : memref<1x128xf32, #tpu.memory_space<vmem>>, vector<1x128xf32>
    %196 = vector.broadcast %195 : vector<1x128xf32> to vector<128x128xf32>
    %197 = arith.mulf %194, %196 : vector<128x128xf32>
    %c0_174 = arith.constant 0 : index
    %c0_175 = arith.constant 0 : index
    %198 = vector.load %arg6[%c0_174, %c0_175] : memref<1x128xf32, #tpu.memory_space<vmem>>, vector<1x128xf32>
    %199 = vector.broadcast %198 : vector<1x128xf32> to vector<128x128xf32>
    %200 = arith.addf %197, %199 : vector<128x128xf32>
    %cst_176 = arith.constant 0.000000e+00 : f32
    %201 = vector.broadcast %cst_176 : f32 to vector<128x128xf32>
    %202 = arith.maximumf %200, %201 : vector<128x128xf32>
    %203 = arith.truncf %202 : vector<128x128xf32> to vector<128x128xbf16>
    %c0_177 = arith.constant 0 : index
    %c0_178 = arith.constant 0 : index
    %204 = vector.load %arg7[%c0_177, %c0_178] : memref<128x128xbf16, #tpu.memory_space<vmem>>, vector<128x128xbf16>
    %cst_179 = arith.constant dense<0.000000e+00> : vector<128x128xf32>
    %205 = tpu.matmul %203, %204, %cst_179 {dimension_numbers = #tpu.dot_dimension_numbers<[1], [0], [0], [1], [0, 0, 1, 1], [], []>} : vector<128x128xbf16>, vector<128x128xbf16>, vector<128x128xf32> -> vector<128x128xf32>
    %c0_180 = arith.constant 0 : index
    %c0_181 = arith.constant 0 : index
    %206 = vector.load %arg8[%c0_180, %c0_181] : memref<1x128xf32, #tpu.memory_space<vmem>>, vector<1x128xf32>
    %207 = vector.broadcast %206 : vector<1x128xf32> to vector<128x128xf32>
    %208 = arith.addf %205, %207 : vector<128x128xf32>
    %c0_182 = arith.constant 0 : index
    %c0_183 = arith.constant 0 : index
    %209 = vector.load %arg10[%c0_182, %c0_183] : memref<128x128xf32, #tpu.memory_space<vmem>>, vector<128x128xf32>
    tpu.vector_store %arg10[%c0_182, %c0_183], %208 {strides = array<i32>} : memref<128x128xf32, #tpu.memory_space<vmem>>, vector<128x128xf32>,
    return
  }
}

</mosaic_0001>

<bundles_post_ra>
// kernel: cnn_classifier_forward.1
= control target key start
LH: loop header
LB: loop body
LE: loop exit
PB: predicated region body
PF: predicated region fallthrough
CT: control target
= control target key end

     0   :  { %s9839_s0 = inlined_call_operand.vmem [shape: bf16[128,288], index: 0, kind: input, shape index: {}]   ;;  %s9840_s1 = inlined_call_operand.vmem [shape: bf16[288,256], index: 1, kind: input, shape index: {}]   ;;  %s9841_s2 = inlined_call_operand.vmem [shape: f32[1,256], index: 2, kind: input, shape index: {}]   ;;  %s9842_s3 = inlined_call_operand.vmem [shape: f32[1,256], index: 3, kind: input, shape index: {}]   ;;  %s9843_s4 = inlined_call_operand.vmem [shape: bf16[9,256,128], index: 4, kind: input, shape index: {}]   ;;  %s9844_s5 = inlined_call_operand.vmem [shape: f32[1,128], index: 5, kind: input, shape index: {}]   ;;  %s9845_s6 = inlined_call_operand.vmem [shape: f32[1,128], index: 6, kind: input, shape index: {}]   ;;  %s9846_s7 = inlined_call_operand.vmem [shape: bf16[128,128], index: 7, kind: input, shape index: {}]   ;;  %s9847_s8 = inlined_call_operand.vmem [shape: f32[1,128], index: 8, kind: input, shape index: {}]   ;;  %s9848_s9 = inlined_call_operand.vmem [shape: f32[128,9], index: 9, kind: input, shape index: {}]   ;;  %s9849_s10 = inlined_call_operand.vmem [shape: f32[128,128], index: 10, kind: output, shape index: {}]  }
   0x1   :  { %v67_v0 = vld [vmem:[%s9843_s4] sm:$0xff]  ;;  %v69_v1 = vld [vmem:[%s9843_s4 + $0x8] sm:$0xff]  ;;  %v71_v2 = vld [vmem:[%s9843_s4 + $0x10] sm:$0xff] }
   0x2   :  { %68 = vst [vmem:[#allocation2] sm:$0xff] %v67_v0  ;;  %70 = vst [vmem:[#allocation2 + $0x8] sm:$0xff] %v69_v1  ;;  %v73_v3 = vld [vmem:[%s9843_s4 + $0x18] sm:$0xff]  ;;  %v75_v4 = vld [vmem:[%s9843_s4 + $0x20] sm:$0xff] }
   0x3   :  { %72 = vst [vmem:[#allocation2 + $0x10] sm:$0xff] %v71_v2  ;;  %v77_v5 = vld [vmem:[%s9843_s4 + $0x28] sm:$0xff]  ;;  %74 = vst [vmem:[#allocation2 + $0x18] sm:$0xff] %v73_v3  ;;  %v79_v6 = vld [vmem:[%s9843_s4 + $0x30] sm:$0xff] }
   0x4   :  { %76 = vst [vmem:[#allocation2 + $0x20] sm:$0xff] %v75_v4  ;;  %78 = vst [vmem:[#allocation2 + $0x28] sm:$0xff] %v77_v5  ;;  %v81_v7 = vld [vmem:[%s9843_s4 + $0x38] sm:$0xff]  ;;  %v83_v8 = vld [vmem:[%s9843_s4 + $0x40] sm:$0xff] }
   0x5   :  { %80 = vst [vmem:[#allocation2 + $0x30] sm:$0xff] %v79_v6  ;;  %82 = vst [vmem:[#allocation2 + $0x38] sm:$0xff] %v81_v7  ;;  %v85_v9 = vld [vmem:[%s9843_s4 + $0x48] sm:$0xff]  ;;  %v87_v10 = vld [vmem:[%s9843_s4 + $0x50] sm:$0xff] }
   0x6   :  { %84 = vst [vmem:[#allocation2 + $0x40] sm:$0xff] %v83_v8  ;;  %v89_v11 = vld [vmem:[%s9843_s4 + $0x58] sm:$0xff]  ;;  %86 = vst [vmem:[#allocation2 + $0x48] sm:$0xff] %v85_v9  ;;  %v91_v12 = vld [vmem:[%s9843_s4 + $0x60] sm:$0xff] }
   0x7   :  { %88 = vst [vmem:[#allocation2 + $0x50] sm:$0xff] %v87_v10  ;;  %90 = vst [vmem:[#allocation2 + $0x58] sm:$0xff] %v89_v11  ;;  %v93_v13 = vld [vmem:[%s9843_s4 + $0x68] sm:$0xff]  ;;  %v95_v14 = vld [vmem:[%s9843_s4 + $0x70] sm:$0xff] }
   0x8   :  { %92 = vst [vmem:[#allocation2 + $0x60] sm:$0xff] %v91_v12  ;;  %94 = vst [vmem:[#allocation2 + $0x68] sm:$0xff] %v93_v13  ;;  %v97_v15 = vld [vmem:[%s9843_s4 + $0x78] sm:$0xff] }
   0x9   :  { %96 = vst [vmem:[#allocation2 + $0x70] sm:$0xff] %v95_v14  ;;  %98 = vst [vmem:[#allocation2 + $0x78] sm:$0xff] %v97_v15 }
   0xa   :  { %106 = vsyncadd [#allocation3], 2048  ;;  %v5303_v16 = vld [vmem:[%s9843_s4 + $0x80] sm:$0xff]  ;;  %v5304_v17 = vld [vmem:[%s9843_s4 + $0x88] sm:$0xff] }
   0xb   :  { %144 = vst [vmem:[#allocation2 + $0x80] sm:$0xff] %v5303_v16  ;;  %146 = vst [vmem:[#allocation2 + $0x88] sm:$0xff] %v5304_v17  ;;  %v5305_v18 = vld [vmem:[%s9843_s4 + $0x90] sm:$0xff]  ;;  %v5306_v19 = vld [vmem:[%s9843_s4 + $0x98] sm:$0xff] }
   0xc   :  { %v5307_v20 = vld [vmem:[%s9843_s4 + $0xa0] sm:$0xff]  ;;  %148 = vst [vmem:[#allocation2 + $0x90] sm:$0xff] %v5305_v18  ;;  %150 = vst [vmem:[#allocation2 + $0x98] sm:$0xff] %v5306_v19  ;;  %v5308_v21 = vld [vmem:[%s9843_s4 + $0xa8] sm:$0xff] }
   0xd   :  { %152 = vst [vmem:[#allocation2 + $0xa0] sm:$0xff] %v5307_v20  ;;  %v5309_v22 = vld [vmem:[%s9843_s4 + $0xb0] sm:$0xff]  ;;  %v5310_v23 = vld [vmem:[%s9843_s4 + $0xb8] sm:$0xff]  ;;  %154 = vst [vmem:[#allocation2 + $0xa8] sm:$0xff] %v5308_v21 }
   0xe   :  { %156 = vst [vmem:[#allocation2 + $0xb0] sm:$0xff] %v5309_v22  ;;  %158 = vst [vmem:[#allocation2 + $0xb8] sm:$0xff] %v5310_v23  ;;  %v5311_v24 = vld [vmem:[%s9843_s4 + $0xc0] sm:$0xff]  ;;  %v5312_v25 = vld [vmem:[%s9843_s4 + $0xc8] sm:$0xff] }
   0xf   :  { %v5313_v26 = vld [vmem:[%s9843_s4 + $0xd0] sm:$0xff]  ;;  %160 = vst [vmem:[#allocation2 + $0xc0] sm:$0xff] %v5311_v24  ;;  %162 = vst [vmem:[#allocation2 + $0xc8] sm:$0xff] %v5312_v25  ;;  %v5314_v27 = vld [vmem:[%s9843_s4 + $0xd8] sm:$0xff] }
  0x10   :  { %164 = vst [vmem:[#allocation2 + $0xd0] sm:$0xff] %v5313_v26  ;;  %v5315_v28 = vld [vmem:[%s9843_s4 + $0xe0] sm:$0xff]  ;;  %v5316_v29 = vld [vmem:[%s9843_s4 + $0xe8] sm:$0xff]  ;;  %166 = vst [vmem:[#allocation2 + $0xd8] sm:$0xff] %v5314_v27 }
  0x11   :  { %168 = vst [vmem:[#allocation2 + $0xe0] sm:$0xff] %v5315_v28  ;;  %170 = vst [vmem:[#allocation2 + $0xe8] sm:$0xff] %v5316_v29  ;;  %v5317_v30 = vld [vmem:[%s9843_s4 + $0xf0] sm:$0xff]  ;;  %v5318_v31 = vld [vmem:[%s9843_s4 + $0xf8] sm:$0xff] }
  0x12   :  { %172 = vst [vmem:[#allocation2 + $0xf0] sm:$0xff] %v5317_v30  ;;  %174 = vst [vmem:[#allocation2 + $0xf8] sm:$0xff] %v5318_v31 }
  0x13   :  { %182 = vsyncadd [#allocation3 + $0x1], 2048  ;;  %v5320_v32 = vld [vmem:[%s9843_s4 + $0x100] sm:$0xff]  ;;  %v5321_v33 = vld [vmem:[%s9843_s4 + $0x108] sm:$0xff] }
  0x14   :  { %220 = vst [vmem:[#allocation2 + $0x100] sm:$0xff] %v5320_v32  ;;  %222 = vst [vmem:[#allocation2 + $0x108] sm:$0xff] %v5321_v33  ;;  %v5322_v34 = vld [vmem:[%s9843_s4 + $0x110] sm:$0xff]  ;;  %v5323_v35 = vld [vmem:[%s9843_s4 + $0x118] sm:$0xff] }
  0x15   :  { %v5324_v36 = vld [vmem:[%s9843_s4 + $0x120] sm:$0xff]  ;;  %224 = vst [vmem:[#allocation2 + $0x110] sm:$0xff] %v5322_v34  ;;  %226 = vst [vmem:[#allocation2 + $0x118] sm:$0xff] %v5323_v35  ;;  %v5325_v37 = vld [vmem:[%s9843_s4 + $0x128] sm:$0xff] }
  0x16   :  { %228 = vst [vmem:[#allocation2 + $0x120] sm:$0xff] %v5324_v36  ;;  %v5326_v38 = vld [vmem:[%s9843_s4 + $0x130] sm:$0xff]  ;;  %v5327_v39 = vld [vmem:[%s9843_s4 + $0x138] sm:$0xff]  ;;  %230 = vst [vmem:[#allocation2 + $0x128] sm:$0xff] %v5325_v37 }
  0x17   :  { %232 = vst [vmem:[#allocation2 + $0x130] sm:$0xff] %v5326_v38  ;;  %234 = vst [vmem:[#allocation2 + $0x138] sm:$0xff] %v5327_v39  ;;  %v5328_v40 = vld [vmem:[%s9843_s4 + $0x140] sm:$0xff]  ;;  %v5329_v41 = vld [vmem:[%s9843_s4 + $0x148] sm:$0xff] }
  0x18   :  { %v5330_v42 = vld [vmem:[%s9843_s4 + $0x150] sm:$0xff]  ;;  %236 = vst [vmem:[#allocation2 + $0x140] sm:$0xff] %v5328_v40  ;;  %238 = vst [vmem:[#allocation2 + $0x148] sm:$0xff] %v5329_v41  ;;  %v5331_v43 = vld [vmem:[%s9843_s4 + $0x158] sm:$0xff] }
  0x19   :  { %240 = vst [vmem:[#allocation2 + $0x150] sm:$0xff] %v5330_v42  ;;  %v5332_v44 = vld [vmem:[%s9843_s4 + $0x160] sm:$0xff]  ;;  %v5333_v45 = vld [vmem:[%s9843_s4 + $0x168] sm:$0xff]  ;;  %242 = vst [vmem:[#allocation2 + $0x158] sm:$0xff] %v5331_v43 }
  0x1a   :  { %244 = vst [vmem:[#allocation2 + $0x160] sm:$0xff] %v5332_v44  ;;  %246 = vst [vmem:[#allocation2 + $0x168] sm:$0xff] %v5333_v45  ;;  %v5334_v46 = vld [vmem:[%s9843_s4 + $0x170] sm:$0xff]  ;;  %v5335_v47 = vld [vmem:[%s9843_s4 + $0x178] sm:$0xff] }
  0x1b   :  { %248 = vst [vmem:[#allocation2 + $0x170] sm:$0xff] %v5334_v46  ;;  %250 = vst [vmem:[#allocation2 + $0x178] sm:$0xff] %v5335_v47 }
  0x1c   :  { %258 = vsyncadd [#allocation3 + $0x2], 2048  ;;  %v5337_v48 = vld [vmem:[%s9843_s4 + $0x180] sm:$0xff]  ;;  %v5338_v49 = vld [vmem:[%s9843_s4 + $0x188] sm:$0xff] }
  0x1d   :  { %296 = vst [vmem:[#allocation2 + $0x180] sm:$0xff] %v5337_v48  ;;  %298 = vst [vmem:[#allocation2 + $0x188] sm:$0xff] %v5338_v49  ;;  %v5339_v50 = vld [vmem:[%s9843_s4 + $0x190] sm:$0xff]  ;;  %v5340_v51 = vld [vmem:[%s9843_s4 + $0x198] sm:$0xff] }
  0x1e   :  { %v5341_v52 = vld [vmem:[%s9843_s4 + $0x1a0] sm:$0xff]  ;;  %300 = vst [vmem:[#allocation2 + $0x190] sm:$0xff] %v5339_v50  ;;  %302 = vst [vmem:[#allocation2 + $0x198] sm:$0xff] %v5340_v51  ;;  %v5342_v53 = vld [vmem:[%s9843_s4 + $0x1a8] sm:$0xff] }
  0x1f   :  { %304 = vst [vmem:[#allocation2 + $0x1a0] sm:$0xff] %v5341_v52  ;;  %v5343_v54 = vld [vmem:[%s9843_s4 + $0x1b0] sm:$0xff]  ;;  %v5344_v55 = vld [vmem:[%s9843_s4 + $0x1b8] sm:$0xff]  ;;  %306 = vst [vmem:[#allocation2 + $0x1a8] sm:$0xff] %v5342_v53 }
  0x20   :  { %308 = vst [vmem:[#allocation2 + $0x1b0] sm:$0xff] %v5343_v54  ;;  %310 = vst [vmem:[#allocation2 + $0x1b8] sm:$0xff] %v5344_v55  ;;  %v5345_v56 = vld [vmem:[%s9843_s4 + $0x1c0] sm:$0xff]  ;;  %v5346_v57 = vld [vmem:[%s9843_s4 + $0x1c8] sm:$0xff] }
  0x21   :  { %v5347_v58 = vld [vmem:[%s9843_s4 + $0x1d0] sm:$0xff]  ;;  %312 = vst [vmem:[#allocation2 + $0x1c0] sm:$0xff] %v5345_v56  ;;  %314 = vst [vmem:[#allocation2 + $0x1c8] sm:$0xff] %v5346_v57  ;;  %v5348_v59 = vld [vmem:[%s9843_s4 + $0x1d8] sm:$0xff] }
  0x22   :  { %316 = vst [vmem:[#allocation2 + $0x1d0] sm:$0xff] %v5347_v58  ;;  %v5349_v60 = vld [vmem:[%s9843_s4 + $0x1e0] sm:$0xff]  ;;  %v5350_v61 = vld [vmem:[%s9843_s4 + $0x1e8] sm:$0xff]  ;;  %318 = vst [vmem:[#allocation2 + $0x1d8] sm:$0xff] %v5348_v59 }
  0x23   :  { %320 = vst [vmem:[#allocation2 + $0x1e0] sm:$0xff] %v5349_v60  ;;  %322 = vst [vmem:[#allocation2 + $0x1e8] sm:$0xff] %v5350_v61  ;;  %v5351_v62 = vld [vmem:[%s9843_s4 + $0x1f0] sm:$0xff]  ;;  %v5352_v63 = vld [vmem:[%s9843_s4 + $0x1f8] sm:$0xff] }
  0x24   :  { %324 = vst [vmem:[#allocation2 + $0x1f0] sm:$0xff] %v5351_v62  ;;  %326 = vst [vmem:[#allocation2 + $0x1f8] sm:$0xff] %v5352_v63 }
  0x25   :  { %334 = vsyncadd [#allocation3 + $0x3], 2048  ;;  %v5354_v0 = vld [vmem:[%s9843_s4 + $0x200] sm:$0xff]  ;;  %v5355_v1 = vld [vmem:[%s9843_s4 + $0x208] sm:$0xff] }
  0x26   :  { %372 = vst [vmem:[#allocation2 + $0x200] sm:$0xff] %v5354_v0  ;;  %374 = vst [vmem:[#allocation2 + $0x208] sm:$0xff] %v5355_v1  ;;  %v5356_v2 = vld [vmem:[%s9843_s4 + $0x210] sm:$0xff]  ;;  %v5357_v3 = vld [vmem:[%s9843_s4 + $0x218] sm:$0xff] }
  0x27   :  { %v5358_v4 = vld [vmem:[%s9843_s4 + $0x220] sm:$0xff]  ;;  %376 = vst [vmem:[#allocation2 + $0x210] sm:$0xff] %v5356_v2  ;;  %378 = vst [vmem:[#allocation2 + $0x218] sm:$0xff] %v5357_v3  ;;  %v5359_v5 = vld [vmem:[%s9843_s4 + $0x228] sm:$0xff] }
  0x28   :  { %380 = vst [vmem:[#allocation2 + $0x220] sm:$0xff] %v5358_v4  ;;  %v5360_v6 = vld [vmem:[%s9843_s4 + $0x230] sm:$0xff]  ;;  %v5361_v7 = vld [vmem:[%s9843_s4 + $0x238] sm:$0xff]  ;;  %382 = vst [vmem:[#allocation2 + $0x228] sm:$0xff] %v5359_v5 }
  0x29   :  { %384 = vst [vmem:[#allocation2 + $0x230] sm:$0xff] %v5360_v6  ;;  %386 = vst [vmem:[#allocation2 + $0x238] sm:$0xff] %v5361_v7  ;;  %v5362_v8 = vld [vmem:[%s9843_s4 + $0x240] sm:$0xff]  ;;  %v5363_v9 = vld [vmem:[%s9843_s4 + $0x248] sm:$0xff] }
  0x2a   :  { %v5364_v10 = vld [vmem:[%s9843_s4 + $0x250] sm:$0xff]  ;;  %388 = vst [vmem:[#allocation2 + $0x240] sm:$0xff] %v5362_v8  ;;  %390 = vst [vmem:[#allocation2 + $0x248] sm:$0xff] %v5363_v9  ;;  %v5365_v11 = vld [vmem:[%s9843_s4 + $0x258] sm:$0xff] }
  0x2b   :  { %392 = vst [vmem:[#allocation2 + $0x250] sm:$0xff] %v5364_v10  ;;  %v5366_v12 = vld [vmem:[%s9843_s4 + $0x260] sm:$0xff]  ;;  %v5367_v13 = vld [vmem:[%s9843_s4 + $0x268] sm:$0xff]  ;;  %394 = vst [vmem:[#allocation2 + $0x258] sm:$0xff] %v5365_v11 }
  0x2c   :  { %396 = vst [vmem:[#allocation2 + $0x260] sm:$0xff] %v5366_v12  ;;  %398 = vst [vmem:[#allocation2 + $0x268] sm:$0xff] %v5367_v13  ;;  %v5368_v14 = vld [vmem:[%s9843_s4 + $0x270] sm:$0xff]  ;;  %v5369_v15 = vld [vmem:[%s9843_s4 + $0x278] sm:$0xff] }
  0x2d   :  { %400 = vst [vmem:[#allocation2 + $0x270] sm:$0xff] %v5368_v14  ;;  %402 = vst [vmem:[#allocation2 + $0x278] sm:$0xff] %v5369_v15 }
  0x2e   :  { %410 = vsyncadd [#allocation3 + $0x4], 2048  ;;  %v5371_v16 = vld [vmem:[%s9843_s4 + $0x280] sm:$0xff]  ;;  %v5372_v17 = vld [vmem:[%s9843_s4 + $0x288] sm:$0xff] }
  0x2f   :  { %448 = vst [vmem:[#allocation2 + $0x280] sm:$0xff] %v5371_v16  ;;  %450 = vst [vmem:[#allocation2 + $0x288] sm:$0xff] %v5372_v17  ;;  %v5373_v18 = vld [vmem:[%s9843_s4 + $0x290] sm:$0xff]  ;;  %v5374_v19 = vld [vmem:[%s9843_s4 + $0x298] sm:$0xff] }
  0x30   :  { %v5375_v20 = vld [vmem:[%s9843_s4 + $0x2a0] sm:$0xff]  ;;  %452 = vst [vmem:[#allocation2 + $0x290] sm:$0xff] %v5373_v18  ;;  %454 = vst [vmem:[#allocation2 + $0x298] sm:$0xff] %v5374_v19  ;;  %v5376_v21 = vld [vmem:[%s9843_s4 + $0x2a8] sm:$0xff] }
  0x31   :  { %456 = vst [vmem:[#allocation2 + $0x2a0] sm:$0xff] %v5375_v20  ;;  %v5377_v22 = vld [vmem:[%s9843_s4 + $0x2b0] sm:$0xff]  ;;  %v5378_v23 = vld [vmem:[%s9843_s4 + $0x2b8] sm:$0xff]  ;;  %458 = vst [vmem:[#allocation2 + $0x2a8] sm:$0xff] %v5376_v21 }
  0x32   :  { %460 = vst [vmem:[#allocation2 + $0x2b0] sm:$0xff] %v5377_v22  ;;  %462 = vst [vmem:[#allocation2 + $0x2b8] sm:$0xff] %v5378_v23  ;;  %v5379_v24 = vld [vmem:[%s9843_s4 + $0x2c0] sm:$0xff]  ;;  %v5380_v25 = vld [vmem:[%s9843_s4 + $0x2c8] sm:$0xff] }
  0x33   :  { %v5381_v26 = vld [vmem:[%s9843_s4 + $0x2d0] sm:$0xff]  ;;  %464 = vst [vmem:[#allocation2 + $0x2c0] sm:$0xff] %v5379_v24  ;;  %466 = vst [vmem:[#allocation2 + $0x2c8] sm:$0xff] %v5380_v25  ;;  %v5382_v27 = vld [vmem:[%s9843_s4 + $0x2d8] sm:$0xff] }
  0x34   :  { %468 = vst [vmem:[#allocation2 + $0x2d0] sm:$0xff] %v5381_v26  ;;  %v5383_v28 = vld [vmem:[%s9843_s4 + $0x2e0] sm:$0xff]  ;;  %v5384_v29 = vld [vmem:[%s9843_s4 + $0x2e8] sm:$0xff]  ;;  %470 = vst [vmem:[#allocation2 + $0x2d8] sm:$0xff] %v5382_v27 }
  0x35   :  { %472 = vst [vmem:[#allocation2 + $0x2e0] sm:$0xff] %v5383_v28  ;;  %474 = vst [vmem:[#allocation2 + $0x2e8] sm:$0xff] %v5384_v29  ;;  %v5385_v30 = vld [vmem:[%s9843_s4 + $0x2f0] sm:$0xff]  ;;  %v5386_v31 = vld [vmem:[%s9843_s4 + $0x2f8] sm:$0xff] }
  0x36   :  { %476 = vst [vmem:[#allocation2 + $0x2f0] sm:$0xff] %v5385_v30  ;;  %478 = vst [vmem:[#allocation2 + $0x2f8] sm:$0xff] %v5386_v31 }
  0x37   :  { %486 = vsyncadd [#allocation3 + $0x5], 2048  ;;  %v5388_v32 = vld [vmem:[%s9843_s4 + $0x300] sm:$0xff]  ;;  %v5389_v33 = vld [vmem:[%s9843_s4 + $0x308] sm:$0xff] }
  0x38   :  { %524 = vst [vmem:[#allocation2 + $0x300] sm:$0xff] %v5388_v32  ;;  %526 = vst [vmem:[#allocation2 + $0x308] sm:$0xff] %v5389_v33  ;;  %v5390_v34 = vld [vmem:[%s9843_s4 + $0x310] sm:$0xff]  ;;  %v5391_v35 = vld [vmem:[%s9843_s4 + $0x318] sm:$0xff] }
  0x39   :  { %v5392_v36 = vld [vmem:[%s9843_s4 + $0x320] sm:$0xff]  ;;  %528 = vst [vmem:[#allocation2 + $0x310] sm:$0xff] %v5390_v34  ;;  %530 = vst [vmem:[#allocation2 + $0x318] sm:$0xff] %v5391_v35  ;;  %v5393_v37 = vld [vmem:[%s9843_s4 + $0x328] sm:$0xff] }
  0x3a   :  { %532 = vst [vmem:[#allocation2 + $0x320] sm:$0xff] %v5392_v36  ;;  %v5394_v38 = vld [vmem:[%s9843_s4 + $0x330] sm:$0xff]  ;;  %v5395_v39 = vld [vmem:[%s9843_s4 + $0x338] sm:$0xff]  ;;  %534 = vst [vmem:[#allocation2 + $0x328] sm:$0xff] %v5393_v37 }
  0x3b   :  { %536 = vst [vmem:[#allocation2 + $0x330] sm:$0xff] %v5394_v38  ;;  %538 = vst [vmem:[#allocation2 + $0x338] sm:$0xff] %v5395_v39  ;;  %v5396_v40 = vld [vmem:[%s9843_s4 + $0x340] sm:$0xff]  ;;  %v5397_v41 = vld [vmem:[%s9843_s4 + $0x348] sm:$0xff] }
  0x3c   :  { %v5398_v42 = vld [vmem:[%s9843_s4 + $0x350] sm:$0xff]  ;;  %540 = vst [vmem:[#allocation2 + $0x340] sm:$0xff] %v5396_v40  ;;  %542 = vst [vmem:[#allocation2 + $0x348] sm:$0xff] %v5397_v41  ;;  %v5399_v43 = vld [vmem:[%s9843_s4 + $0x358] sm:$0xff] }
  0x3d   :  { %544 = vst [vmem:[#allocation2 + $0x350] sm:$0xff] %v5398_v42  ;;  %v5400_v44 = vld [vmem:[%s9843_s4 + $0x360] sm:$0xff]  ;;  %v5401_v45 = vld [vmem:[%s9843_s4 + $0x368] sm:$0xff]  ;;  %546 = vst [vmem:[#allocation2 + $0x358] sm:$0xff] %v5399_v43 }
  0x3e   :  { %548 = vst [vmem:[#allocation2 + $0x360] sm:$0xff] %v5400_v44  ;;  %550 = vst [vmem:[#allocation2 + $0x368] sm:$0xff] %v5401_v45  ;;  %v5402_v46 = vld [vmem:[%s9843_s4 + $0x370] sm:$0xff]  ;;  %v5403_v47 = vld [vmem:[%s9843_s4 + $0x378] sm:$0xff] }
  0x3f   :  { %552 = vst [vmem:[#allocation2 + $0x370] sm:$0xff] %v5402_v46  ;;  %554 = vst [vmem:[#allocation2 + $0x378] sm:$0xff] %v5403_v47 }
  0x40   :  { %562 = vsyncadd [#allocation3 + $0x6], 2048  ;;  %v5405_v48 = vld [vmem:[%s9843_s4 + $0x380] sm:$0xff]  ;;  %v5406_v49 = vld [vmem:[%s9843_s4 + $0x388] sm:$0xff] }
  0x41   :  { %600 = vst [vmem:[#allocation2 + $0x380] sm:$0xff] %v5405_v48  ;;  %602 = vst [vmem:[#allocation2 + $0x388] sm:$0xff] %v5406_v49  ;;  %v5407_v50 = vld [vmem:[%s9843_s4 + $0x390] sm:$0xff]  ;;  %v5408_v51 = vld [vmem:[%s9843_s4 + $0x398] sm:$0xff] }
  0x42   :  { %v5409_v52 = vld [vmem:[%s9843_s4 + $0x3a0] sm:$0xff]  ;;  %604 = vst [vmem:[#allocation2 + $0x390] sm:$0xff] %v5407_v50  ;;  %606 = vst [vmem:[#allocation2 + $0x398] sm:$0xff] %v5408_v51  ;;  %v5410_v53 = vld [vmem:[%s9843_s4 + $0x3a8] sm:$0xff] }
  0x43   :  { %608 = vst [vmem:[#allocation2 + $0x3a0] sm:$0xff] %v5409_v52  ;;  %v5411_v54 = vld [vmem:[%s9843_s4 + $0x3b0] sm:$0xff]  ;;  %v5412_v55 = vld [vmem:[%s9843_s4 + $0x3b8] sm:$0xff]  ;;  %610 = vst [vmem:[#allocation2 + $0x3a8] sm:$0xff] %v5410_v53 }
  0x44   :  { %612 = vst [vmem:[#allocation2 + $0x3b0] sm:$0xff] %v5411_v54  ;;  %614 = vst [vmem:[#allocation2 + $0x3b8] sm:$0xff] %v5412_v55  ;;  %v5413_v56 = vld [vmem:[%s9843_s4 + $0x3c0] sm:$0xff]  ;;  %v5414_v57 = vld [vmem:[%s9843_s4 + $0x3c8] sm:$0xff] }
  0x45   :  { %v5415_v58 = vld [vmem:[%s9843_s4 + $0x3d0] sm:$0xff]  ;;  %616 = vst [vmem:[#allocation2 + $0x3c0] sm:$0xff] %v5413_v56  ;;  %618 = vst [vmem:[#allocation2 + $0x3c8] sm:$0xff] %v5414_v57  ;;  %v5416_v59 = vld [vmem:[%s9843_s4 + $0x3d8] sm:$0xff] }
  0x46   :  { %620 = vst [vmem:[#allocation2 + $0x3d0] sm:$0xff] %v5415_v58  ;;  %v5417_v60 = vld [vmem:[%s9843_s4 + $0x3e0] sm:$0xff]  ;;  %v5418_v61 = vld [vmem:[%s9843_s4 + $0x3e8] sm:$0xff]  ;;  %622 = vst [vmem:[#allocation2 + $0x3d8] sm:$0xff] %v5416_v59 }
  0x47   :  { %624 = vst [vmem:[#allocation2 + $0x3e0] sm:$0xff] %v5417_v60  ;;  %626 = vst [vmem:[#allocation2 + $0x3e8] sm:$0xff] %v5418_v61  ;;  %v5419_v62 = vld [vmem:[%s9843_s4 + $0x3f0] sm:$0xff]  ;;  %v5420_v63 = vld [vmem:[%s9843_s4 + $0x3f8] sm:$0xff] }
  0x48   :  { %628 = vst [vmem:[#allocation2 + $0x3f0] sm:$0xff] %v5419_v62  ;;  %630 = vst [vmem:[#allocation2 + $0x3f8] sm:$0xff] %v5420_v63 }
  0x49   :  { %638 = vsyncadd [#allocation3 + $0x7], 2048  ;;  %v5422_v0 = vld [vmem:[%s9843_s4 + $0x400] sm:$0xff]  ;;  %v5423_v1 = vld [vmem:[%s9843_s4 + $0x408] sm:$0xff] }
  0x4a   :  { %676 = vst [vmem:[#allocation2 + $0x400] sm:$0xff] %v5422_v0  ;;  %678 = vst [vmem:[#allocation2 + $0x408] sm:$0xff] %v5423_v1  ;;  %v5424_v2 = vld [vmem:[%s9843_s4 + $0x410] sm:$0xff]  ;;  %v5425_v3 = vld [vmem:[%s9843_s4 + $0x418] sm:$0xff] }
  0x4b   :  { %v5426_v4 = vld [vmem:[%s9843_s4 + $0x420] sm:$0xff]  ;;  %680 = vst [vmem:[#allocation2 + $0x410] sm:$0xff] %v5424_v2  ;;  %682 = vst [vmem:[#allocation2 + $0x418] sm:$0xff] %v5425_v3  ;;  %v5427_v5 = vld [vmem:[%s9843_s4 + $0x428] sm:$0xff] }
  0x4c   :  { %684 = vst [vmem:[#allocation2 + $0x420] sm:$0xff] %v5426_v4  ;;  %v5428_v6 = vld [vmem:[%s9843_s4 + $0x430] sm:$0xff]  ;;  %v5429_v7 = vld [vmem:[%s9843_s4 + $0x438] sm:$0xff]  ;;  %686 = vst [vmem:[#allocation2 + $0x428] sm:$0xff] %v5427_v5 }
  0x4d   :  { %688 = vst [vmem:[#allocation2 + $0x430] sm:$0xff] %v5428_v6  ;;  %690 = vst [vmem:[#allocation2 + $0x438] sm:$0xff] %v5429_v7  ;;  %v5430_v8 = vld [vmem:[%s9843_s4 + $0x440] sm:$0xff]  ;;  %v5431_v9 = vld [vmem:[%s9843_s4 + $0x448] sm:$0xff] }
  0x4e   :  { %v5432_v10 = vld [vmem:[%s9843_s4 + $0x450] sm:$0xff]  ;;  %692 = vst [vmem:[#allocation2 + $0x440] sm:$0xff] %v5430_v8  ;;  %694 = vst [vmem:[#allocation2 + $0x448] sm:$0xff] %v5431_v9  ;;  %v5433_v11 = vld [vmem:[%s9843_s4 + $0x458] sm:$0xff] }
  0x4f   :  { %696 = vst [vmem:[#allocation2 + $0x450] sm:$0xff] %v5432_v10  ;;  %v5434_v12 = vld [vmem:[%s9843_s4 + $0x460] sm:$0xff]  ;;  %v5435_v13 = vld [vmem:[%s9843_s4 + $0x468] sm:$0xff]  ;;  %698 = vst [vmem:[#allocation2 + $0x458] sm:$0xff] %v5433_v11 }
  0x50   :  { %700 = vst [vmem:[#allocation2 + $0x460] sm:$0xff] %v5434_v12  ;;  %702 = vst [vmem:[#allocation2 + $0x468] sm:$0xff] %v5435_v13  ;;  %v5436_v14 = vld [vmem:[%s9843_s4 + $0x470] sm:$0xff]  ;;  %v5437_v15 = vld [vmem:[%s9843_s4 + $0x478] sm:$0xff] }
  0x51   :  { %704 = vst [vmem:[#allocation2 + $0x470] sm:$0xff] %v5436_v14  ;;  %706 = vst [vmem:[#allocation2 + $0x478] sm:$0xff] %v5437_v15 }
  0x52   :  { %714 = vsyncadd [#allocation3 + $0x8], 2048  ;;  %v6321_v16 = vld [vmem:[%s9840_s1 + $0x74] ss:$8 sps:$4 sm:$0xff]   ;;  %v6323_v17 = vld [vmem:[%s9840_s1 + $0x70] ss:$8 sps:$4 sm:$0xff]  }
  0x53   :  { %v6575_v18 = vmov 0   ;;  %v6324_v19 = vld [vmem:[%s9840_s1 + $0x64] ss:$8 sps:$4 sm:$0xff]   ;;  %1108 = vmatprep.subr.bf16.mxu0 %v6321_v16  ;;  %v6326_v20 = vld [vmem:[%s9840_s1 + $0x60] ss:$8 sps:$4 sm:$0xff]   ;;  %vm1083_vm0 = vcmask 261120  }
  0x54   :  { %1253 = vmatprep.mubr.bf16.mxu1 %v6575_v18  ;;  %6320 = vset.pattern.permute.xlu1 %v6575_v18  ;;  %v6327_v21 = vld [vmem:[%s9840_s1 + $0x54] ss:$8 sps:$4 sm:$0xff]   ;;  %v6329_v22 = vld [vmem:[%s9840_s1 + $0x50] ss:$8 sps:$4 sm:$0xff]   ;;  %v6330_v23 = vld [vmem:[%s9840_s1 + $0x44] ss:$8 sps:$4 sm:$0xff]  }
  0x55   :  { %6319 = vset.pattern.permute.xlu0 %v6575_v18  ;;  %1109 = vmatpush1.bf16.msra.mxu0 %v6323_v17  ;;  %v6332_v24 = vld [vmem:[%s9840_s1 + $0x40] ss:$8 sps:$4 sm:$0xff]   ;;  %v6333_v25 = vld [vmem:[%s9840_s1 + $0x34] ss:$8 sps:$4 sm:$0xff]   ;;  %v6335_v26 = vld [vmem:[%s9840_s1 + $0x30] ss:$8 sps:$4 sm:$0xff]  }
  0x56   :  { %1110 = vmatprep.subr.bf16.mxu0 %v6324_v19  ;;  %v6336_v27 = vld [vmem:[%s9840_s1 + $0x24] ss:$8 sps:$4 sm:$0xff]   ;;  %v6360_v28 = vld [vmem:[%s9840_s1 + $0x114] ss:$8 sps:$4 sm:$0xff]   ;;  %v6362_v29 = vld [vmem:[%s9840_s1 + $0x110] ss:$8 sps:$4 sm:$0xff]  }
  0x57   :  { %v6338_v30 = vld [vmem:[%s9840_s1 + $0x20] ss:$8 sps:$4 sm:$0xff]   ;;  %v6339_v31 = vld [vmem:[%s9840_s1 + $0x14] ss:$8 sps:$4 sm:$0xff]   ;;  %1233 = vmatprep.subr.bf16.mxu1 %v6360_v28  ;;  %v6366_v32 = vld [vmem:[%s9840_s1 + $0x104] ss:$8 sps:$4 sm:$0xff]  }
  0x58   :  { %1234 = vmatpush1.bf16.msra.mxu1 %v6362_v29  ;;  %v6368_v33 = vld [vmem:[%s9840_s1 + $0x100] ss:$8 sps:$4 sm:$0xff]   ;;  %v6341_v34 = vld [vmem:[%s9840_s1 + $0x10] ss:$8 sps:$4 sm:$0xff]   ;;  %v6342_v36 = vld [vmem:[%s9840_s1 + $0x4] ss:$8 sps:$4 sm:$0xff]  }
  0x59   :  { %1111 = vmatpush1.bf16.msra.mxu0 %v6326_v20  ;;  %1235 = vmatprep.subr.bf16.mxu1 %v6366_v32  ;;  %v6372_v35 = vld [vmem:[%s9839_s0 + $0x8] ss:$12 sps:$4 sm:$0xff]   ;;  %v6378_v37 = vld [vmem:[%s9839_s0 + $0x4] ss:$12 sps:$4 sm:$0xff]   ;;  %v6379_v41 = vld [vmem:[%s9839_s0 + $0x20] ss:$12 sps:$4 sm:$0xff]  }
  0x5a   :  { %1112 = vmatprep.subr.bf16.mxu0 %v6327_v21  ;;  %v6344_v38 = vld [vmem:[%s9840_s1] ss:$8 sps:$4 sm:$0xff]   ;;  %v6345_v39 = vld [vmem:[%s9840_s1 + $0xf4] ss:$8 sps:$4 sm:$0xff]   ;;  %1140 = vmatprep.mubr.bf16.mxu0 %v6378_v37  ;;  %v6347_v40 = vld [vmem:[%s9840_s1 + $0xf0] ss:$8 sps:$4 sm:$0xff]  }
  0x5b   :  { %v6348_v42 = vld [vmem:[%s9840_s1 + $0xe4] ss:$8 sps:$4 sm:$0xff]   ;;  %v6350_v43 = vld [vmem:[%s9840_s1 + $0xe0] ss:$8 sps:$4 sm:$0xff]   ;;  %v6351_v44 = vld [vmem:[%s9840_s1 + $0xd4] ss:$8 sps:$4 sm:$0xff]  }
  0x5c   :  { %1236 = vmatpush1.bf16.msra.mxu1 %v6368_v33  ;;  %v6353_v45 = vld [vmem:[%s9840_s1 + $0xd0] ss:$8 sps:$4 sm:$0xff]   ;;  %v6354_v47 = vld [vmem:[%s9840_s1 + $0xc4] ss:$8 sps:$4 sm:$0xff]   ;;  %v6356_v50 = vld [vmem:[%s9840_s1 + $0xc0] ss:$8 sps:$4 sm:$0xff]  }
  0x5d   :  { %1113 = vmatpush1.bf16.msra.mxu0 %v6329_v22  ;;  %v6383_v46 = vld [vmem:[%s9839_s0 + $0x38] ss:$12 sps:$4 sm:$0xff]   ;;  %v1523_v48 = vld [vmem:[%s9848_s9 + $0x10] sm:$0xff]  ;;  %v1522_v53 = vld [vmem:[%s9848_s9 + $0x8] sm:$0xff] }
  0x5e   :  { %1114 = vmatprep.subr.bf16.mxu0 %v6330_v23  ;;  %v1521_v49 = vld [vmem:[%s9848_s9] sm:$0xff]  ;;  %v6357_v51 = vld [vmem:[%s9840_s1 + $0xb4] ss:$8 sps:$4 sm:$0xff]   ;;  %1549 = vperm.xlu1 %6320, %v1523_v48   ;;  %v6359_v54 = vld [vmem:[%s9840_s1 + $0xb0] ss:$8 sps:$4 sm:$0xff]  }
  0x5f   :  { %5499 = vmatmul.mubr.msk.bf16.vlgmr.msra.gmra.mxu1 %vm1083_vm0, %v6372_v35  ;;  %1539 = vperm.xlu0 %6319, %v1521_v49   ;;  %v1524_v52 = vld [vmem:[%s9848_s9 + $0x18] sm:$0xff]  ;;  %v6363_v56 = vld [vmem:[%s9840_s1 + $0xa4] ss:$8 sps:$4 sm:$0xff]   ;;  %v6365_v59 = vld [vmem:[%s9840_s1 + $0xa0] ss:$8 sps:$4 sm:$0xff]  }
  0x60   :  { %1263 = vmatprep.mubr.bf16.mxu1 %v6575_v18  ;;  %v6387_v55 = vld [vmem:[%s9839_s0 + $0x50] ss:$12 sps:$4 sm:$0xff]   ;;  %v1525_v57 = vld [vmem:[%s9848_s9 + $0x20] sm:$0xff]  ;;  %v1526_v58 = vld [vmem:[%s9848_s9 + $0x28] sm:$0xff] }
  0x61   :  { %1115 = vmatpush1.bf16.msra.mxu0 %v6332_v24  ;;  %v6369_v60 = vld [vmem:[%s9840_s1 + $0x94] ss:$8 sps:$4 sm:$0xff]   ;;  %v6371_v63 = vld [vmem:[%s9840_s1 + $0x90] ss:$8 sps:$4 sm:$0xff]   ;;  %v6373_v1 = vld [vmem:[%s9840_s1 + $0x84] ss:$8 sps:$4 sm:$0xff]  }
  0x62   :  { %1116 = vmatprep.subr.bf16.mxu0 %v6333_v25  ;;  %1554 = vperm.xlu1 %6320, %v1524_v52   ;;  %v1528_v61 = vld [vmem:[%s9848_s9 + $0x38] sm:$0xff]  ;;  %v1527_v62 = vld [vmem:[%s9848_s9 + $0x30] sm:$0xff]  ;;  %v1530_v2 = vld [vmem:[%s9848_s9 + $0x48] sm:$0xff] }
  0x63   :  { %1544 = vperm.xlu0 %6319, %v1522_v53   ;;  %v6391_v0 = vld [vmem:[%s9839_s0 + $0x68] ss:$12 sps:$4 sm:$0xff]   ;;  %v1529_v3 = vld [vmem:[%s9848_s9 + $0x40] sm:$0xff]  ;;  %v1532_v6 = vld [vmem:[%s9848_s9 + $0x58] sm:$0xff] }
  0x64   :  { %v6375_v4 = vld [vmem:[%s9840_s1 + $0x80] ss:$8 sps:$4 sm:$0xff]   ;;  %v1531_v7 = vld [vmem:[%s9848_s9 + $0x50] sm:$0xff]  ;;  %v6382_v12 = vld [vmem:[%s9839_s0 + $0x18] ss:$12 sps:$4 sm:$0xff]  }
  0x65   :  { %1117 = vmatpush1.bf16.msra.mxu0 %v6335_v26  ;;  %v6376_v5 = vld [vmem:[%s9839_s0] ss:$12 sps:$4 sm:$0xff]   ;;  %v6380_v8 = vld [vmem:[%s9839_s0 + $0x1c] ss:$12 sps:$4 sm:$0xff]   ;;  %v1535_v14 = vld [vmem:[%s9848_s9 + $0x70] sm:$0xff] }
  0x66   :  { %1118 = vmatprep.subr.bf16.mxu0 %v6336_v27  ;;  %1564 = vperm.xlu1 %6320, %v1526_v58   ;;  %v6395_v9 = vld [vmem:[%s9839_s0 + $0x80] ss:$12 sps:$4 sm:$0xff]   ;;  %v1536_v13 = vld [vmem:[%s9848_s9 + $0x78] sm:$0xff]  ;;  %v6392_v21 = vld [vmem:[%s9839_s0 + $0x64] ss:$12 sps:$4 sm:$0xff]  }
  0x67   :  { %5500 = vmatmul.mubr.msk.bf16.gmra.mxu1 %vm1083_vm0, %v6379_v41  ;;  %1559 = vperm.xlu0 %6319, %v1525_v57   ;;  %v1534_v10 = vld [vmem:[%s9848_s9 + $0x68] sm:$0xff]  ;;  %v1533_v11 = vld [vmem:[%s9848_s9 + $0x60] sm:$0xff]  ;;  %v6386_v17 = vld [vmem:[%s9839_s0 + $0x30] ss:$12 sps:$4 sm:$0xff]   ;;  %v1336_v41 = vlaneseq }
  0x68   :  { %1273 = vmatprep.mubr.bf16.mxu1 %v6575_v18  ;;  %v6384_v15 = vld [vmem:[%s9839_s0 + $0x34] ss:$12 sps:$4 sm:$0xff]   ;;  %v6399_v16 = vld [vmem:[%s9839_s0 + $0x98] ss:$12 sps:$4 sm:$0xff]   ;;  %v6403_v20 = vld [vmem:[%s9839_s0 + $0xb0] ss:$12 sps:$4 sm:$0xff]  }
  0x69   :  { %1119 = vmatpush1.bf16.msra.mxu0 %v6338_v30  ;;  %v6388_v19 = vld [vmem:[%s9839_s0 + $0x4c] ss:$12 sps:$4 sm:$0xff]   ;;  %v6396_v23 = vld [vmem:[%s9839_s0 + $0x7c] ss:$12 sps:$4 sm:$0xff]   ;;  %v6400_v25 = vld [vmem:[%s9839_s0 + $0x94] ss:$12 sps:$4 sm:$0xff]  }
  0x6a   :  { %1120 = vmatprep.subr.bf16.mxu0 %v6339_v31  ;;  %1574 = vperm.xlu1 %6320, %v1528_v61   ;;  %v6394_v22 = vld [vmem:[%s9839_s0 + $0x60] ss:$12 sps:$4 sm:$0xff]   ;;  %v6398_v24 = vld [vmem:[%s9839_s0 + $0x78] ss:$12 sps:$4 sm:$0xff]   ;;  %v6402_v26 = vld [vmem:[%s9839_s0 + $0x90] ss:$12 sps:$4 sm:$0xff]  }
  0x6b   :  { %1569 = vperm.xlu0 %6319, %v1527_v62   ;;  %v6404_v27 = vld [vmem:[%s9839_s0 + $0xac] ss:$12 sps:$4 sm:$0xff]   ;;  %v6406_v28 = vld [vmem:[%s9839_s0 + $0xa8] ss:$12 sps:$4 sm:$0xff]  }
  0x6d   :  { %1121 = vmatpush1.bf16.msra.mxu0 %v6341_v34 }
  0x6e   :  { %1122 = vmatprep.subr.bf16.mxu0 %v6342_v36  ;;  %1584 = vperm.xlu1 %6320, %v1530_v2  }
  0x6f   :  { %5501 = vmatmul.mubr.msk.bf16.gmra.mxu1 %vm1083_vm0, %v6383_v46  ;;  %1579 = vperm.xlu0 %6319, %v1529_v3  }
  0x70   :  { %1283 = vmatprep.mubr.bf16.mxu1 %v6575_v18 }
  0x71   :  { %1123 = vmatpush1.bf16.msra.mxu0 %v6344_v38 }
  0x72   :  { %1124 = vmatprep.subr.bf16.mxu0 %v6345_v39  ;;  %1594 = vperm.xlu1 %6320, %v1532_v6  }
  0x73   :  { %1589 = vperm.xlu0 %6319, %v1531_v7  }
  0x75   :  { %1125 = vmatpush2.bf16.msra.mxu0 %v6347_v40 }
  0x76   :  { %1126 = vmatprep.subr.bf16.mxu0 %v6348_v42  ;;  %1604 = vperm.xlu1 %6320, %v1534_v10  }
  0x77   :  { %5502 = vmatmul.mubr.msk.bf16.gmra.mxu1 %vm1083_vm0, %v6387_v55  ;;  %1599 = vperm.xlu0 %6319, %v1533_v11  }
  0x78   :  { %1293 = vmatprep.mubr.bf16.mxu1 %v6575_v18 }
  0x79   :  { %1127 = vmatpush2.bf16.msra.mxu0 %v6350_v43  ;;  %v7326_v43 = vshrl.u32 %v1336_v41, 7 }
  0x7a   :  { %1128 = vmatprep.subr.bf16.mxu0 %v6351_v44  ;;  %1614 = vperm.xlu1 %6320, %v1536_v13  }
  0x7b   :  { %1609 = vperm.xlu0 %6319, %v1535_v14   ;;  %10061 = vst [vmem:[#allocation22_spill] sm:$0xff] %v7326_v43  ;;  %v1342_v48 = vsub.s32 1, %v7326_v43  ;;  %vm1488_vm1 = vcmp.lt.s32.totalorder %v7326_v43, 1 }
  0x7d   :  { %1129 = vmatpush2.bf16.msra.mxu0 %v6353_v45  ;;  %v1338_v45 = vsub.s32 0, %v7326_v43 }
  0x7e   :  { %1130 = vmatprep.subr.bf16.mxu0 %v6354_v47  ;;  %v1334_v47 = vld [vmem:[%s9841_s2] sm:$0x3] }
  0x7f   :  { %5503 = vmatmul.mubr.msk.bf16.gmra.mxu1 %vm1083_vm0, %v6391_v0  ;;  %v7337_v49 = vrot.slane %v1334_v47, %v1338_v45 }
  0x80   :  { %1303 = vmatprep.mubr.bf16.mxu1 %v6575_v18 }
  0x81   :  { %1131 = vmatpush2.bf16.msra.mxu0 %v6356_v50  ;;  %v1378_v50 = vld [vmem:[%s9842_s3] sm:$0x3] }
  0x82   :  { %1132 = vmatprep.subr.bf16.mxu0 %v6357_v51  ;;  %v7346_v55 = vrot.slane %v1378_v50, %v1338_v45 }
  0x85   :  { %1133 = vmatpush2.bf16.msra.mxu0 %v6359_v54  ;;  %v7344_v54 = vrot.slane %v1334_v47, %v1342_v48 }
  0x86   :  { %1134 = vmatprep.subr.bf16.mxu0 %v6363_v56 }
  0x87   :  { %5504 = vmatmul.mubr.msk.bf16.gmra.mxu1 %vm1083_vm0, %v6395_v9 }
  0x88   :  { %1313 = vmatprep.mubr.bf16.mxu1 %v6575_v18 }
  0x89   :  { %1135 = vmatpush2.bf16.msra.mxu0 %v6365_v59  ;;  %v7349_v59 = vrot.slane %v1378_v50, %v1342_v48 }
  0x8a   :  { %1136 = vmatprep.subr.bf16.mxu0 %v6369_v60 }
  0x8d   :  { %1137 = vmatpush2.bf16.msra.mxu0 %v6371_v63 }
  0x8e   :  { %1138 = vmatprep.subr.bf16.mxu0 %v6373_v1 }
  0x8f   :  { %5505 = vmatmul.mubr.msk.bf16.gmra.mxu1 %vm1083_vm0, %v6399_v16 }
  0x90   :  { %1323 = vmatprep.mubr.bf16.mxu1 %v6575_v18  ;;  %v6390_v18 = vld [vmem:[%s9839_s0 + $0x48] ss:$12 sps:$4 sm:$0xff]  }
  0x91   :  { %1139 = vmatpush2.bf16.msra.mxu0 %v6375_v4 }
  0x94   :  { %1141 = vmatmul.mubr.bf16.vlgmr.msra.gmra.mxu0 %v6376_v5 }
  0x95   :  { %1150 = vmatprep.mubr.bf16.mxu0 %v6380_v8 }
  0x97   :  { %5506 = vmatmul.mubr.msk.bf16.gmra.mxu1 %vm1083_vm0, %v6403_v20 }
  0x9c   :  { %1151 = vmatmul.mubr.bf16.gmra.mxu0 %v6382_v12 }
  0x9d   :  { %1160 = vmatprep.mubr.bf16.mxu0 %v6384_v15 }
  0xa4   :  { %1161 = vmatmul.mubr.bf16.gmra.mxu0 %v6386_v17 }
  0xa5   :  { %1170 = vmatprep.mubr.bf16.mxu0 %v6388_v19 }
  0xac   :  { %1171 = vmatmul.mubr.bf16.gmra.mxu0 %v6390_v18 }
  0xad   :  { %1180 = vmatprep.mubr.bf16.mxu0 %v6392_v21 }
  0xb4   :  { %1181 = vmatmul.mubr.bf16.gmra.mxu0 %v6394_v22 }
  0xb5   :  { %1190 = vmatprep.mubr.bf16.mxu0 %v6396_v23 }
  0xbc   :  { %1191 = vmatmul.mubr.bf16.gmra.mxu0 %v6398_v24 }
  0xbd   :  { %1200 = vmatprep.mubr.bf16.mxu0 %v6400_v25 }
  0xc4   :  { %1201 = vmatmul.mubr.bf16.gmra.mxu0 %v6402_v26 }
  0xc5   :  { %1210 = vmatprep.mubr.bf16.mxu0 %v6404_v27 }
  0xcc   :  { %1211 = vmatmul.mubr.bf16.gmra.mxu0 %v6406_v28 }
  0xd9   :  { %v1550_v24 = vpop.permute.xlu1 %1549 }
  0xda   :  { %v7361_v9 = vpop.permute.xlu0 %1539 }
 0x11f   :  { %v1255_v29 = vpop.f32.mrf.mxu1 }
 0x121   :  { %v1257_v30 = vpop.f32.mrf.mxu1 }
 0x123   :  { %v1259_v31 = vpop.f32.mrf.mxu1 }
 0x125   :  { %v1261_v32 = vpop.f32.mrf.mxu1 }
 0x127   :  { %v1265_v33 = vpop.f32.mrf.mxu1 }
 0x129   :  { %v1267_v34 = vpop.f32.mrf.mxu1 }
 0x12b   :  { %v1269_v35 = vpop.f32.mrf.mxu1 }
 0x12d   :  { %v1271_v36 = vpop.f32.mrf.mxu1 }
 0x12f   :  { %v7316_v37 = vpop.f32.mrf.mxu1 }
 0x131   :  { %v7318_v38 = vpop.f32.mrf.mxu1 }
 0x133   :  { %v7320_v39 = vpop.f32.mrf.mxu1 }
 0x135   :  { %v7322_v40 = vpop.f32.mrf.mxu1 }
 0x137   :  { %v7324_v42 = vpop.f32.mrf.mxu1 }
 0x139   :  { %v7328_v44 = vpop.f32.mrf.mxu1 }
 0x13b   :  { %v7331_v46 = vpop.f32.mrf.mxu1 }
 0x13d   :  { %v7342_v51 = vpop.f32.mrf.mxu1 }
 0x13f   :  { %v7351_v60 = vpop.f32.mrf.mxu1 }
 0x141   :  { %v7357_v5 = vpop.f32.mrf.mxu1 }
 0x143   :  { %v7370_v17 = vpop.f32.mrf.mxu1 }
 0x154   :  { %v1142_v52 = vpop.f32.mrf.mxu0 }
 0x155   :  { %v1256_v53 = vadd.f32 %v1255_v29, %v1142_v52 }
 0x156   :  { %v1144_v56 = vpop.f32.mrf.mxu0 }
 0x157   :  { %v1346_v57 = vmul.f32 %v7337_v49, %v1256_v53  ;;  %v1258_v58 = vadd.f32 %v1257_v30, %v1144_v56 }
 0x158   :  { %v1146_v61 = vpop.f32.mrf.mxu0 }
 0x159   :  { %v1347_v62 = vmul.f32 %v7344_v54, %v1258_v58  ;;  %v1260_v63 = vadd.f32 %v1259_v31, %v1146_v61  ;;  %v1390_v0 = vadd.f32 %v7346_v55, %v1346_v57 }
 0x15a   :  { %v1148_v1 = vpop.f32.mrf.mxu0 }
 0x15b   :  { %v1391_v2 = vadd.f32 %v7349_v59, %v1347_v62  ;;  %v1348_v3 = vmul.f32 %v7337_v49, %v1260_v63  ;;  %v1262_v4 = vadd.f32 %v1261_v32, %v1148_v1  ;;  %v7363_v10 = vmax.f32 %v1390_v0, 0.0  ;;  %v1555_v1 = vpop.permute.xlu1 %1554 }
 0x15c   :  { %v1152_v6 = vpop.f32.mrf.mxu0 }
 0x15d   :  { %v1392_v7 = vadd.f32 %v7346_v55, %v1348_v3  ;;  %v1349_v8 = vmul.f32 %v7344_v54, %v1262_v4  ;;  %10062 = vst [vmem:[#allocation23_spill] sm:$0xff] %v7363_v10  ;;  %v7365_v11 = vmax.f32 %v1391_v2, 0.0  ;;  %v1266_v12 = vadd.f32 %v1265_v33, %v1152_v6  ;;  %v7384_v33 = vpop.permute.xlu0 %1544 }
 0x15e   :  { %v1154_v13 = vpop.f32.mrf.mxu0  ;;  %v9851_v25 = vrot.slane %v7363_v10, 7 }
 0x15f   :  { %10063 = vst [vmem:[#allocation24_spill] sm:$0xff] %v7365_v11  ;;  %v7367_v14 = vmax.f32 %v1392_v7, 0.0  ;;  %v1393_v15 = vadd.f32 %v7349_v59, %v1349_v8  ;;  %v1268_v16 = vadd.f32 %v1267_v34, %v1154_v13  ;;  %v1350_v19 = vmul.f32 %v7337_v49, %v1266_v12  ;;  %v7386_v34 = vpop.f32.mrf.mxu1 }
 0x160   :  { %v1156_v20 = vpop.f32.mrf.mxu0  ;;  %v9850_v26 = vrot.slane %v7365_v11, 7 }
 0x161   :  { %10064 = vst [vmem:[#allocation25_spill] sm:$0xff] %v7367_v14  ;;  %v1456_v18 = vrot.slane %v7367_v14, 7  ;;  %v7375_v21 = vmax.f32 %v1393_v15, 0.0  ;;  %v1351_v22 = vmul.f32 %v7344_v54, %v1268_v16  ;;  %v1270_v23 = vadd.f32 %v1269_v35, %v1156_v20  ;;  %v7419_v2 = vpop.f32.mrf.mxu1 }
 0x162   :  { %v1394_v27 = vadd.f32 %v7346_v55, %v1350_v19  ;;  %v1158_v28 = vpop.f32.mrf.mxu0 }
 0x163   :  { %10065 = vst [vmem:[#allocation26_spill] sm:$0xff] %v7375_v21  ;;  %v1457_v29 = vrot.slane %v7375_v21, 7  ;;  %v1395_v30 = vadd.f32 %v7349_v59, %v1351_v22  ;;  %v1352_v31 = vmul.f32 %v7337_v49, %v1270_v23  ;;  %v1272_v32 = vadd.f32 %v1271_v36, %v1158_v28 }
 0x164   :  { %v7388_v35 = vmax.f32 %v1394_v27, 0.0  ;;  %v7394_v41 = vsel %vm1488_vm1, %v9851_v25, %v1456_v18  ;;  %v1162_v45 = vpop.f32.mrf.mxu0  ;;  %v7449_v27 = vpop.f32.mrf.mxu1 }
 0x165   :  { %10067 = vst [vmem:[#allocation28_spill] sm:$0xff] %v7394_v41  ;;  %v7396_v47 = vmax.f32 %v1395_v30, 0.0  ;;  %v1396_v48 = vadd.f32 %v7346_v55, %v1352_v31  ;;  %v1353_v50 = vmul.f32 %v7344_v54, %v1272_v32  ;;  %v7404_v36 = vsel %vm1488_vm1, %v9850_v26, %v1457_v29 }
 0x166   :  { %10066 = vst [vmem:[#allocation27_spill] sm:$0xff] %v7388_v35  ;;  %10069 = vst [vmem:[#allocation30_spill] sm:$0xff] %v7404_v36  ;;  %v1458_v52 = vrot.slane %v7388_v35, 7  ;;  %v7408_v53 = vmul.f32 %v1550_v24, %v7394_v41  ;;  %v7411_v56 = vmul.f32 %v1550_v24, %v7404_v36  ;;  %v1276_v57 = vadd.f32 %v7316_v37, %v1162_v45  ;;  %v1164_v58 = vpop.f32.mrf.mxu0 }
 0x167   :  { %10068 = vst [vmem:[#allocation29_spill] sm:$0xff] %v7396_v47  ;;  %v1459_v61 = vrot.slane %v7396_v47, 7  ;;  %v7415_v62 = vmax.f32 %v1396_v48, 0.0  ;;  %v1397_v63 = vadd.f32 %v7349_v59, %v1353_v50  ;;  %v1278_v0 = vadd.f32 %v7318_v38, %v1164_v58  ;;  %v1560_v38 = vpop.permute.xlu0 %1559 }
 0x168   :  { %10070 = vst [vmem:[#allocation31_spill] sm:$0xff] %v7408_v53  ;;  %v1354_v3 = vmul.f32 %v7337_v49, %v1276_v57  ;;  %v7424_v4 = vsel %vm1488_vm1, %v1456_v18, %v1458_v52  ;;  %v1166_v6 = vpop.f32.mrf.mxu0 }
 0x169   :  { %10071 = vst [vmem:[#allocation32_spill] sm:$0xff] %v7415_v62  ;;  %10072 = vst [vmem:[#allocation33_spill] sm:$0xff] %v7424_v4  ;;  %v1460_v37 = vrot.slane %v7415_v62, 7  ;;  %v7427_v7 = vmax.f32 %v1397_v63, 0.0  ;;  %v1355_v8 = vmul.f32 %v7344_v54, %v1278_v0  ;;  %v7432_v12 = vsel %vm1488_vm1, %v1457_v29, %v1459_v61 }
 0x16a   :  { %10074 = vst [vmem:[#allocation35_spill] sm:$0xff] %v7432_v12  ;;  %v1398_v13 = vadd.f32 %v7346_v55, %v1354_v3  ;;  %v7436_v15 = vmul.f32 %v1555_v1, %v7424_v4  ;;  %v7439_v16 = vmul.f32 %v1555_v1, %v7432_v12  ;;  %v1280_v19 = vadd.f32 %v7320_v39, %v1166_v6  ;;  %v1168_v20 = vpop.f32.mrf.mxu0 }
 0x16b   :  { %10073 = vst [vmem:[#allocation34_spill] sm:$0xff] %v7427_v7  ;;  %v1461_v18 = vrot.slane %v7427_v7, 7  ;;  %v1399_v22 = vadd.f32 %v7349_v59, %v1355_v8  ;;  %v1282_v23 = vadd.f32 %v7322_v40, %v1168_v20  ;;  %v7447_v24 = vsel %vm1488_vm1, %v1458_v52, %v1460_v37 }
 0x16c   :  { %10075 = vst [vmem:[#allocation36_spill] sm:$0xff] %v7447_v24  ;;  %v7451_v28 = vmax.f32 %v1398_v13, 0.0  ;;  %v1356_v29 = vmul.f32 %v7337_v49, %v1280_v19  ;;  %v7455_v30 = vmul.f32 %v1560_v38, %v7447_v24  ;;  %v1172_v39 = vpop.f32.mrf.mxu0 }
 0x16d   :  { %v7457_v31 = vmax.f32 %v1399_v22, 0.0  ;;  %v1357_v32 = vmul.f32 %v7344_v54, %v1282_v23  ;;  %v7462_v40 = vsel %vm1488_vm1, %v1459_v61, %v1461_v18  ;;  %v1286_v45 = vadd.f32 %v7324_v42, %v1172_v39  ;;  %v7474_v61 = vpop.f32.mrf.mxu1  ;;  %v1565_v42 = vpop.permute.xlu1 %1564 }
 0x16e   :  { %10076 = vst [vmem:[#allocation37_spill] sm:$0xff] %v7451_v28  ;;  %10078 = vst [vmem:[#allocation39_spill] sm:$0xff] %v7462_v40  ;;  %v1462_v48 = vrot.slane %v7451_v28, 7  ;;  %v1400_v50 = vadd.f32 %v7346_v55, %v1356_v29  ;;  %v7468_v52 = vmul.f32 %v1560_v38, %v7462_v40  ;;  %v1174_v57 = vpop.f32.mrf.mxu0 }
 0x16f   :  { %10077 = vst [vmem:[#allocation38_spill] sm:$0xff] %v7457_v31  ;;  %v1463_v58 = vrot.slane %v7457_v31, 7  ;;  %v1401_v63 = vadd.f32 %v7349_v59, %v1357_v32  ;;  %v1358_v0 = vmul.f32 %v7337_v49, %v1286_v45  ;;  %v1288_v1 = vadd.f32 %v7328_v44, %v1174_v57  ;;  %v7502_v45 = vpop.f32.mrf.mxu1 }
 0x170   :  { %v7476_v3 = vmax.f32 %v1400_v50, 0.0  ;;  %v7480_v6 = vsel %vm1488_vm1, %v1460_v37, %v1462_v48  ;;  %v1176_v8 = vpop.f32.mrf.mxu0 }
 0x171   :  { %10080 = vst [vmem:[#allocation41_spill] sm:$0xff] %v7480_v6  ;;  %v7482_v38 = vmax.f32 %v1401_v63, 0.0  ;;  %v1402_v13 = vadd.f32 %v7346_v55, %v1358_v0  ;;  %v7487_v19 = vsel %vm1488_vm1, %v1461_v18, %v1463_v58  ;;  %v7490_v44 = vmul.f32 %v1565_v42, %v7480_v6  ;;  %v1570_v63 = vpop.permute.xlu0 %1569  ;;  %v1575_v26 = vpop.permute.xlu1 %1574 }
 0x172   :  { %10079 = vst [vmem:[#allocation40_spill] sm:$0xff] %v7476_v3  ;;  %10082 = vst [vmem:[#allocation43_spill] sm:$0xff] %v7487_v19  ;;  %v1464_v20 = vrot.slane %v7476_v3, 7  ;;  %v7494_v22 = vmul.f32 %v1565_v42, %v7487_v19  ;;  %v1359_v37 = vmul.f32 %v7344_v54, %v1288_v1  ;;  %v1290_v23 = vadd.f32 %v7331_v46, %v1176_v8  ;;  %v1178_v29 = vpop.f32.mrf.mxu0 }
 0x173   :  { %10081 = vst [vmem:[#allocation42_spill] sm:$0xff] %v7482_v38  ;;  %v1465_v39 = vrot.slane %v7482_v38, 7  ;;  %v7499_v32 = vmax.f32 %v1402_v13, 0.0  ;;  %v1292_v18 = vadd.f32 %v7342_v51, %v1178_v29 }
 0x174   :  { %v1403_v50 = vadd.f32 %v7349_v59, %v1359_v37  ;;  %v1360_v57 = vmul.f32 %v7337_v49, %v1290_v23  ;;  %v7508_v0 = vsel %vm1488_vm1, %v1462_v48, %v1464_v20  ;;  %v1182_v1 = vpop.f32.mrf.mxu0 }
 0x175   :  { %10083 = vst [vmem:[#allocation44_spill] sm:$0xff] %v7499_v32  ;;  %10084 = vst [vmem:[#allocation45_spill] sm:$0xff] %v7508_v0  ;;  %v1466_v46 = vrot.slane %v7499_v32, 7  ;;  %v7513_v42 = vsel %vm1488_vm1, %v1463_v58, %v1465_v39  ;;  %v7516_v51 = vmul.f32 %v1570_v63, %v7508_v0  ;;  %v1361_v8 = vmul.f32 %v7344_v54, %v1292_v18  ;;  %v1315_v18 = vpop.f32.mrf.mxu1  ;;  %v1585_v24 = vpop.permute.xlu1 %1584 }
 0x176   :  { %10085 = vst [vmem:[#allocation46_spill] sm:$0xff] %v7513_v42  ;;  %v7519_v13 = vmax.f32 %v1403_v50, 0.0  ;;  %v1404_v37 = vadd.f32 %v7346_v55, %v1360_v57  ;;  %v7523_v23 = vmul.f32 %v1570_v63, %v7513_v42  ;;  %v1296_v48 = vadd.f32 %v7351_v60, %v1182_v1  ;;  %v1184_v29 = vpop.f32.mrf.mxu0 }
 0x177   :  { %v7528_v58 = vsel %vm1488_vm1, %v1464_v20, %v1466_v46  ;;  %v1405_v25 = vadd.f32 %v7349_v59, %v1361_v8  ;;  %v1298_v19 = vadd.f32 %v7357_v5, %v1184_v29  ;;  %v1317_v0 = vpop.f32.mrf.mxu1 }
 0x178   :  { %10086 = vst [vmem:[#allocation47_spill] sm:$0xff] %v7519_v13  ;;  %10087 = vst [vmem:[#allocation48_spill] sm:$0xff] %v7528_v58  ;;  %v1467_v50 = vrot.slane %v7519_v13, 7  ;;  %v7533_v6 = vmax.f32 %v1404_v37, 0.0  ;;  %v7536_v57 = vmul.f32 %v1575_v26, %v7528_v58  ;;  %v1362_v60 = vmul.f32 %v7337_v49, %v1296_v48  ;;  %v1186_v63 = vpop.f32.mrf.mxu0 }
 0x179   :  { %v7539_v1 = vmax.f32 %v1405_v25, 0.0  ;;  %v1363_v20 = vmul.f32 %v7344_v54, %v1298_v19  ;;  %v1300_v42 = vadd.f32 %v7370_v17, %v1186_v63  ;;  %v1580_v63 = vpop.permute.xlu0 %1579 }
 0x17a   :  { %10088 = vst [vmem:[#allocation49_spill] sm:$0xff] %v7533_v6  ;;  %v1468_v8 = vrot.slane %v7533_v6, 7  ;;  %v7546_v5 = vsel %vm1488_vm1, %v1465_v39, %v1467_v50  ;;  %v1406_v37 = vadd.f32 %v7346_v55, %v1362_v60  ;;  %v1188_v29 = vpop.f32.mrf.mxu0 }
 0x17b   :  { %10089 = vst [vmem:[#allocation50_spill] sm:$0xff] %v7539_v1  ;;  %10090 = vst [vmem:[#allocation51_spill] sm:$0xff] %v7546_v5  ;;  %v7550_v58 = vmul.f32 %v1575_v26, %v7546_v5  ;;  %v1469_v48 = vrot.slane %v7539_v1, 7  ;;  %v1407_v25 = vadd.f32 %v7349_v59, %v1363_v20  ;;  %v1364_v19 = vmul.f32 %v7337_v49, %v1300_v42 }
 0x17c   :  { %v7555_v17 = vmax.f32 %v1406_v37, 0.0  ;;  %v7559_v39 = vsel %vm1488_vm1, %v1466_v46, %v1468_v8  ;;  %v1302_v60 = vadd.f32 %v7386_v34, %v1188_v29  ;;  %v1192_v36 = vpop.f32.mrf.mxu0 }
 0x17d   :  { %10092 = vst [vmem:[#allocation53_spill] sm:$0xff] %v7559_v39  ;;  %v7564_v26 = vsel %vm1488_vm1, %v1467_v50, %v1469_v48  ;;  %v7567_v5 = vmul.f32 %v1580_v63, %v7559_v39  ;;  %v7569_v20 = vmax.f32 %v1407_v25, 0.0  ;;  %v1408_v42 = vadd.f32 %v7346_v55, %v1364_v19  ;;  %v1319_v25 = vpop.f32.mrf.mxu1 }
 0x17e   :  { %10091 = vst [vmem:[#allocation52_spill] sm:$0xff] %v7555_v17  ;;  %10093 = vst [vmem:[#allocation54_spill] sm:$0xff] %v7564_v26  ;;  %v1470_v37 = vrot.slane %v7555_v17, 7  ;;  %v7574_v41 = vmul.f32 %v1580_v63, %v7564_v26  ;;  %v1365_v46 = vmul.f32 %v7344_v54, %v1302_v60  ;;  %v1306_v34 = vadd.f32 %v7419_v2, %v1192_v36  ;;  %v1194_v29 = vpop.f32.mrf.mxu0 }
 0x17f   :  { %10094 = vst [vmem:[#allocation55_spill] sm:$0xff] %v7569_v20  ;;  %v1471_v50 = vrot.slane %v7569_v20, 7  ;;  %v7579_v40 = vmax.f32 %v1408_v42, 0.0  ;;  %v1308_v39 = vadd.f32 %v7449_v27, %v1194_v29 }
 0x180   :  { %v7584_v19 = vsel %vm1488_vm1, %v1468_v8, %v1470_v37  ;;  %v1409_v63 = vadd.f32 %v7349_v59, %v1365_v46  ;;  %v1366_v26 = vmul.f32 %v7337_v49, %v1306_v34  ;;  %v1196_v60 = vpop.f32.mrf.mxu0 }
 0x181   :  { %10095 = vst [vmem:[#allocation56_spill] sm:$0xff] %v7579_v40  ;;  %10096 = vst [vmem:[#allocation57_spill] sm:$0xff] %v7584_v19  ;;  %v7589_v36 = vmul.f32 %v1585_v24, %v7584_v19  ;;  %v7593_v2 = vsel %vm1488_vm1, %v1469_v48, %v1471_v50  ;;  %v1472_v27 = vrot.slane %v7579_v40, 7  ;;  %v1367_v42 = vmul.f32 %v7344_v54, %v1308_v39  ;;  %v1590_v19 = vpop.permute.xlu0 %1589  ;;  %v1321_v39 = vpop.f32.mrf.mxu1 }
 0x182   :  { %10097 = vst [vmem:[#allocation58_spill] sm:$0xff] %v7593_v2  ;;  %v7598_v29 = vmul.f32 %v1585_v24, %v7593_v2  ;;  %v7600_v8 = vmax.f32 %v1409_v63, 0.0  ;;  %v1410_v46 = vadd.f32 %v7346_v55, %v1366_v26  ;;  %v1310_v34 = vadd.f32 %v7474_v61, %v1196_v60  ;;  %v1198_v12 = vpop.f32.mrf.mxu0 }
 0x183   :  { %v7606_v4 = vsel %vm1488_vm1, %v1470_v37, %v1472_v27  ;;  %v1411_v48 = vadd.f32 %v7349_v59, %v1367_v42  ;;  %v1312_v40 = vadd.f32 %v7502_v45, %v1198_v12 }
 0x184   :  { %10098 = vst [vmem:[#allocation59_spill] sm:$0xff] %v7600_v8  ;;  %10099 = vst [vmem:[#allocation60_spill] sm:$0xff] %v7606_v4  ;;  %v7611_v24 = vmul.f32 %v1590_v19, %v7606_v4  ;;  %v1473_v63 = vrot.slane %v7600_v8, 7  ;;  %v7614_v2 = vmax.f32 %v1410_v46, 0.0  ;;  %v1368_v61 = vmul.f32 %v7337_v49, %v1310_v34  ;;  %v1202_v26 = vpop.f32.mrf.mxu0 }
 0x185   :  { %v7617_v60 = vmax.f32 %v1411_v48, 0.0  ;;  %v1369_v37 = vmul.f32 %v7344_v54, %v1312_v40  ;;  %v1316_v1 = vadd.f32 %v1315_v18, %v1202_v26  ;;  %v1325_v40 = vpop.f32.mrf.mxu1  ;;  %v1595_v18 = vpop.permute.xlu1 %1594 }
 0x186   :  { %10100 = vst [vmem:[#allocation61_spill] sm:$0xff] %v7611_v24  ;;  %10101 = vst [vmem:[#allocation62_spill] sm:$0xff] %v7614_v2  ;;  %v7622_v42 = vsel %vm1488_vm1, %v1471_v50, %v1473_v63  ;;  %v1474_v12 = vrot.slane %v7614_v2, 7  ;;  %v1412_v45 = vadd.f32 %v7346_v55, %v1368_v61  ;;  %v1204_v4 = vpop.f32.mrf.mxu0  ;;  %v1600_v17 = vpop.permute.xlu0 %1599 }
 0x187   :  { %10102 = vst [vmem:[#allocation63_spill] sm:$0xff] %v7617_v60  ;;  %10103 = vst [vmem:[#allocation64_spill] sm:$0xff] %v7622_v42  ;;  %v7627_v46 = vmul.f32 %v1590_v19, %v7622_v42  ;;  %v1475_v34 = vrot.slane %v7617_v60, 7  ;;  %v1413_v48 = vadd.f32 %v7349_v59, %v1369_v37  ;;  %v1370_v8 = vmul.f32 %v7337_v49, %v1316_v1  ;;  %v1327_v20 = vpop.f32.mrf.mxu1 }
 0x188   :  { %v7634_v50 = vsel %vm1488_vm1, %v1472_v27, %v1474_v12  ;;  %v7636_v26 = vmax.f32 %v1412_v45, 0.0  ;;  %v1318_v2 = vadd.f32 %v1317_v0, %v1204_v4  ;;  %v1206_v61 = vpop.f32.mrf.mxu0 }
 0x189   :  { %10104 = vst [vmem:[#allocation65_spill] sm:$0xff] %v7634_v50  ;;  %v7639_v6 = vmul.f32 %v1595_v18, %v7634_v50  ;;  %v7643_v19 = vsel %vm1488_vm1, %v1473_v63, %v1475_v34  ;;  %v7645_v37 = vmax.f32 %v1413_v48, 0.0  ;;  %v1414_v1 = vadd.f32 %v7346_v55, %v1370_v8 }
 0x18a   :  { %10105 = vst [vmem:[#allocation66_spill] sm:$0xff] %v7636_v26  ;;  %10107 = vst [vmem:[#allocation68_spill] sm:$0xff] %v7643_v19  ;;  %v7649_v42 = vmul.f32 %v1595_v18, %v7643_v19  ;;  %v1476_v27 = vrot.slane %v7636_v26, 7  ;;  %v1371_v45 = vmul.f32 %v7344_v54, %v1318_v2  ;;  %v1320_v4 = vadd.f32 %v1319_v25, %v1206_v61  ;;  %v1208_v0 = vpop.f32.mrf.mxu0  ;;  %v1329_v26 = vpop.f32.mrf.mxu1 }
 0x18b   :  { %10106 = vst [vmem:[#allocation67_spill] sm:$0xff] %v7639_v6  ;;  %10108 = vst [vmem:[#allocation69_spill] sm:$0xff] %v7645_v37  ;;  %v1477_v50 = vrot.slane %v7645_v37, 7  ;;  %v7654_v60 = vmax.f32 %v1414_v1, 0.0  ;;  %v1322_v63 = vadd.f32 %v1321_v39, %v1208_v0  ;;  %v1605_v37 = vpop.permute.xlu1 %1604 }
 0x18c   :  { %v7658_v48 = vsel %vm1488_vm1, %v1474_v12, %v1476_v27  ;;  %v1415_v8 = vadd.f32 %v7349_v59, %v1371_v45  ;;  %v1372_v18 = vmul.f32 %v7337_v49, %v1320_v4  ;;  %v1212_v19 = vpop.f32.mrf.mxu0 }
 0x18d   :  { %10109 = vst [vmem:[#allocation70_spill] sm:$0xff] %v7654_v60  ;;  %10110 = vst [vmem:[#allocation71_spill] sm:$0xff] %v7658_v48  ;;  %v7663_v2 = vmul.f32 %v1600_v17, %v7658_v48  ;;  %v7667_v25 = vsel %vm1488_vm1, %v1475_v34, %v1477_v50  ;;  %v1478_v61 = vrot.slane %v7654_v60, 7  ;;  %v1373_v39 = vmul.f32 %v7344_v54, %v1322_v63 }
 0x18e   :  { %10112 = vst [vmem:[#allocation73_spill] sm:$0xff] %v7667_v25  ;;  %v7672_v1 = vmul.f32 %v1600_v17, %v7667_v25  ;;  %v7674_v12 = vmax.f32 %v1415_v8, 0.0  ;;  %v1416_v45 = vadd.f32 %v7346_v55, %v1372_v18  ;;  %v1326_v4 = vadd.f32 %v1325_v40, %v1212_v19  ;;  %v1214_v0 = vpop.f32.mrf.mxu0 }
 0x18f   :  { %10111 = vst [vmem:[#allocation72_spill] sm:$0xff] %v7663_v2  ;;  %v7679_v48 = vsel %vm1488_vm1, %v1476_v27, %v1478_v61  ;;  %v1417_v34 = vadd.f32 %v7349_v59, %v1373_v39  ;;  %v1328_v60 = vadd.f32 %v1327_v20, %v1214_v0 }
 0x190   :  { %10113 = vst [vmem:[#allocation74_spill] sm:$0xff] %v7672_v1  ;;  %10114 = vst [vmem:[#allocation75_spill] sm:$0xff] %v7674_v12  ;;  %v7683_v63 = vmul.f32 %v1605_v37, %v7679_v48  ;;  %v1479_v17 = vrot.slane %v7674_v12, 7  ;;  %v7686_v8 = vmax.f32 %v1416_v45, 0.0  ;;  %v1374_v18 = vmul.f32 %v7337_v49, %v1326_v4  ;;  %v1216_v40 = vpop.f32.mrf.mxu0  ;;  %v1331_v12 = vpop.f32.mrf.mxu1 }
 0x191   :  { %10115 = vst [vmem:[#allocation76_spill] sm:$0xff] %v7679_v48  ;;  %v7689_v19 = vmax.f32 %v1417_v34, 0.0  ;;  %v1375_v25 = vmul.f32 %v7344_v54, %v1328_v60  ;;  %v1330_v27 = vadd.f32 %v1329_v26, %v1216_v40  ;;  %v1610_v26 = vpop.permute.xlu0 %1609 }
 0x192   :  { %10116 = vst [vmem:[#allocation77_spill] sm:$0xff] %v7683_v63  ;;  %10117 = vst [vmem:[#allocation78_spill] sm:$0xff] %v7686_v8  ;;  %v7694_v39 = vsel %vm1488_vm1, %v1477_v50, %v1479_v17  ;;  %v1480_v20 = vrot.slane %v7686_v8, 7  ;;  %v1418_v0 = vadd.f32 %v7346_v55, %v1374_v18  ;;  %v1218_v48 = vpop.f32.mrf.mxu0 }
 0x193   :  { %10118 = vst [vmem:[#allocation79_spill] sm:$0xff] %v7689_v19  ;;  %10119 = vst [vmem:[#allocation80_spill] sm:$0xff] %v7694_v39  ;;  %v7699_v45 = vmul.f32 %v1605_v37, %v7694_v39  ;;  %v1481_v4 = vrot.slane %v7689_v19, 7  ;;  %v1419_v34 = vadd.f32 %v7349_v59, %v1375_v25  ;;  %v1376_v60 = vmul.f32 %v7337_v49, %v1330_v27 }
 0x194   :  { %v7706_v50 = vsel %vm1488_vm1, %v1478_v61, %v1480_v20  ;;  %v7708_v40 = vmax.f32 %v1418_v0, 0.0  ;;  %v1332_v8 = vadd.f32 %v1331_v12, %v1218_v48  ;;  %v1615_v0 = vpop.permute.xlu1 %1614 }
 0x195   :  { %10120 = vst [vmem:[#allocation81_spill] sm:$0xff] %v7699_v45  ;;  %10121 = vst [vmem:[#allocation82_spill] sm:$0xff] %v7706_v50  ;;  %v7711_v18 = vmul.f32 %v1610_v26, %v7706_v50  ;;  %v7715_v37 = vsel %vm1488_vm1, %v1479_v17, %v1481_v4  ;;  %v7717_v39 = vmax.f32 %v1419_v34, 0.0  ;;  %v1420_v25 = vadd.f32 %v7346_v55, %v1376_v60 }
 0x196   :  { %10122 = vst [vmem:[#allocation83_spill] sm:$0xff] %v7708_v40  ;;  %10124 = vst [vmem:[#allocation85_spill] sm:$0xff] %v7715_v37  ;;  %v7721_v49 = vmul.f32 %v1610_v26, %v7715_v37  ;;  %v1482_v61 = vrot.slane %v7708_v40, 7  ;;  %v1377_v27 = vmul.f32 %v7344_v54, %v1332_v8 }
 0x197   :  { %10123 = vst [vmem:[#allocation84_spill] sm:$0xff] %v7711_v18  ;;  %10125 = vst [vmem:[#allocation86_spill] sm:$0xff] %v7717_v39  ;;  %v1483_v48 = vrot.slane %v7717_v39, 7  ;;  %v7726_v12 = vmax.f32 %v1420_v25, 0.0 }
 0x198   :  { %10126 = vst [vmem:[#allocation87_spill] sm:$0xff] %v7721_v49  ;;  %v7730_v17 = vsel %vm1488_vm1, %v1480_v20, %v1482_v61  ;;  %v1421_v34 = vadd.f32 %v7349_v59, %v1377_v27  ;;  %v10134_v59 = vrot.slane %v7363_v10, 7 }
 0x199   :  { %10127 = vst [vmem:[#allocation88_spill] sm:$0xff] %v7726_v12  ;;  %10128 = vst [vmem:[#allocation89_spill] sm:$0xff] %v7730_v17  ;;  %v7734_v55 = vmul.f32 %v1615_v0, %v7730_v17  ;;  %v7738_v60 = vsel %vm1488_vm1, %v1481_v4, %v1483_v48  ;;  %v1484_v54 = vrot.slane %v7726_v12, 7 }
 0x19a   :  { %10130 = vst [vmem:[#allocation91_spill] sm:$0xff] %v7738_v60  ;;  %v7742_v8 = vmul.f32 %v1615_v0, %v7738_v60  ;;  %v7744_v26 = vmax.f32 %v1421_v34, 0.0  ;;  %v10137_v34 = vrot.slane %v7365_v11, 7 }
 0x19b   :  { %10129 = vst [vmem:[#allocation90_spill] sm:$0xff] %v7734_v55  ;;  %v7748_v20 = vsel %vm1488_vm1, %v1482_v61, %v1484_v54  ;;  %v7754_v25 = vsel %vm1488_vm1, %v1484_v54, %v10134_v59 }
 0x19c   :  { %10131 = vst [vmem:[#allocation92_spill] sm:$0xff] %v7742_v8  ;;  %10132 = vst [vmem:[#allocation93_spill] sm:$0xff] %v7744_v26  ;;  %v7758_v4 = vmul.f32 %v7361_v9, %v7748_v20  ;;  %v7762_v27 = vmul.f32 %v7384_v33, %v7754_v25  ;;  %v1485_v0 = vrot.slane %v7744_v26, 7 }
 0x19d   :  { %10133 = vst [vmem:[#allocation94_spill] sm:$0xff] %v7748_v20  ;;  %10135 = vst [vmem:[#allocation95_spill] sm:$0xff] %v7754_v25 }
 0x19e   :  { %v7767_v61 = vsel %vm1488_vm1, %v1483_v48, %v1485_v0  ;;  %v7773_v54 = vsel %vm1488_vm1, %v1485_v0, %v10137_v34 }
 0x19f   :  { %10136 = vst [vmem:[#allocation96_spill] sm:$0xff] %v7767_v61  ;;  %10138 = vst [vmem:[#allocation97_spill] sm:$0xff] %v7773_v54  ;;  %v7777_v59 = vmul.f32 %v7361_v9, %v7767_v61  ;;  %v7781_v60 = vmul.f32 %v7384_v33, %v7773_v54 }
 0x1a0   :  { %6557 = dma.done.wait [#allocation3], 2048 }
 0x1a1   :  { %6558 = vsyncadd [#allocation3], 4294965248  ;;  %v6576_v17 = vmov 1   ;;  %v7783_v48 = vld [vmem:[#allocation2] sm:$0xf] }
 0x1a2   :  { %6408 = vset.pattern.permute.xlu1 %v6576_v17  ;;  %6407 = vset.pattern.permute.xlu0 %v6576_v17  ;;  %10139 = vst [vmem:[#allocation98_spill] sm:$0xff] %v7783_v48  ;;  %v7785_v20 = vld [vmem:[#allocation2 + $0x4] sm:$0xf]  ;;  %v7787_v37 = vld [vmem:[#allocation2 + $0x8] sm:$0xf] }
 0x1a3   :  { %10140 = vst [vmem:[#allocation99_spill] sm:$0xff] %v7785_v20  ;;  %10141 = vst [vmem:[#allocation100_spill] sm:$0xff] %v7787_v37  ;;  %v7789_v0 = vld [vmem:[#allocation2 + $0xc] sm:$0xf]  ;;  %v7791_v34 = vld [vmem:[#allocation2 + $0x10] sm:$0xf] }
 0x1a4   :  { %10142 = vst [vmem:[#allocation101_spill] sm:$0xff] %v7789_v0  ;;  %10143 = vst [vmem:[#allocation102_spill] sm:$0xff] %v7791_v34  ;;  %v7793_v9 = vld [vmem:[#allocation2 + $0x14] sm:$0xf]  ;;  %v7795_v61 = vld [vmem:[#allocation2 + $0x18] sm:$0xf] }
 0x1a5   :  { %10144 = vst [vmem:[#allocation103_spill] sm:$0xff] %v7793_v9  ;;  %10145 = vst [vmem:[#allocation104_spill] sm:$0xff] %v7795_v61  ;;  %v7797_v33 = vld [vmem:[#allocation2 + $0x1c] sm:$0xf]  ;;  %v7799_v50 = vld [vmem:[#allocation2 + $0x20] sm:$0xf] }
 0x1a6   :  { %10146 = vst [vmem:[#allocation105_spill] sm:$0xff] %v7797_v33  ;;  %10147 = vst [vmem:[#allocation106_spill] sm:$0xff] %v7799_v50  ;;  %v7801_v54 = vld [vmem:[#allocation2 + $0x24] sm:$0xf]  ;;  %v7803_v17 = vld [vmem:[#allocation2 + $0x28] sm:$0xf] }
 0x1a7   :  { %10148 = vst [vmem:[#allocation107_spill] sm:$0xff] %v7801_v54  ;;  %10149 = vst [vmem:[#allocation108_spill] sm:$0xff] %v7803_v17  ;;  %v7805_v25 = vld [vmem:[#allocation2 + $0x2c] sm:$0xf]  ;;  %v7807_v43 = vld [vmem:[#allocation2 + $0x30] sm:$0xf] }
 0x1a8   :  { %10150 = vst [vmem:[#allocation109_spill] sm:$0xff] %v7805_v25  ;;  %10151 = vst [vmem:[#allocation110_spill] sm:$0xff] %v7807_v43  ;;  %v7809_v48 = vld [vmem:[#allocation2 + $0x34] sm:$0xf]  ;;  %v7811_v20 = vld [vmem:[#allocation2 + $0x38] sm:$0xf] }
 0x1a9   :  { %10152 = vst [vmem:[#allocation111_spill] sm:$0xff] %v7809_v48  ;;  %v7813_v37 = vld [vmem:[#allocation2 + $0x3c] sm:$0xf]  ;;  %v7815_v0 = vld [vmem:[#allocation2 + $0x40] sm:$0xf] }
 0x1aa   :  { %10153 = vst [vmem:[#allocation112_spill] sm:$0xff] %v7815_v0  ;;  %v7817_v34 = vld [vmem:[#allocation2 + $0x44] sm:$0xf]  ;;  %v7819_v9 = vld [vmem:[#allocation2 + $0x48] sm:$0xf] }
 0x1ab   :  { %10154 = vst [vmem:[#allocation113_spill] sm:$0xff] %v7817_v34  ;;  %10155 = vst [vmem:[#allocation114_spill] sm:$0xff] %v7819_v9  ;;  %v7821_v61 = vld [vmem:[#allocation2 + $0x4c] sm:$0xf]  ;;  %v7823_v33 = vld [vmem:[#allocation2 + $0x50] sm:$0xf] }
 0x1ac   :  { %10156 = vst [vmem:[#allocation115_spill] sm:$0xff] %v7821_v61  ;;  %10157 = vst [vmem:[#allocation116_spill] sm:$0xff] %v7823_v33  ;;  %v7825_v50 = vld [vmem:[#allocation2 + $0x54] sm:$0xf]  ;;  %v7827_v54 = vld [vmem:[#allocation2 + $0x58] sm:$0xf] }
 0x1ad   :  { %10158 = vst [vmem:[#allocation117_spill] sm:$0xff] %v7825_v50  ;;  %10159 = vst [vmem:[#allocation118_spill] sm:$0xff] %v7827_v54  ;;  %v7829_v17 = vld [vmem:[#allocation2 + $0x5c] sm:$0xf]  ;;  %v7831_v25 = vld [vmem:[#allocation2 + $0x60] sm:$0xf] }
 0x1ae   :  { %10160 = vst [vmem:[#allocation119_spill] sm:$0xff] %v7829_v17  ;;  %10161 = vst [vmem:[#allocation120_spill] sm:$0xff] %v7831_v25  ;;  %v7833_v43 = vld [vmem:[#allocation2 + $0x64] sm:$0xf]  ;;  %v7835_v48 = vld [vmem:[#allocation2 + $0x68] sm:$0xf] }
 0x1af   :  { %10162 = vst [vmem:[#allocation121_spill] sm:$0xff] %v7833_v43  ;;  %10163 = vst [vmem:[#allocation122_spill] sm:$0xff] %v7835_v48  ;;  %v7837_v0 = vld [vmem:[#allocation2 + $0x6c] sm:$0xf]  ;;  %v7839_v34 = vld [vmem:[#allocation2 + $0x70] sm:$0xf] }
 0x1b0   :  { %10164 = vst [vmem:[#allocation123_spill] sm:$0xff] %v7837_v0  ;;  %10165 = vst [vmem:[#allocation124_spill] sm:$0xff] %v7839_v34  ;;  %v7841_v9 = vld [vmem:[#allocation2 + $0x74] sm:$0xf]  ;;  %v7843_v61 = vld [vmem:[#allocation2 + $0x78] sm:$0xf] }
 0x1b1   :  { %v7845_v33 = vld [vmem:[#allocation2 + $0x7c] sm:$0xf]  ;;  %v1703_v50 = vld [vmem:[%s9848_s9 + $0x10] sm:$0xff]  ;;  %v1701_v54 = vld [vmem:[%s9848_s9] sm:$0xff] }
 0x1b2   :  { %1729 = vperm.xlu1 %6408, %v1703_v50   ;;  %1719 = vperm.xlu0 %6407, %v1701_v54   ;;  %v1704_v17 = vld [vmem:[%s9848_s9 + $0x18] sm:$0xff]  ;;  %v1702_v25 = vld [vmem:[%s9848_s9 + $0x8] sm:$0xff]  ;;  %v1705_v50 = vld [vmem:[%s9848_s9 + $0x20] sm:$0xff] }
 0x1b3   :  { %v1706_v43 = vld [vmem:[%s9848_s9 + $0x28] sm:$0xff]  ;;  %v1708_v54 = vld [vmem:[%s9848_s9 + $0x38] sm:$0xff]  ;;  %v1707_v48 = vld [vmem:[%s9848_s9 + $0x30] sm:$0xff] }
 0x1b6   :  { %1734 = vperm.xlu1 %6408, %v1704_v17   ;;  %1724 = vperm.xlu0 %6407, %v1702_v25   ;;  %v1710_v25 = vld [vmem:[%s9848_s9 + $0x48] sm:$0xff]  ;;  %v1709_v17 = vld [vmem:[%s9848_s9 + $0x40] sm:$0xff] }
 0x1ba   :  { %1744 = vperm.xlu1 %6408, %v1706_v43   ;;  %1739 = vperm.xlu0 %6407, %v1705_v50   ;;  %v1712_v43 = vld [vmem:[%s9848_s9 + $0x58] sm:$0xff]  ;;  %v1711_v50 = vld [vmem:[%s9848_s9 + $0x50] sm:$0xff] }
 0x1be   :  { %1754 = vperm.xlu1 %6408, %v1708_v54   ;;  %1749 = vperm.xlu0 %6407, %v1707_v48   ;;  %v1714_v48 = vld [vmem:[%s9848_s9 + $0x68] sm:$0xff]  ;;  %v1713_v54 = vld [vmem:[%s9848_s9 + $0x60] sm:$0xff] }
 0x1c2   :  { %1764 = vperm.xlu1 %6408, %v1710_v25   ;;  %1759 = vperm.xlu0 %6407, %v1709_v17   ;;  %v1716_v25 = vld [vmem:[%s9848_s9 + $0x78] sm:$0xff] }
 0x1c6   :  { %1774 = vperm.xlu1 %6408, %v1712_v43   ;;  %1769 = vperm.xlu0 %6407, %v1711_v50  }
 0x1ca   :  { %1784 = vperm.xlu1 %6408, %v1714_v48   ;;  %1779 = vperm.xlu0 %6407, %v1713_v54   ;;  %v1715_v48 = vld [vmem:[%s9848_s9 + $0x70] sm:$0xff] }
 0x1ce   :  { %1794 = vperm.xlu1 %6408, %v1716_v25   ;;  %1789 = vperm.xlu0 %6407, %v1715_v48  }
 0x22d   :  { %v1730_v0 = vpop.permute.xlu1 %1729  ;;  %v1720_v25 = vpop.permute.xlu0 %1719 }
 0x22e   :  { %v7928_v53 = vmul.f32 %v1730_v0, %v7367_v14  ;;  %v7931_v54 = vmul.f32 %v1730_v0, %v7375_v21  ;;  %v7934_v34 = vmul.f32 %v1720_v25, %v7726_v12  ;;  %v1798_v17 = vmul.f32 %v1720_v25, %v7744_v26 }
 0x231   :  { %v1735_v2 = vpop.permute.xlu1 %1734  ;;  %v1725_v48 = vpop.permute.xlu0 %1724 }
 0x232   :  { %v7938_v43 = vmul.f32 %v1735_v2, %v7388_v35  ;;  %v7941_v50 = vmul.f32 %v1735_v2, %v7396_v47  ;;  %v7944_v14 = vmul.f32 %v1725_v48, %v7363_v10  ;;  %v1800_v0 = vmul.f32 %v1725_v48, %v7365_v11 }
 0x235   :  { %v1745_v21 = vpop.permute.xlu1 %1744  ;;  %v1740_v25 = vpop.permute.xlu0 %1739 }
 0x236   :  { %v7948_v18 = vmul.f32 %v1745_v21, %v7451_v28  ;;  %v7951_v12 = vmul.f32 %v1745_v21, %v7457_v31  ;;  %v7954_v26 = vmul.f32 %v1740_v25, %v7415_v62  ;;  %v7957_v2 = vmul.f32 %v1740_v25, %v7427_v7  ;;  %v10166_v62 = vld [vmem:[#allocation52_spill] sm:$0xff]  ;;  %v10168_v25 = vld [vmem:[#allocation55_spill] sm:$0xff] }
 0x239   :  { %v1755_v47 = vpop.permute.xlu1 %1754  ;;  %v1750_v11 = vpop.permute.xlu0 %1749 }
 0x23a   :  { %v7960_v10 = vmul.f32 %v1755_v47, %v7499_v32  ;;  %v7963_v48 = vmul.f32 %v1755_v47, %v7519_v13  ;;  %v7966_v28 = vmul.f32 %v1750_v11, %v7476_v3  ;;  %v7969_v21 = vmul.f32 %v1750_v11, %v7482_v38  ;;  %v10169_v32 = vld [vmem:[#allocation49_spill] sm:$0xff]  ;;  %v10170_v47 = vld [vmem:[#allocation50_spill] sm:$0xff]  ;;  %v10173_v11 = vld [vmem:[#allocation63_spill] sm:$0xff] }
 0x23b   :  { %v10171_v3 = vld [vmem:[#allocation62_spill] sm:$0xff] }
 0x23d   :  { %v1765_v31 = vpop.permute.xlu1 %1764  ;;  %v1760_v55 = vpop.permute.xlu0 %1759 }
 0x23e   :  { %v7972_v35 = vmul.f32 %v1765_v31, %v10166_v62  ;;  %v7975_v7 = vmul.f32 %v1765_v31, %v10168_v25  ;;  %v7978_v49 = vmul.f32 %v1760_v55, %v10169_v32  ;;  %v7981_v13 = vmul.f32 %v1760_v55, %v10170_v47  ;;  %v10175_v62 = vld [vmem:[#allocation56_spill] sm:$0xff]  ;;  %v10176_v31 = vld [vmem:[#allocation59_spill] sm:$0xff]  ;;  %v10177_v32 = vld [vmem:[#allocation70_spill] sm:$0xff] }
 0x23f   :  { %v10179_v55 = vld [vmem:[#allocation75_spill] sm:$0xff] }
 0x240   :  { %10167 = vst [vmem:[#allocation125_spill] sm:$0xff] %v7972_v35 }
 0x241   :  { %v1775_v8 = vpop.permute.xlu1 %1774  ;;  %v1770_v1 = vpop.permute.xlu0 %1769 }
 0x242   :  { %v7984_v63 = vmul.f32 %v1775_v8, %v10171_v3  ;;  %v7987_v38 = vmul.f32 %v1775_v8, %v10173_v11  ;;  %v7990_v45 = vmul.f32 %v1770_v1, %v10175_v62  ;;  %v7993_v25 = vmul.f32 %v1770_v1, %v10176_v31  ;;  %v10180_v3 = vld [vmem:[#allocation66_spill] sm:$0xff]  ;;  %v10181_v8 = vld [vmem:[#allocation69_spill] sm:$0xff] }
 0x244   :  { %10172 = vst [vmem:[#allocation126_spill] sm:$0xff] %v7984_v63  ;;  %10174 = vst [vmem:[#allocation127_spill] sm:$0xff] %v7987_v38 }
 0x245   :  { %v1785_v24 = vpop.permute.xlu1 %1784  ;;  %v1780_v35 = vpop.permute.xlu0 %1779 }
 0x246   :  { %v7996_v6 = vmul.f32 %v1785_v24, %v10177_v32  ;;  %v7999_v47 = vmul.f32 %v1785_v24, %v10179_v55  ;;  %v8002_v63 = vmul.f32 %v1780_v35, %v10180_v3  ;;  %v8005_v11 = vmul.f32 %v1780_v35, %v10181_v8  ;;  %v10183_v32 = vld [vmem:[#allocation78_spill] sm:$0xff] }
 0x248   :  { %10178 = vst [vmem:[#allocation128_spill] sm:$0xff] %v7996_v6 }
 0x249   :  { %v1795_v38 = vpop.permute.xlu1 %1794  ;;  %v1790_v31 = vpop.permute.xlu0 %1789 }
 0x24a   :  { %v8008_v62 = vmul.f32 %v1795_v38, %v7708_v40  ;;  %v8011_v1 = vmul.f32 %v1795_v38, %v7717_v39  ;;  %v8014_v6 = vmul.f32 %v1790_v31, %v10183_v32  ;;  %v8017_v24 = vmul.f32 %v1790_v31, %v7689_v19 }
 0x24c   :  { %10182 = vst [vmem:[#allocation129_spill] sm:$0xff] %v8008_v62 }
 0x24d   :  { %6559 = dma.done.wait [#allocation3 + $0x1], 2048 }
 0x24e   :  { %6560 = vsyncadd [#allocation3 + $0x1], 4294965248  ;;  %v5538_v35 = vcombine.low %v7843_v61, %v7845_v33  ;;  %v5530_v55 = vcombine.low %v7811_v20, %v7813_v37  ;;  %v10184_v40 = vld [vmem:[#allocation124_spill] sm:$0xff]  ;;  %v10185_v38 = vpack.c.bf16 %v7781_v60, %v7777_v59  ;;  %v10186_v39 = vld [vmem:[#allocation111_spill] sm:$0xff]  ;;  %v1832_v61 = vpack.c.bf16 %v1800_v0, %v1798_v17 }
 0x24f   :  { %v5537_v8 = vcombine.low %v10184_v40, %v7841_v9  ;;  %v10187_v31 = vld [vmem:[#allocation110_spill] sm:$0xff]  ;;  %v10188_v32 = vld [vmem:[#allocation123_spill] sm:$0xff]  ;;  %v6411_v37 = vld [vmem:[#allocation2 + $0xf8] sm:$0xff]  }
 0x250   :  { %2200 = vmatprep.mubr.bf16.mxu0 %v10185_v38  ;;  %5735 = vmatprep.subr.bf16.mxu0 %v5538_v35  ;;  %v5529_v19 = vcombine.low %v10187_v31, %v10186_v39  ;;  %v10189_v3 = vld [vmem:[#allocation122_spill] sm:$0xff]  ;;  %v10190_v20 = vld [vmem:[#allocation109_spill] sm:$0xff]  ;;  %v10191_v33 = vld [vmem:[#allocation108_spill] sm:$0xff]  ;;  %v6577_v38 = vmov 2  }
 0x251   :  { %5736 = vmatpush3.bf16.msra.mxu0 %v5530_v55  ;;  %v5536_v62 = vcombine.low %v10189_v3, %v10188_v32  ;;  %2007 = vmatprep.mubr.bf16.mxu1 %v1832_v61  ;;  %v5528_v40 = vcombine.low %v10191_v33, %v10190_v20  ;;  %v6412_v9 = vld [vmem:[#allocation2 + $0xb8] sm:$0xff]   ;;  %v10193_v59 = vld [vmem:[#allocation120_spill] sm:$0xff]  ;;  %v10194_v3 = vld [vmem:[#allocation107_spill] sm:$0xff] }
 0x252   :  { %5737 = vmatprep.subr.bf16.mxu0 %v5537_v8  ;;  %v10192_v60 = vld [vmem:[#allocation121_spill] sm:$0xff]  ;;  %5671 = vmatprep.subr.bf16.mxu1 %v6411_v37  ;;  %v6413_v55 = vld [vmem:[#allocation2 + $0xf0] sm:$0xff]   ;;  %v10195_v32 = vld [vmem:[#allocation106_spill] sm:$0xff] }
 0x253   :  { %v5535_v35 = vcombine.low %v10193_v59, %v10192_v60  ;;  %6410 = vset.pattern.permute.xlu1 %v6577_v38  ;;  %5672 = vmatpush3.bf16.msra.mxu1 %v6412_v9  ;;  %v6414_v39 = vld [vmem:[#allocation2 + $0xb0] sm:$0xff]   ;;  %v6415_v17 = vld [vmem:[#allocation2 + $0xe8] sm:$0xff]   ;;  %v10197_v8 = vld [vmem:[#allocation118_spill] sm:$0xff] }
 0x254   :  { %6409 = vset.pattern.permute.xlu0 %v6577_v38  ;;  %5673 = vmatprep.subr.bf16.mxu1 %v6413_v55  ;;  %v10196_v0 = vld [vmem:[#allocation119_spill] sm:$0xff]  ;;  %v10198_v61 = vld [vmem:[#allocation105_spill] sm:$0xff]  ;;  %v10199_v37 = vld [vmem:[#allocation104_spill] sm:$0xff] }
 0x255   :  { %5738 = vmatpush3.bf16.msra.mxu0 %v5529_v19  ;;  %v5527_v19 = vcombine.low %v10195_v32, %v10194_v3  ;;  %v6416_v31 = vld [vmem:[#allocation2 + $0xa8] sm:$0xff]   ;;  %v5526_v20 = vcombine.low %v10199_v37, %v10198_v61  ;;  %v6417_v33 = vld [vmem:[#allocation2 + $0xe0] sm:$0xff]   ;;  %v10200_v9 = vld [vmem:[#allocation117_spill] sm:$0xff] }
 0x256   :  { %5739 = vmatprep.subr.bf16.mxu0 %v5536_v62  ;;  %v5534_v62 = vcombine.low %v10197_v8, %v10196_v0  ;;  %v6418_v59 = vld [vmem:[#allocation2 + $0xa0] sm:$0xff]   ;;  %v6419_v3 = vld [vmem:[#allocation2 + $0xd8] sm:$0xff]   ;;  %v10207_v8 = vld [vmem:[#allocation100_spill] sm:$0xff] }
 0x257   :  { %5674 = vmatpush3.bf16.msra.mxu1 %v6414_v39  ;;  %v10203_v55 = vld [vmem:[#allocation102_spill] sm:$0xff]  ;;  %v10204_v39 = vld [vmem:[#allocation115_spill] sm:$0xff]  ;;  %v10206_v0 = vld [vmem:[#allocation101_spill] sm:$0xff] }
 0x258   :  { %5675 = vmatprep.subr.bf16.mxu1 %v6415_v17  ;;  %v10205_v32 = vld [vmem:[#allocation114_spill] sm:$0xff]  ;;  %v6420_v17 = vld [vmem:[#allocation2 + $0x98] sm:$0xff]   ;;  %v6421_v61 = vld [vmem:[#allocation2 + $0xd0] sm:$0xff]  }
 0x259   :  { %5740 = vmatpush3.bf16.msra.mxu0 %v5528_v40  ;;  %v10201_v40 = vld [vmem:[#allocation116_spill] sm:$0xff]  ;;  %v2330_v37 = vld [vmem:[%s9848_s9] sm:$0xff] }
 0x25a   :  { %5741 = vmatprep.subr.bf16.mxu0 %v5535_v35  ;;  %v5533_v60 = vcombine.low %v10201_v40, %v10200_v9  ;;  %v10202_v35 = vld [vmem:[#allocation103_spill] sm:$0xff]  ;;  %2348 = vperm.xlu0 %6409, %v2330_v37   ;;  %v2333_v40 = vld [vmem:[%s9848_s9 + $0x18] sm:$0xff]  ;;  %v1831_v37 = vpack.c.bf16 %v7944_v14, %v7934_v34  ;;  %v2340_v34 = vld [vmem:[%s9848_s9 + $0x50] sm:$0xff] }
 0x25b   :  { %5676 = vmatpush3.bf16.msra.mxu1 %v6416_v31  ;;  %v5525_v38 = vcombine.low %v10203_v55, %v10202_v35  ;;  %v2332_v31 = vld [vmem:[%s9848_s9 + $0x10] sm:$0xff]  ;;  %v10210_v35 = vld [vmem:[#allocation99_spill] sm:$0xff]  ;;  %v10211_v55 = vld [vmem:[#allocation98_spill] sm:$0xff] }
 0x25c   :  { %5677 = vmatprep.subr.bf16.mxu1 %v6417_v33  ;;  %v10209_v33 = vld [vmem:[#allocation112_spill] sm:$0xff]  ;;  %2358 = vperm.xlu1 %6410, %v2332_v31   ;;  %v10213_v31 = vpack.c.bf16 %v7439_v16, %v7411_v56  ;;  %v2341_v14 = vld [vmem:[%s9848_s9 + $0x58] sm:$0xff]  ;;  %v10214_v56 = vld [vmem:[#allocation31_spill] sm:$0xff] }
 0x25d   :  { %5742 = vmatpush3.bf16.msra.mxu0 %v5527_v19  ;;  %v5532_v19 = vcombine.low %v10205_v32, %v10204_v39  ;;  %v2335_v39 = vld [vmem:[%s9848_s9 + $0x28] sm:$0xff]  ;;  %v10215_v16 = vpack.c.bf16 %v7436_v15, %v10214_v56  ;;  %v1836_v15 = vpack.c.bf16 %v7951_v12, %v7957_v2  ;;  %v10218_v12 = vpack.c.bf16 %v7550_v58, %v7523_v23 }
 0x25e   :  { %5743 = vmatprep.subr.bf16.mxu0 %v5534_v62  ;;  %v5524_v62 = vcombine.low %v10207_v8, %v10206_v0  ;;  %v6424_v32 = vld [vmem:[#allocation2 + $0x88] sm:$0xff]   ;;  %v2337_v0 = vld [vmem:[%s9848_s9 + $0x38] sm:$0xff]  ;;  %v10212_v8 = vpack.c.bf16 %v7762_v27, %v7758_v4  ;;  %v1834_v27 = vpack.c.bf16 %v7941_v50, %v7931_v54  ;;  %v10216_v50 = vpack.c.bf16 %v7494_v22, %v7468_v52  ;;  %v2344_v22 = vld [vmem:[%s9848_s9 + $0x70] sm:$0xff] }
 0x25f   :  { %5678 = vmatpush3.bf16.msra.mxu1 %v6418_v59  ;;  %v2331_v59 = vld [vmem:[%s9848_s9 + $0x8] sm:$0xff]  ;;  %v1833_v54 = vpack.c.bf16 %v7938_v43, %v7928_v53  ;;  %v2345_v52 = vld [vmem:[%s9848_s9 + $0x78] sm:$0xff]  ;;  %v10217_v53 = vpack.c.bf16 %v7490_v44, %v7455_v30  ;;  %v1835_v43 = vpack.c.bf16 %v7948_v18, %v7954_v26  ;;  %v1838_v2 = vpack.c.bf16 %v7963_v48, %v7969_v21  ;;  %v10231_v48 = vld [vmem:[#allocation126_spill] sm:$0xff] }
 0x260   :  { %5679 = vmatprep.subr.bf16.mxu1 %v6419_v3  ;;  %v6423_v3 = vld [vmem:[#allocation2 + $0xc8] sm:$0xff]   ;;  %2363 = vperm.xlu1 %6410, %v2333_v40   ;;  %v10219_v30 = vpack.c.bf16 %v7536_v57, %v7516_v51  ;;  %v10220_v44 = vpack.c.bf16 %v7598_v29, %v7574_v41  ;;  %v1837_v23 = vpack.c.bf16 %v7960_v10, %v7966_v28  ;;  %v10223_v57 = vld [vmem:[#allocation125_spill] sm:$0xff]  ;;  %v10233_v21 = vld [vmem:[#allocation72_spill] sm:$0xff] }
 0x261   :  { %5744 = vmatpush3.bf16.msra.mxu0 %v5526_v20  ;;  %v10208_v20 = vld [vmem:[#allocation113_spill] sm:$0xff]  ;;  %2353 = vperm.xlu0 %6409, %v2331_v59   ;;  %v2339_v4 = vld [vmem:[%s9848_s9 + $0x48] sm:$0xff]  ;;  %v1840_v58 = vpack.c.bf16 %v7975_v7, %v7981_v13  ;;  %v10221_v18 = vpack.c.bf16 %v7589_v36, %v7567_v5  ;;  %v10222_v51 = vpack.c.bf16 %v7649_v42, %v7627_v46  ;;  %v10229_v5 = vld [vmem:[#allocation74_spill] sm:$0xff] }
 0x262   :  { %5745 = vmatprep.subr.bf16.mxu0 %v5533_v60  ;;  %v5531_v9 = vcombine.low %v10209_v33, %v10208_v20  ;;  %v6422_v60 = vld [vmem:[#allocation2 + $0x90] sm:$0xff]   ;;  %v2338_v20 = vld [vmem:[%s9848_s9 + $0x40] sm:$0xff]  ;;  %v2343_v33 = vld [vmem:[%s9848_s9 + $0x68] sm:$0xff]  ;;  %v1839_v41 = vpack.c.bf16 %v10223_v57, %v7978_v49  ;;  %v1841_v42 = vpack.c.bf16 %v10231_v48, %v7990_v45  ;;  %v1844_v46 = vpack.c.bf16 %v7999_v47, %v8005_v11 }
 0x263   :  { %5680 = vmatpush3.bf16.msra.mxu1 %v6420_v17  ;;  %v6425_v17 = vld [vmem:[#allocation2 + $0xc0] sm:$0xff]   ;;  %v10224_v29 = vld [vmem:[#allocation127_spill] sm:$0xff]  ;;  %v10226_v28 = vld [vmem:[#allocation61_spill] sm:$0xff] }
 0x264   :  { %5681 = vmatprep.subr.bf16.mxu1 %v6421_v61  ;;  %2373 = vperm.xlu1 %6410, %v2335_v39   ;;  %v2336_v61 = vld [vmem:[%s9848_s9 + $0x30] sm:$0xff]  ;;  %v1842_v26 = vpack.c.bf16 %v10224_v29, %v7993_v25  ;;  %v10225_v10 = vld [vmem:[#allocation67_spill] sm:$0xff]  ;;  %v10228_v13 = vld [vmem:[#allocation81_spill] sm:$0xff] }
 0x265   :  { %5746 = vmatpush3.bf16.msra.mxu0 %v5525_v38  ;;  %v5523_v38 = vcombine.low %v10211_v55, %v10210_v35  ;;  %v10227_v7 = vpack.c.bf16 %v10225_v10, %v10226_v28  ;;  %v10230_v36 = vpack.c.bf16 %v10228_v13, %v10229_v5  ;;  %v10232_v49 = vld [vmem:[#allocation77_spill] sm:$0xff]  ;;  %v10235_v40 = vld [vmem:[#allocation92_spill] sm:$0xff]  ;;  %v10239_v45 = vld [vmem:[#allocation90_spill] sm:$0xff] }
 0x266   :  { %5747 = vmatprep.subr.bf16.mxu0 %v5532_v19  ;;  %v2334_v19 = vld [vmem:[%s9848_s9 + $0x20] sm:$0xff]  ;;  %v10234_v25 = vpack.c.bf16 %v10232_v49, %v10233_v21  ;;  %v10238_v35 = vld [vmem:[#allocation128_spill] sm:$0xff]  ;;  %v10242_v11 = vld [vmem:[#allocation129_spill] sm:$0xff] }
 0x267   :  { %5682 = vmatpush3.bf16.msra.mxu1 %v6422_v60  ;;  %2368 = vperm.xlu0 %6409, %v2334_v19   ;;  %v10236_v60 = vld [vmem:[#allocation87_spill] sm:$0xff]  ;;  %v1843_v55 = vpack.c.bf16 %v10238_v35, %v8002_v63  ;;  %v1845_v39 = vpack.c.bf16 %v10242_v11, %v8014_v6  ;;  %v10246_v63 = vld [vmem:[#allocation29_spill] sm:$0xff]  ;;  %v10252_v6 = vld [vmem:[#allocation32_spill] sm:$0xff] }
 0x268   :  { %5683 = vmatprep.subr.bf16.mxu1 %v6423_v3  ;;  %2383 = vperm.xlu1 %6410, %v2337_v0   ;;  %v10237_v59 = vpack.c.bf16 %v10235_v40, %v10236_v60  ;;  %v10240_v3 = vld [vmem:[#allocation84_spill] sm:$0xff]  ;;  %v10263_v29 = vld [vmem:[#allocation42_spill] sm:$0xff] }
 0x269   :  { %5748 = vmatpush3.bf16.msra.mxu0 %v5524_v62  ;;  %v6426_v62 = vld [vmem:[#allocation2 + $0x80] sm:$0xff]   ;;  %v10241_v47 = vpack.c.bf16 %v10239_v45, %v10240_v3  ;;  %v10262_v57 = vld [vmem:[#allocation40_spill] sm:$0xff] }
 0x26a   :  { %5749 = vmatprep.subr.bf16.mxu0 %v5531_v9  ;;  %v2342_v9 = vld [vmem:[%s9848_s9 + $0x60] sm:$0xff]  ;;  %v10266_v13 = vld [vmem:[#allocation44_spill] sm:$0xff] }
 0x26b   :  { %5684 = vmatpush3.bf16.msra.mxu1 %v6424_v32  ;;  %2378 = vperm.xlu0 %6409, %v2336_v61   ;;  %v10243_v32 = vld [vmem:[#allocation25_spill] sm:$0xff]  ;;  %v2270_v61 = vrot.slane %v10246_v63, 1  ;;  %v2277_v5 = vrot.slane %v10266_v13, 1  ;;  %v10269_v49 = vld [vmem:[#allocation50_spill] sm:$0xff] }
 0x26c   :  { %5685 = vmatprep.subr.bf16.mxu1 %v6425_v17  ;;  %2393 = vperm.xlu1 %6410, %v2339_v4   ;;  %v2267_v19 = vrot.slane %v10243_v32, 1  ;;  %v10244_v17 = vld [vmem:[#allocation26_spill] sm:$0xff]  ;;  %v2280_v21 = vrot.slane %v10269_v49, 1 }
 0x26d   :  { %5750 = vmatpush3.bf16.msra.mxu0 %v5523_v38  ;;  %v1846_v38 = vpack.c.bf16 %v8011_v1, %v8017_v24  ;;  %v2268_v0 = vrot.slane %v10244_v17, 1  ;;  %v10248_v1 = vld [vmem:[#allocation23_spill] sm:$0xff] }
 0x26e   :  { %v2265_v24 = vrot.slane %v10248_v1, 1 }
 0x26f   :  { %5686 = vmatpush3.bf16.msra.mxu1 %v6426_v62  ;;  %2388 = vperm.xlu0 %6409, %v2338_v20  }
 0x270   :  { %2201 = vmatmul.mubr.bf16.vlgmr.msra.gmra.mxu0 %v10212_v8  ;;  %2403 = vperm.xlu1 %6410, %v2341_v14   ;;  %v10245_v8 = vld [vmem:[#allocation27_spill] sm:$0xff]  ;;  %v10251_v14 = vld [vmem:[#allocation93_spill] sm:$0xff] }
 0x271   :  { %2208 = vmatprep.mubr.bf16.mxu0 %v10213_v31  ;;  %v2269_v62 = vrot.slane %v10245_v8, 1  ;;  %v10247_v31 = vld [vmem:[#allocation22_spill] sm:$0xff]  ;;  %v9993_v56 = vrot.slane %v10251_v14, 1 }
 0x272   :  { %2008 = vmatmul.mubr.bf16.vlgmr.msra.gmra.mxu1 %v1831_v37  ;;  %vm2297_vm2 = vcmp.lt.s32.totalorder %v10247_v31, 7  ;;  %v10249_v37 = vld [vmem:[#allocation24_spill] sm:$0xff] }
 0x273   :  { %2015 = vmatprep.mubr.bf16.mxu1 %v1834_v27  ;;  %2398 = vperm.xlu0 %6409, %v2340_v34   ;;  %v2266_v4 = vrot.slane %v10249_v37, 1  ;;  %v10250_v27 = vld [vmem:[#allocation88_spill] sm:$0xff]  ;;  %v10253_v34 = vld [vmem:[#allocation34_spill] sm:$0xff]  ;;  %v8234_v10 = vsel %vm2297_vm2, %v2265_v24, %v2267_v19 }
 0x274   :  { %2413 = vperm.xlu1 %6410, %v2343_v33   ;;  %v9994_v20 = vrot.slane %v10250_v27, 1  ;;  %v8194_v33 = vsel %vm2297_vm2, %v2268_v0, %v2270_v61  ;;  %10264 = vst [vmem:[#allocation108_spill] sm:$0xff] %v8234_v10 }
 0x275   :  { %10255 = vst [vmem:[#allocation111_spill] sm:$0xff] %v8194_v33  ;;  %v8238_v28 = vsel %vm2297_vm2, %v2266_v4, %v2268_v0 }
 0x276   :  { %10265 = vst [vmem:[#allocation121_spill] sm:$0xff] %v8238_v28 }
 0x277   :  { %2408 = vperm.xlu0 %6409, %v2342_v9   ;;  %v8206_v9 = vsel %vm2297_vm2, %v9993_v56, %v2266_v4  ;;  %v10277_v4 = vld [vmem:[#allocation55_spill] sm:$0xff] }
 0x278   :  { %2209 = vmatmul.mubr.bf16.gmra.mxu0 %v10215_v16  ;;  %2423 = vperm.xlu1 %6410, %v2345_v52   ;;  %v2271_v16 = vrot.slane %v10252_v6, 1  ;;  %10257 = vst [vmem:[#allocation123_spill] sm:$0xff] %v8206_v9 }
 0x279   :  { %2216 = vmatprep.mubr.bf16.mxu0 %v10216_v50  ;;  %v2272_v50 = vrot.slane %v10253_v34, 1 }
 0x27a   :  { %2016 = vmatmul.mubr.bf16.gmra.mxu1 %v1833_v54  ;;  %v8190_v54 = vsel %vm2297_vm2, %v2267_v19, %v2269_v62 }
 0x27b   :  { %2023 = vmatprep.mubr.bf16.mxu1 %v1836_v15  ;;  %2418 = vperm.xlu0 %6409, %v2344_v22   ;;  %10254 = vst [vmem:[#allocation124_spill] sm:$0xff] %v8190_v54  ;;  %v8200_v15 = vsel %vm2297_vm2, %v9994_v20, %v2265_v24  ;;  %v8214_v22 = vsel %vm2297_vm2, %v2270_v61, %v2272_v50  ;;  %v10276_v61 = vld [vmem:[#allocation52_spill] sm:$0xff]  ;;  %v10282_v20 = vld [vmem:[#allocation62_spill] sm:$0xff] }
 0x27c   :  { %10256 = vst [vmem:[#allocation110_spill] sm:$0xff] %v8200_v15  ;;  %10259 = vst [vmem:[#allocation109_spill] sm:$0xff] %v8214_v22  ;;  %v2281_v24 = vrot.slane %v10276_v61, 1 }
 0x280   :  { %2217 = vmatmul.mubr.bf16.gmra.mxu0 %v10217_v53  ;;  %v8210_v53 = vsel %vm2297_vm2, %v2269_v62, %v2271_v16 }
 0x281   :  { %2224 = vmatprep.mubr.bf16.mxu0 %v10218_v12  ;;  %10258 = vst [vmem:[#allocation122_spill] sm:$0xff] %v8210_v53 }
 0x282   :  { %2024 = vmatmul.mubr.bf16.gmra.mxu1 %v1835_v43 }
 0x283   :  { %2031 = vmatprep.mubr.bf16.mxu1 %v1838_v2 }
 0x288   :  { %2225 = vmatmul.mubr.bf16.gmra.mxu0 %v10219_v30  ;;  %v10260_v30 = vld [vmem:[#allocation37_spill] sm:$0xff] }
 0x289   :  { %2232 = vmatprep.mubr.bf16.mxu0 %v10220_v44  ;;  %v2273_v44 = vrot.slane %v10260_v30, 1 }
 0x28a   :  { %2032 = vmatmul.mubr.bf16.gmra.mxu1 %v1837_v23  ;;  %v10261_v23 = vld [vmem:[#allocation38_spill] sm:$0xff] }
 0x28b   :  { %2039 = vmatprep.mubr.bf16.mxu1 %v1840_v58  ;;  %v2274_v58 = vrot.slane %v10261_v23, 1  ;;  %v8266_v45 = vsel %vm2297_vm2, %v2271_v16, %v2273_v44  ;;  %v2282_v16 = vrot.slane %v10277_v4, 1 }
 0x28c   :  { %10272 = vst [vmem:[#allocation106_spill] sm:$0xff] %v8266_v45 }
 0x28d   :  { %v8270_v3 = vsel %vm2297_vm2, %v2272_v50, %v2274_v58 }
 0x28e   :  { %10273 = vst [vmem:[#allocation119_spill] sm:$0xff] %v8270_v3 }
 0x290   :  { %2233 = vmatmul.mubr.bf16.gmra.mxu0 %v10221_v18 }
 0x291   :  { %2240 = vmatprep.mubr.bf16.mxu0 %v10222_v51 }
 0x292   :  { %2040 = vmatmul.mubr.bf16.gmra.mxu1 %v1839_v41  ;;  %v2275_v41 = vrot.slane %v10262_v57, 1 }
 0x293   :  { %2047 = vmatprep.mubr.bf16.mxu1 %v1842_v26  ;;  %v2276_v26 = vrot.slane %v10263_v29, 1 }
 0x298   :  { %2241 = vmatmul.mubr.bf16.gmra.mxu0 %v10227_v7 }
 0x299   :  { %2248 = vmatprep.mubr.bf16.mxu0 %v10230_v36  ;;  %v10267_v36 = vld [vmem:[#allocation47_spill] sm:$0xff] }
 0x29a   :  { %2048 = vmatmul.mubr.bf16.gmra.mxu1 %v1841_v42  ;;  %v2278_v48 = vrot.slane %v10267_v36, 1  ;;  %v10268_v42 = vld [vmem:[#allocation49_spill] sm:$0xff] }
 0x29b   :  { %2055 = vmatprep.mubr.bf16.mxu1 %v1844_v46  ;;  %v2279_v46 = vrot.slane %v10268_v42, 1 }
 0x29d   :  { %v8274_v11 = vsel %vm2297_vm2, %v2277_v5, %v2279_v46 }
 0x29e   :  { %10274 = vst [vmem:[#allocation118_spill] sm:$0xff] %v8274_v11 }
 0x2a0   :  { %2249 = vmatmul.mubr.bf16.gmra.mxu0 %v10234_v25 }
 0x2a1   :  { %2256 = vmatprep.mubr.bf16.mxu0 %v10237_v59 }
 0x2a2   :  { %2056 = vmatmul.mubr.bf16.gmra.mxu1 %v1843_v55  ;;  %v8258_v55 = vsel %vm2297_vm2, %v2273_v44, %v2275_v41 }
 0x2a3   :  { %2063 = vmatprep.mubr.bf16.mxu1 %v1846_v38  ;;  %10270 = vst [vmem:[#allocation120_spill] sm:$0xff] %v8258_v55  ;;  %v8262_v38 = vsel %vm2297_vm2, %v2274_v58, %v2276_v26  ;;  %v10279_v58 = vld [vmem:[#allocation59_spill] sm:$0xff] }
 0x2a4   :  { %10271 = vst [vmem:[#allocation107_spill] sm:$0xff] %v8262_v38 }
 0x2a8   :  { %2257 = vmatmul.mubr.bf16.gmra.mxu0 %v10241_v47 }
 0x2aa   :  { %2064 = vmatmul.mubr.bf16.gmra.mxu1 %v1845_v39  ;;  %v8278_v39 = vsel %vm2297_vm2, %v2278_v48, %v2280_v21 }
 0x2ab   :  { %10275 = vst [vmem:[#allocation105_spill] sm:$0xff] %v8278_v39 }
 0x2d5   :  { %v2349_v2 = vpop.permute.xlu0 %2348 }
 0x2d6   :  { %v8225_v18 = vmul.f32 %v2349_v2, %v8200_v15  ;;  %v8228_v51 = vmul.f32 %v2349_v2, %v8206_v9  ;;  %v10278_v2 = vld [vmem:[#allocation56_spill] sm:$0xff]  ;;  %v2285_v9 = vrot.slane %v10282_v20, 1  ;;  %v10283_v15 = vld [vmem:[#allocation63_spill] sm:$0xff]  ;;  %v10294_v20 = vld [vmem:[#allocation78_spill] sm:$0xff] }
 0x2d7   :  { %v2359_v52 = vpop.permute.xlu1 %2358  ;;  %v2283_v44 = vrot.slane %v10278_v2, 1 }
 0x2d8   :  { %v8217_v12 = vmul.f32 %v2359_v52, %v8190_v54  ;;  %v8220_v43 = vmul.f32 %v2359_v52, %v8194_v33  ;;  %v10285_v33 = vld [vmem:[#allocation69_spill] sm:$0xff] }
 0x2d9   :  { %v2288_v54 = vrot.slane %v10285_v33, 1  ;;  %v2291_v33 = vrot.slane %v10294_v20, 1 }
 0x2db   :  { %v2364_v7 = vpop.permute.xlu1 %2363 }
 0x2dc   :  { %v8245_v25 = vmul.f32 %v2364_v7, %v8210_v53  ;;  %v8248_v40 = vmul.f32 %v2364_v7, %v8214_v22  ;;  %v2354_v60 = vpop.permute.xlu0 %2353  ;;  %v2284_v7 = vrot.slane %v10279_v58, 1 }
 0x2dd   :  { %v8251_v59 = vmul.f32 %v2354_v60, %v8234_v10  ;;  %v8254_v35 = vmul.f32 %v2354_v60, %v8238_v28  ;;  %v8298_v60 = vsel %vm2297_vm2, %v2275_v41, %v2277_v5 }
 0x2de   :  { %10280 = vst [vmem:[#allocation104_spill] sm:$0xff] %v8298_v60  ;;  %v8326_v28 = vsel %vm2297_vm2, %v2282_v16, %v2284_v7 }
 0x2df   :  { %v2374_v47 = vpop.permute.xlu1 %2373  ;;  %10287 = vst [vmem:[#allocation103_spill] sm:$0xff] %v8326_v28 }
 0x2e0   :  { %v8281_v19 = vmul.f32 %v2374_v47, %v8258_v55  ;;  %v8284_v0 = vmul.f32 %v2374_v47, %v8262_v38  ;;  %v8302_v47 = vsel %vm2297_vm2, %v2276_v26, %v2278_v48  ;;  %v2286_v38 = vrot.slane %v10283_v15, 1  ;;  %v10284_v55 = vld [vmem:[#allocation66_spill] sm:$0xff]  ;;  %v10295_v15 = vld [vmem:[#allocation79_spill] sm:$0xff] }
 0x2e1   :  { %10281 = vst [vmem:[#allocation117_spill] sm:$0xff] %v8302_v47  ;;  %v8322_v48 = vsel %vm2297_vm2, %v2281_v24, %v2283_v44  ;;  %v2292_v2 = vrot.slane %v10295_v15, 1 }
 0x2e2   :  { %v2369_v62 = vpop.permute.xlu0 %2368  ;;  %10286 = vst [vmem:[#allocation116_spill] sm:$0xff] %v8322_v48 }
 0x2e3   :  { %v8289_v50 = vmul.f32 %v2369_v62, %v8266_v45  ;;  %v8292_v52 = vmul.f32 %v2369_v62, %v8270_v3  ;;  %v2384_v56 = vpop.permute.xlu1 %2383  ;;  %v2287_v62 = vrot.slane %v10284_v55, 1 }
 0x2e4   :  { %v8309_v3 = vmul.f32 %v2384_v56, %v8274_v11  ;;  %v8312_v45 = vmul.f32 %v2384_v56, %v8278_v39  ;;  %v8330_v11 = vsel %vm2297_vm2, %v2279_v46, %v2281_v24  ;;  %v8334_v56 = vsel %vm2297_vm2, %v2280_v21, %v2282_v16  ;;  %v10292_v24 = vld [vmem:[#allocation70_spill] sm:$0xff]  ;;  %v10293_v21 = vld [vmem:[#allocation75_spill] sm:$0xff] }
 0x2e5   :  { %10288 = vst [vmem:[#allocation102_spill] sm:$0xff] %v8330_v11  ;;  %10289 = vst [vmem:[#allocation115_spill] sm:$0xff] %v8334_v56  ;;  %v2289_v22 = vrot.slane %v10292_v24, 1  ;;  %v2290_v16 = vrot.slane %v10293_v21, 1  ;;  %v10299_v21 = vld [vmem:[#allocation86_spill] sm:$0xff] }
 0x2e6   :  { %v2379_v41 = vpop.permute.xlu0 %2378  ;;  %v2294_v15 = vrot.slane %v10299_v21, 1 }
 0x2e7   :  { %v8315_v5 = vmul.f32 %v2379_v41, %v8298_v60  ;;  %v8318_v26 = vmul.f32 %v2379_v41, %v8302_v47  ;;  %v2394_v39 = vpop.permute.xlu1 %2393  ;;  %v8338_v41 = vsel %vm2297_vm2, %v2285_v9, %v2287_v62  ;;  %v8342_v47 = vsel %vm2297_vm2, %v2286_v38, %v2288_v54 }
 0x2e8   :  { %10290 = vst [vmem:[#allocation114_spill] sm:$0xff] %v8338_v41  ;;  %10291 = vst [vmem:[#allocation101_spill] sm:$0xff] %v8342_v47  ;;  %v8345_v60 = vmul.f32 %v2394_v39, %v8322_v48  ;;  %v8348_v10 = vmul.f32 %v2394_v39, %v8326_v28  ;;  %v8362_v48 = vsel %vm2297_vm2, %v2283_v44, %v2285_v9 }
 0x2e9   :  { %10296 = vst [vmem:[#allocation100_spill] sm:$0xff] %v8362_v48  ;;  %v8366_v39 = vsel %vm2297_vm2, %v2284_v7, %v2286_v38  ;;  %v8384_v38 = vsel %vm2297_vm2, %v2289_v22, %v2291_v33  ;;  %v8388_v44 = vsel %vm2297_vm2, %v2290_v16, %v2292_v2  ;;  %v8396_v7 = vsel %vm2297_vm2, %v2288_v54, %v2290_v16 }
 0x2ea   :  { %v2389_v46 = vpop.permute.xlu0 %2388  ;;  %10297 = vst [vmem:[#allocation113_spill] sm:$0xff] %v8366_v39  ;;  %10300 = vst [vmem:[#allocation112_spill] sm:$0xff] %v8384_v38 }
 0x2eb   :  { %v8353_v53 = vmul.f32 %v2389_v46, %v8330_v11  ;;  %v8356_v55 = vmul.f32 %v2389_v46, %v8334_v56  ;;  %v2404_v28 = vpop.permute.xlu1 %2403  ;;  %v10298_v56 = vld [vmem:[#allocation83_spill] sm:$0xff]  ;;  %10301 = vst [vmem:[#allocation99_spill] sm:$0xff] %v8388_v44  ;;  %10303 = vst [vmem:[#allocation31_spill] sm:$0xff] %v8396_v7 }
 0x2ec   :  { %v8369_v24 = vmul.f32 %v2404_v28, %v8338_v41  ;;  %v8372_v11 = vmul.f32 %v2404_v28, %v8342_v47  ;;  %v2293_v20 = vrot.slane %v10298_v56, 1  ;;  %v8392_v28 = vsel %vm2297_vm2, %v2287_v62, %v2289_v22 }
 0x2ed   :  { %10302 = vst [vmem:[#allocation98_spill] sm:$0xff] %v8392_v28  ;;  %v10304_v22 = vrot.slane %v10250_v27, 1  ;;  %v10306_v62 = vrot.slane %v10251_v14, 1 }
 0x2ee   :  { %v2399_v46 = vpop.permute.xlu0 %2398 }
 0x2ef   :  { %v8377_v61 = vmul.f32 %v2399_v46, %v8362_v48  ;;  %v8380_v9 = vmul.f32 %v2399_v46, %v8366_v39  ;;  %v2414_v47 = vpop.permute.xlu1 %2413  ;;  %v8414_v54 = vsel %vm2297_vm2, %v2293_v20, %v10304_v22  ;;  %v8420_v16 = vsel %vm2297_vm2, %v2294_v15, %v10306_v62 }
 0x2f0   :  { %v8399_v46 = vmul.f32 %v2414_v47, %v8384_v38  ;;  %v8402_v41 = vmul.f32 %v2414_v47, %v8388_v44  ;;  %10305 = vst [vmem:[#allocation125_spill] sm:$0xff] %v8414_v54  ;;  %10307 = vst [vmem:[#allocation127_spill] sm:$0xff] %v8420_v16  ;;  %v8424_v47 = vsel %vm2297_vm2, %v2291_v33, %v2293_v20 }
 0x2f1   :  { %10308 = vst [vmem:[#allocation67_spill] sm:$0xff] %v8424_v47 }
 0x2f2   :  { %v2409_v39 = vpop.permute.xlu0 %2408 }
 0x2f3   :  { %v8405_v48 = vmul.f32 %v2409_v39, %v8392_v28  ;;  %v8408_v56 = vmul.f32 %v2409_v39, %v8396_v7  ;;  %v8428_v39 = vsel %vm2297_vm2, %v2292_v2, %v2294_v15  ;;  %v2424_v44 = vpop.permute.xlu1 %2423 }
 0x2f4   :  { %10309 = vst [vmem:[#allocation61_spill] sm:$0xff] %v8428_v39  ;;  %v8431_v38 = vmul.f32 %v2424_v44, %v8414_v54  ;;  %v8434_v22 = vmul.f32 %v2424_v44, %v8420_v16 }
 0x2f6   :  { %v2419_v7 = vpop.permute.xlu0 %2418 }
 0x2f7   :  { %v8437_v28 = vmul.f32 %v2419_v7, %v8424_v47  ;;  %v8440_v62 = vmul.f32 %v2419_v7, %v8428_v39 }
 0x330   :  { %v5751_v20 = vpop.f32.mrf.mxu0 }
 0x332   :  { %v5752_v33 = vpop.f32.mrf.mxu0  ;;  %v5687_v15 = vpop.f32.mrf.mxu1 }
 0x333   :  { %v5753_v21 = vadd.f32 %v5752_v33, %v5751_v20 }
 0x334   :  { %v5754_v27 = vpop.f32.mrf.mxu0  ;;  %v5688_v14 = vpop.f32.mrf.mxu1 }
 0x335   :  { %v5689_v54 = vadd.f32 %v5688_v14, %v5687_v15 }
 0x336   :  { %v5755_v31 = vpop.f32.mrf.mxu0  ;;  %v5690_v4 = vpop.f32.mrf.mxu1 }
 0x337   :  { %v8442_v44 = vadd.f32 %v5753_v21, %v5689_v54  ;;  %v5756_v47 = vadd.f32 %v5755_v31, %v5754_v27 }
 0x338   :  { %v5757_v2 = vpop.f32.mrf.mxu0  ;;  %v5691_v42 = vpop.f32.mrf.mxu1 }
 0x339   :  { %v5692_v13 = vadd.f32 %v5691_v42, %v5690_v4 }
 0x33a   :  { %v5758_v58 = vpop.f32.mrf.mxu0  ;;  %v5693_v7 = vpop.f32.mrf.mxu1 }
 0x33b   :  { %v8444_v39 = vadd.f32 %v5756_v47, %v5692_v13  ;;  %v5759_v30 = vadd.f32 %v5758_v58, %v5757_v2 }
 0x33c   :  { %v5760_v16 = vpop.f32.mrf.mxu0  ;;  %v5694_v57 = vpop.f32.mrf.mxu1 }
 0x33d   :  { %v5695_v29 = vadd.f32 %v5694_v57, %v5693_v7 }
 0x33e   :  { %v5761_v49 = vpop.f32.mrf.mxu0  ;;  %v5696_v6 = vpop.f32.mrf.mxu1 }
 0x33f   :  { %v8446_v20 = vadd.f32 %v5759_v30, %v5695_v29  ;;  %v5762_v21 = vadd.f32 %v5761_v49, %v5760_v16 }
 0x340   :  { %v5763_v36 = vpop.f32.mrf.mxu0  ;;  %v5697_v33 = vpop.f32.mrf.mxu1 }
 0x341   :  { %v5698_v54 = vadd.f32 %v5697_v33, %v5696_v6 }
 0x342   :  { %v5764_v23 = vpop.f32.mrf.mxu0  ;;  %v5699_v8 = vpop.f32.mrf.mxu1 }
 0x343   :  { %v8448_v27 = vadd.f32 %v5762_v21, %v5698_v54  ;;  %v5765_v13 = vadd.f32 %v5764_v23, %v5763_v36 }
 0x344   :  { %v5766_v14 = vpop.f32.mrf.mxu0  ;;  %v5700_v4 = vpop.f32.mrf.mxu1 }
 0x345   :  { %v5701_v47 = vadd.f32 %v5700_v4, %v5699_v8 }
 0x346   :  { %v5767_v15 = vpop.f32.mrf.mxu0  ;;  %v5702_v34 = vpop.f32.mrf.mxu1 }
 0x347   :  { %v8450_v58 = vadd.f32 %v5765_v13, %v5701_v47  ;;  %v5768_v30 = vadd.f32 %v5767_v15, %v5766_v14 }
 0x348   :  { %v5769_v42 = vpop.f32.mrf.mxu0  ;;  %v5703_v2 = vpop.f32.mrf.mxu1 }
 0x349   :  { %v5704_v29 = vadd.f32 %v5703_v2, %v5702_v34 }
 0x34a   :  { %v5770_v31 = vpop.f32.mrf.mxu0  ;;  %v5705_v63 = vpop.f32.mrf.mxu1 }
 0x34b   :  { %v8452_v49 = vadd.f32 %v5768_v30, %v5704_v29  ;;  %v5771_v33 = vadd.f32 %v5770_v31, %v5769_v42 }
 0x34c   :  { %v5772_v57 = vpop.f32.mrf.mxu0  ;;  %v5706_v16 = vpop.f32.mrf.mxu1 }
 0x34d   :  { %v5707_v21 = vadd.f32 %v5706_v16, %v5705_v63 }
 0x34e   :  { %v5773_v7 = vpop.f32.mrf.mxu0  ;;  %v5708_v32 = vpop.f32.mrf.mxu1 }
 0x34f   :  { %v8454_v23 = vadd.f32 %v5771_v33, %v5707_v21  ;;  %v5774_v4 = vadd.f32 %v5773_v7, %v5772_v57 }
 0x350   :  { %v5775_v6 = vpop.f32.mrf.mxu0  ;;  %v5709_v36 = vpop.f32.mrf.mxu1 }
 0x351   :  { %v5710_v13 = vadd.f32 %v5709_v36, %v5708_v32 }
 0x352   :  { %v5776_v54 = vpop.f32.mrf.mxu0  ;;  %v5711_v1 = vpop.f32.mrf.mxu1 }
 0x353   :  { %v8456_v14 = vadd.f32 %v5774_v4, %v5710_v13  ;;  %v5777_v2 = vadd.f32 %v5776_v54, %v5775_v6 }
 0x354   :  { %v5778_v8 = vpop.f32.mrf.mxu0  ;;  %v5712_v15 = vpop.f32.mrf.mxu1 }
 0x355   :  { %10310 = vst [vmem:[#allocation81_spill] sm:$0xff] %v8456_v14  ;;  %v5713_v30 = vadd.f32 %v5712_v15, %v5711_v1 }
 0x356   :  { %v5779_v47 = vpop.f32.mrf.mxu0  ;;  %v5714_v17 = vpop.f32.mrf.mxu1 }
 0x357   :  { %v8458_v42 = vadd.f32 %v5777_v2, %v5713_v30  ;;  %v5780_v16 = vadd.f32 %v5779_v47, %v5778_v8 }
 0x358   :  { %v5781_v34 = vpop.f32.mrf.mxu0  ;;  %v5715_v31 = vpop.f32.mrf.mxu1 }
 0x359   :  { %10311 = vst [vmem:[#allocation74_spill] sm:$0xff] %v8458_v42  ;;  %v5716_v33 = vadd.f32 %v5715_v31, %v5714_v17 }
 0x35a   :  { %v5782_v29 = vpop.f32.mrf.mxu0  ;;  %v5717_v37 = vpop.f32.mrf.mxu1 }
 0x35b   :  { %v8460_v57 = vadd.f32 %v5780_v16, %v5716_v33  ;;  %v5783_v36 = vadd.f32 %v5782_v29, %v5781_v34 }
 0x35c   :  { %v5784_v63 = vpop.f32.mrf.mxu0  ;;  %v5718_v7 = vpop.f32.mrf.mxu1 }
 0x35d   :  { %10312 = vst [vmem:[#allocation126_spill] sm:$0xff] %v8460_v57  ;;  %v5719_v4 = vadd.f32 %v5718_v7, %v5717_v37 }
 0x35e   :  { %v5785_v21 = vpop.f32.mrf.mxu0  ;;  %v5720_v14 = vpop.f32.mrf.mxu1 }
 0x35f   :  { %v8462_v6 = vadd.f32 %v5783_v36, %v5719_v4  ;;  %v5786_v15 = vadd.f32 %v5785_v21, %v5784_v63 }
 0x360   :  { %v5787_v32 = vpop.f32.mrf.mxu0  ;;  %v5721_v54 = vpop.f32.mrf.mxu1 }
 0x361   :  { %10313 = vst [vmem:[#allocation77_spill] sm:$0xff] %v8462_v6  ;;  %v5722_v2 = vadd.f32 %v5721_v54, %v5720_v14 }
 0x362   :  { %v5788_v13 = vpop.f32.mrf.mxu0  ;;  %v5723_v42 = vpop.f32.mrf.mxu1 }
 0x363   :  { %v8464_v8 = vadd.f32 %v5786_v15, %v5722_v2  ;;  %v5789_v31 = vadd.f32 %v5788_v13, %v5787_v32 }
 0x364   :  { %v5790_v1 = vpop.f32.mrf.mxu0  ;;  %v5724_v47 = vpop.f32.mrf.mxu1 }
 0x365   :  { %v5725_v16 = vadd.f32 %v5724_v47, %v5723_v42 }
 0x366   :  { %v5791_v30 = vpop.f32.mrf.mxu0  ;;  %v5726_v33 = vpop.f32.mrf.mxu1 }
 0x367   :  { %v8466_v34 = vadd.f32 %v5789_v31, %v5725_v16  ;;  %v5792_v29 = vadd.f32 %v5791_v30, %v5790_v1 }
 0x368   :  { %v5793_v17 = vpop.f32.mrf.mxu0  ;;  %v5727_v37 = vpop.f32.mrf.mxu1 }
 0x369   :  { %v5728_v7 = vadd.f32 %v5727_v37, %v5726_v33 }
 0x36a   :  { %v5794_v57 = vpop.f32.mrf.mxu0  ;;  %v5729_v4 = vpop.f32.mrf.mxu1 }
 0x36b   :  { %v8468_v6 = vadd.f32 %v5792_v29, %v5728_v7  ;;  %v5795_v63 = vadd.f32 %v5794_v57, %v5793_v17 }
 0x36c   :  { %v5796_v36 = vpop.f32.mrf.mxu0  ;;  %v5730_v14 = vpop.f32.mrf.mxu1 }
 0x36d   :  { %v5731_v21 = vadd.f32 %v5730_v14, %v5729_v4 }
 0x36e   :  { %v5797_v54 = vpop.f32.mrf.mxu0  ;;  %v5732_v15 = vpop.f32.mrf.mxu1 }
 0x36f   :  { %v8470_v2 = vadd.f32 %v5795_v63, %v5731_v21  ;;  %v5798_v42 = vadd.f32 %v5797_v54, %v5796_v36 }
 0x370   :  { %v5733_v32 = vpop.f32.mrf.mxu1 }
 0x371   :  { %v5734_v13 = vadd.f32 %v5733_v32, %v5732_v15 }
 0x373   :  { %v8472_v47 = vadd.f32 %v5798_v42, %v5734_v13 }
 0x374   :  { %6561 = dma.done.wait [#allocation3 + $0x2], 2048 }
 0x375   :  { %6562 = vsyncadd [#allocation3 + $0x2], 4294965248  ;;  %v2461_v1 = vpack.c.bf16 %v8254_v35, %v8228_v51  ;;  %v6578_v30 = vmov 3   ;;  %v6429_v57 = vld [vmem:[#allocation2 + $0x178] sm:$0xff]   ;;  %v6431_v31 = vld [vmem:[#allocation2 + $0x170] sm:$0xff]  }
 0x376   :  { %6428 = vset.pattern.permute.xlu1 %v6578_v30  ;;  %6427 = vset.pattern.permute.xlu0 %v6578_v30  ;;  %v6430_v17 = vld [vmem:[#allocation2 + $0x138] sm:$0xff]   ;;  %v6432_v16 = vld [vmem:[#allocation2 + $0x130] sm:$0xff]   ;;  %v6433_v33 = vld [vmem:[#allocation2 + $0x168] sm:$0xff]  }
 0x377   :  { %2636 = vmatprep.mubr.bf16.mxu1 %v2461_v1  ;;  %5799 = vmatprep.subr.bf16.mxu1 %v6429_v57  ;;  %v6434_v37 = vld [vmem:[#allocation2 + $0x128] sm:$0xff]   ;;  %v6435_v29 = vld [vmem:[#allocation2 + $0x160] sm:$0xff]   ;;  %v6437_v51 = vld [vmem:[#allocation2 + $0x158] sm:$0xff]  }
 0x378   :  { %5800 = vmatpush3.bf16.msra.mxu1 %v6430_v17  ;;  %v6436_v7 = vld [vmem:[#allocation2 + $0x120] sm:$0xff]   ;;  %v6438_v35 = vld [vmem:[#allocation2 + $0x118] sm:$0xff]   ;;  %v6439_v36 = vld [vmem:[#allocation2 + $0x150] sm:$0xff]  }
 0x379   :  { %5801 = vmatprep.subr.bf16.mxu1 %v6431_v31  ;;  %v2719_v4 = vld [vmem:[%s9848_s9 + $0x10] sm:$0xff]  ;;  %v2717_v14 = vld [vmem:[%s9848_s9] sm:$0xff]  ;;  %v2720_v63 = vld [vmem:[%s9848_s9 + $0x18] sm:$0xff]  ;;  %v2460_v31 = vpack.c.bf16 %v8251_v59, %v8225_v18  ;;  %v2462_v59 = vpack.c.bf16 %v8245_v25, %v8217_v12  ;;  %v2464_v25 = vpack.c.bf16 %v8281_v19, %v8289_v50  ;;  %v2473_v19 = vpack.c.bf16 %v8402_v41, %v8408_v56 }
 0x37a   :  { %2745 = vperm.xlu1 %6428, %v2719_v4   ;;  %2735 = vperm.xlu0 %6427, %v2717_v14   ;;  %v2718_v21 = vld [vmem:[%s9848_s9 + $0x8] sm:$0xff]  ;;  %v6440_v54 = vld [vmem:[#allocation2 + $0x110] sm:$0xff]   ;;  %v2721_v42 = vld [vmem:[%s9848_s9 + $0x20] sm:$0xff]  ;;  %v2471_v4 = vpack.c.bf16 %v8372_v11, %v8380_v9 }
 0x37b   :  { %v6441_v15 = vld [vmem:[#allocation2 + $0x148] sm:$0xff]   ;;  %v6443_v1 = vld [vmem:[#allocation2 + $0x140] sm:$0xff]   ;;  %v2724_v30 = vld [vmem:[%s9848_s9 + $0x38] sm:$0xff] }
 0x37c   :  { %5802 = vmatpush3.bf16.msra.mxu1 %v6432_v16  ;;  %v2722_v32 = vld [vmem:[%s9848_s9 + $0x28] sm:$0xff]  ;;  %v2723_v57 = vld [vmem:[%s9848_s9 + $0x30] sm:$0xff]  ;;  %v6444_v17 = vld [vmem:[#allocation2 + $0x100] sm:$0xff]  }
 0x37d   :  { %5803 = vmatprep.subr.bf16.mxu1 %v6433_v33  ;;  %v6442_v13 = vld [vmem:[#allocation2 + $0x108] sm:$0xff]   ;;  %v2725_v33 = vld [vmem:[%s9848_s9 + $0x40] sm:$0xff]  ;;  %v2727_v18 = vld [vmem:[%s9848_s9 + $0x50] sm:$0xff] }
 0x37e   :  { %2750 = vperm.xlu1 %6428, %v2720_v63   ;;  %2740 = vperm.xlu0 %6427, %v2718_v21   ;;  %v2726_v16 = vld [vmem:[%s9848_s9 + $0x48] sm:$0xff]  ;;  %v2731_v12 = vld [vmem:[%s9848_s9 + $0x70] sm:$0xff]  ;;  %v10321_v63 = vld [vmem:[#allocation30_spill] sm:$0xff] }
 0x380   :  { %5804 = vmatpush3.bf16.msra.mxu1 %v6434_v37  ;;  %v2463_v37 = vpack.c.bf16 %v8248_v40, %v8220_v43  ;;  %v2730_v43 = vld [vmem:[%s9848_s9 + $0x68] sm:$0xff]  ;;  %v2729_v40 = vld [vmem:[%s9848_s9 + $0x60] sm:$0xff] }
 0x381   :  { %5805 = vmatprep.subr.bf16.mxu1 %v6435_v29  ;;  %v2728_v29 = vld [vmem:[%s9848_s9 + $0x58] sm:$0xff] }
 0x382   :  { %2760 = vperm.xlu1 %6428, %v2722_v32   ;;  %2755 = vperm.xlu0 %6427, %v2721_v42   ;;  %v10322_v32 = vld [vmem:[#allocation45_spill] sm:$0xff] }
 0x384   :  { %5806 = vmatpush3.bf16.msra.mxu1 %v6436_v7  ;;  %v2465_v7 = vpack.c.bf16 %v8284_v0, %v8292_v52  ;;  %v2467_v0 = vpack.c.bf16 %v8312_v45, %v8318_v26  ;;  %v2466_v52 = vpack.c.bf16 %v8309_v3, %v8315_v5  ;;  %v2470_v45 = vpack.c.bf16 %v8369_v24, %v8377_v61  ;;  %v10314_v61 = vld [vmem:[#allocation33_spill] sm:$0xff]  ;;  %v10316_v26 = vld [vmem:[#allocation95_spill] sm:$0xff] }
 0x385   :  { %5807 = vmatprep.subr.bf16.mxu1 %v6437_v51  ;;  %v2732_v51 = vld [vmem:[%s9848_s9 + $0x78] sm:$0xff] }
 0x386   :  { %2770 = vperm.xlu1 %6428, %v2724_v30   ;;  %2765 = vperm.xlu0 %6427, %v2723_v57   ;;  %v10324_v30 = vld [vmem:[#allocation41_spill] sm:$0xff] }
 0x388   :  { %5808 = vmatpush3.bf16.msra.mxu1 %v6438_v35  ;;  %v2469_v35 = vpack.c.bf16 %v8348_v10, %v8356_v55  ;;  %v2472_v10 = vpack.c.bf16 %v8399_v46, %v8405_v48  ;;  %v2475_v55 = vpack.c.bf16 %v8434_v22, %v8440_v62  ;;  %v10317_v48 = vld [vmem:[#allocation97_spill] sm:$0xff]  ;;  %v10318_v46 = vld [vmem:[#allocation36_spill] sm:$0xff] }
 0x389   :  { %5809 = vmatprep.subr.bf16.mxu1 %v6439_v36  ;;  %v2468_v36 = vpack.c.bf16 %v8345_v60, %v8353_v53  ;;  %v2474_v53 = vpack.c.bf16 %v8431_v38, %v8437_v28  ;;  %v10315_v60 = vld [vmem:[#allocation35_spill] sm:$0xff]  ;;  %v10320_v62 = vld [vmem:[#allocation28_spill] sm:$0xff] }
 0x38a   :  { %2780 = vperm.xlu1 %6428, %v2726_v16   ;;  %2775 = vperm.xlu0 %6427, %v2725_v33   ;;  %v10319_v38 = vld [vmem:[#allocation39_spill] sm:$0xff] }
 0x38c   :  { %5810 = vmatpush3.bf16.msra.mxu1 %v6440_v54 }
 0x38d   :  { %5811 = vmatprep.subr.bf16.mxu1 %v6441_v15 }
 0x38e   :  { %2790 = vperm.xlu1 %6428, %v2728_v29   ;;  %2785 = vperm.xlu0 %6427, %v2727_v18   ;;  %v10327_v18 = vld [vmem:[#allocation54_spill] sm:$0xff] }
 0x390   :  { %5812 = vmatpush3.bf16.msra.mxu1 %v6442_v13  ;;  %v10323_v13 = vld [vmem:[#allocation46_spill] sm:$0xff] }
 0x391   :  { %5813 = vmatprep.subr.bf16.mxu1 %v6443_v1 }
 0x392   :  { %2800 = vperm.xlu1 %6428, %v2730_v43   ;;  %2795 = vperm.xlu0 %6427, %v2729_v40   ;;  %v10328_v43 = vld [vmem:[#allocation48_spill] sm:$0xff] }
 0x394   :  { %5814 = vmatpush3.bf16.msra.mxu1 %v6444_v17  ;;  %v10325_v17 = vld [vmem:[#allocation43_spill] sm:$0xff] }
 0x396   :  { %2810 = vperm.xlu1 %6428, %v2732_v51   ;;  %2805 = vperm.xlu0 %6427, %v2731_v12  }
 0x397   :  { %2637 = vmatmul.mubr.bf16.vlgmr.msra.gmra.mxu1 %v2460_v31 }
 0x398   :  { %2644 = vmatprep.mubr.bf16.mxu1 %v2463_v37  ;;  %v10326_v37 = vld [vmem:[#allocation53_spill] sm:$0xff] }
 0x39f   :  { %2645 = vmatmul.mubr.bf16.gmra.mxu1 %v2462_v59 }
 0x3a0   :  { %2652 = vmatprep.mubr.bf16.mxu1 %v2465_v7  ;;  %v10329_v7 = vld [vmem:[#allocation51_spill] sm:$0xff] }
 0x3a7   :  { %2653 = vmatmul.mubr.bf16.gmra.mxu1 %v2464_v25 }
 0x3a8   :  { %2660 = vmatprep.mubr.bf16.mxu1 %v2467_v0  ;;  %v10330_v0 = vld [vmem:[#allocation60_spill] sm:$0xff] }
 0x3af   :  { %2661 = vmatmul.mubr.bf16.gmra.mxu1 %v2466_v52 }
 0x3b0   :  { %2668 = vmatprep.mubr.bf16.mxu1 %v2469_v35  ;;  %v10331_v35 = vld [vmem:[#allocation64_spill] sm:$0xff] }
 0x3b7   :  { %2669 = vmatmul.mubr.bf16.gmra.mxu1 %v2468_v36 }
 0x3b8   :  { %2676 = vmatprep.mubr.bf16.mxu1 %v2471_v4  ;;  %v10332_v4 = vld [vmem:[#allocation57_spill] sm:$0xff] }
 0x3bf   :  { %2677 = vmatmul.mubr.bf16.gmra.mxu1 %v2470_v45 }
 0x3c0   :  { %2684 = vmatprep.mubr.bf16.mxu1 %v2473_v19  ;;  %v10333_v19 = vld [vmem:[#allocation58_spill] sm:$0xff] }
 0x3c7   :  { %2685 = vmatmul.mubr.bf16.gmra.mxu1 %v2472_v10 }
 0x3c8   :  { %2692 = vmatprep.mubr.bf16.mxu1 %v2475_v55 }
 0x3cf   :  { %2693 = vmatmul.mubr.bf16.gmra.mxu1 %v2474_v53 }
 0x3f5   :  { %v2746_v3 = vpop.permute.xlu1 %2745  ;;  %v2736_v11 = vpop.permute.xlu0 %2735 }
 0x3f6   :  { %v8555_v50 = vmul.f32 %v2746_v3, %v10314_v61  ;;  %v8558_v5 = vmul.f32 %v2746_v3, %v10315_v60  ;;  %v8561_v56 = vmul.f32 %v2736_v11, %v10316_v26  ;;  %v8564_v41 = vmul.f32 %v2736_v11, %v10317_v48  ;;  %v10334_v3 = vld [vmem:[#allocation71_spill] sm:$0xff]  ;;  %v10338_v26 = vld [vmem:[#allocation82_spill] sm:$0xff] }
 0x3f9   :  { %v2751_v24 = vpop.permute.xlu1 %2750  ;;  %v2741_v9 = vpop.permute.xlu0 %2740 }
 0x3fa   :  { %v8567_v22 = vmul.f32 %v2751_v24, %v10318_v46  ;;  %v8570_v28 = vmul.f32 %v2751_v24, %v10319_v38  ;;  %v8573_v14 = vmul.f32 %v2741_v9, %v10320_v62  ;;  %v8576_v21 = vmul.f32 %v2741_v9, %v10321_v63  ;;  %v10335_v24 = vld [vmem:[#allocation73_spill] sm:$0xff] }
 0x3fd   :  { %v2761_v54 = vpop.permute.xlu1 %2760  ;;  %v2756_v15 = vpop.permute.xlu0 %2755 }
 0x3fe   :  { %v8579_v42 = vmul.f32 %v2761_v54, %v10322_v32  ;;  %v8582_v1 = vmul.f32 %v2761_v54, %v10323_v13  ;;  %v8585_v57 = vmul.f32 %v2756_v15, %v10324_v30  ;;  %v8588_v31 = vmul.f32 %v2756_v15, %v10325_v17  ;;  %v10336_v54 = vld [vmem:[#allocation65_spill] sm:$0xff]  ;;  %v10345_v32 = vld [vmem:[#allocation91_spill] sm:$0xff] }
 0x3ff   :  { %v10344_v13 = vld [vmem:[#allocation89_spill] sm:$0xff] }
 0x401   :  { %v2771_v16 = vpop.permute.xlu1 %2770  ;;  %v2766_v33 = vpop.permute.xlu0 %2765 }
 0x402   :  { %v8591_v29 = vmul.f32 %v2771_v16, %v10326_v37  ;;  %v8594_v59 = vmul.f32 %v2771_v16, %v10327_v18  ;;  %v8597_v40 = vmul.f32 %v2766_v33, %v10328_v43  ;;  %v8600_v51 = vmul.f32 %v2766_v33, %v10329_v7  ;;  %v10337_v16 = vld [vmem:[#allocation68_spill] sm:$0xff] }
 0x403   :  { %v10340_v18 = vld [vmem:[#allocation76_spill] sm:$0xff] }
 0x404   :  { %v10341_v37 = vld [vmem:[#allocation80_spill] sm:$0xff] }
 0x405   :  { %v2781_v12 = vpop.permute.xlu1 %2780  ;;  %v2776_v25 = vpop.permute.xlu0 %2775 }
 0x406   :  { %v8603_v52 = vmul.f32 %v2781_v12, %v10330_v0  ;;  %v8606_v36 = vmul.f32 %v2781_v12, %v10331_v35  ;;  %v8609_v45 = vmul.f32 %v2776_v25, %v10332_v4  ;;  %v8612_v10 = vmul.f32 %v2776_v25, %v10333_v19  ;;  %v10339_v25 = vld [vmem:[#allocation85_spill] sm:$0xff]  ;;  %v10342_v19 = vld [vmem:[#allocation94_spill] sm:$0xff] }
 0x409   :  { %v2791_v55 = vpop.permute.xlu1 %2790  ;;  %v2786_v53 = vpop.permute.xlu0 %2785 }
 0x40a   :  { %v8615_v11 = vmul.f32 %v2791_v55, %v10334_v3  ;;  %v8618_v9 = vmul.f32 %v2791_v55, %v10335_v24  ;;  %v8621_v15 = vmul.f32 %v2786_v53, %v10336_v54  ;;  %v8624_v33 = vmul.f32 %v2786_v53, %v10337_v16  ;;  %v10343_v53 = vld [vmem:[#allocation96_spill] sm:$0xff] }
 0x40d   :  { %v2801_v12 = vpop.permute.xlu1 %2800  ;;  %v2796_v48 = vpop.permute.xlu0 %2795 }
 0x40e   :  { %v8627_v35 = vmul.f32 %v2801_v12, %v10338_v26  ;;  %v8630_v0 = vmul.f32 %v2801_v12, %v10339_v25  ;;  %v8633_v3 = vmul.f32 %v2796_v48, %v10340_v18  ;;  %v8636_v55 = vmul.f32 %v2796_v48, %v10341_v37 }
 0x411   :  { %v2811_v24 = vpop.permute.xlu1 %2810  ;;  %v2806_v54 = vpop.permute.xlu0 %2805 }
 0x412   :  { %v8639_v4 = vmul.f32 %v2811_v24, %v10342_v19  ;;  %v8642_v16 = vmul.f32 %v2811_v24, %v10343_v53  ;;  %v8645_v26 = vmul.f32 %v2806_v54, %v10344_v13  ;;  %v8648_v12 = vmul.f32 %v2806_v54, %v10345_v32 }
 0x457   :  { %v5815_v25 = vpop.f32.mrf.mxu1 }
 0x459   :  { %v5816_v18 = vpop.f32.mrf.mxu1 }
 0x45a   :  { %v5817_v7 = vadd.f32 %v5816_v18, %v5815_v25 }
 0x45b   :  { %v5818_v43 = vpop.f32.mrf.mxu1 }
 0x45c   :  { %v8651_v48 = vadd.f32 %v5817_v7, %v8442_v44 }
 0x45d   :  { %v5819_v37 = vpop.f32.mrf.mxu1 }
 0x45e   :  { %v5820_v60 = vadd.f32 %v5819_v37, %v5818_v43 }
 0x45f   :  { %v5821_v19 = vpop.f32.mrf.mxu1 }
 0x460   :  { %v8654_v61 = vadd.f32 %v5820_v60, %v8444_v39 }
 0x461   :  { %v5822_v24 = vpop.f32.mrf.mxu1 }
 0x462   :  { %v5823_v53 = vadd.f32 %v5822_v24, %v5821_v19 }
 0x463   :  { %v5824_v13 = vpop.f32.mrf.mxu1 }
 0x464   :  { %v8657_v17 = vadd.f32 %v5823_v53, %v8446_v20 }
 0x465   :  { %v5825_v54 = vpop.f32.mrf.mxu1 }
 0x466   :  { %v5826_v32 = vadd.f32 %v5825_v54, %v5824_v13 }
 0x467   :  { %v5827_v30 = vpop.f32.mrf.mxu1 }
 0x468   :  { %v8660_v18 = vadd.f32 %v5826_v32, %v8448_v27 }
 0x469   :  { %v5828_v44 = vpop.f32.mrf.mxu1 }
 0x46a   :  { %v5829_v7 = vadd.f32 %v5828_v44, %v5827_v30  ;;  %v10346_v30 = vld [vmem:[#allocation81_spill] sm:$0xff] }
 0x46b   :  { %v5830_v25 = vpop.f32.mrf.mxu1 }
 0x46c   :  { %v8663_v37 = vadd.f32 %v5829_v7, %v8450_v58 }
 0x46d   :  { %v5831_v39 = vpop.f32.mrf.mxu1 }
 0x46e   :  { %v5832_v60 = vadd.f32 %v5831_v39, %v5830_v25  ;;  %v10347_v25 = vld [vmem:[#allocation74_spill] sm:$0xff] }
 0x46f   :  { %v5833_v43 = vpop.f32.mrf.mxu1 }
 0x470   :  { %v8666_v19 = vadd.f32 %v5832_v60, %v8452_v49 }
 0x471   :  { %v5834_v20 = vpop.f32.mrf.mxu1 }
 0x472   :  { %v5835_v53 = vadd.f32 %v5834_v20, %v5833_v43  ;;  %v10348_v43 = vld [vmem:[#allocation126_spill] sm:$0xff] }
 0x473   :  { %v5836_v24 = vpop.f32.mrf.mxu1 }
 0x474   :  { %v8669_v13 = vadd.f32 %v5835_v53, %v8454_v23 }
 0x475   :  { %v5837_v27 = vpop.f32.mrf.mxu1 }
 0x476   :  { %v5838_v32 = vadd.f32 %v5837_v27, %v5836_v24  ;;  %v10349_v24 = vld [vmem:[#allocation77_spill] sm:$0xff] }
 0x477   :  { %v5839_v54 = vpop.f32.mrf.mxu1 }
 0x478   :  { %v8672_v44 = vadd.f32 %v5838_v32, %v10346_v30 }
 0x479   :  { %v5840_v58 = vpop.f32.mrf.mxu1 }
 0x47a   :  { %v5841_v7 = vadd.f32 %v5840_v58, %v5839_v54 }
 0x47b   :  { %v5842_v63 = vpop.f32.mrf.mxu1 }
 0x47c   :  { %v8675_v39 = vadd.f32 %v5841_v7, %v10347_v25 }
 0x47d   :  { %v5843_v49 = vpop.f32.mrf.mxu1 }
 0x47e   :  { %v5844_v60 = vadd.f32 %v5843_v49, %v5842_v63 }
 0x47f   :  { %v5845_v62 = vpop.f32.mrf.mxu1 }
 0x480   :  { %v8678_v20 = vadd.f32 %v5844_v60, %v10348_v43 }
 0x481   :  { %v5846_v23 = vpop.f32.mrf.mxu1 }
 0x482   :  { %v5847_v53 = vadd.f32 %v5846_v23, %v5845_v62 }
 0x483   :  { %v5848_v38 = vpop.f32.mrf.mxu1 }
 0x484   :  { %v8681_v27 = vadd.f32 %v5847_v53, %v10349_v24 }
 0x485   :  { %v5849_v32 = vpop.f32.mrf.mxu1 }
 0x486   :  { %v5850_v30 = vadd.f32 %v5849_v32, %v5848_v38 }
 0x487   :  { %v5851_v46 = vpop.f32.mrf.mxu1 }
 0x488   :  { %v8684_v54 = vadd.f32 %v5850_v30, %v8464_v8 }
 0x489   :  { %v5852_v58 = vpop.f32.mrf.mxu1 }
 0x48a   :  { %v5853_v7 = vadd.f32 %v5852_v58, %v5851_v46 }
 0x48b   :  { %v5854_v25 = vpop.f32.mrf.mxu1 }
 0x48c   :  { %v8687_v63 = vadd.f32 %v5853_v7, %v8466_v34 }
 0x48d   :  { %v5855_v49 = vpop.f32.mrf.mxu1 }
 0x48e   :  { %v5856_v60 = vadd.f32 %v5855_v49, %v5854_v25 }
 0x48f   :  { %v5857_v43 = vpop.f32.mrf.mxu1 }
 0x490   :  { %v8690_v62 = vadd.f32 %v5856_v60, %v8468_v6 }
 0x491   :  { %v5858_v23 = vpop.f32.mrf.mxu1 }
 0x492   :  { %v5859_v53 = vadd.f32 %v5858_v23, %v5857_v43 }
 0x493   :  { %v5860_v24 = vpop.f32.mrf.mxu1 }
 0x494   :  { %v8693_v38 = vadd.f32 %v5859_v53, %v8470_v2 }
 0x495   :  { %v5861_v8 = vpop.f32.mrf.mxu1 }
 0x496   :  { %v5862_v32 = vadd.f32 %v5861_v8, %v5860_v24 }
 0x498   :  { %v8696_v46 = vadd.f32 %v5862_v32, %v8472_v47 }
 0x499   :  { %6563 = dma.done.wait [#allocation3 + $0x3], 2048 }
 0x49a   :  { %6564 = vsyncadd [#allocation3 + $0x3], 4294965248  ;;  %v2848_v34 = vpack.c.bf16 %v8576_v21, %v8564_v41  ;;  %v6445_v30 = vld [vmem:[#allocation2 + $0x1f8] sm:$0xff]   ;;  %v6447_v58 = vld [vmem:[#allocation2 + $0x1f0] sm:$0xff]   ;;  %v2847_v32 = vpack.c.bf16 %v8573_v14, %v8561_v56  ;;  %v2854_v56 = vpack.c.bf16 %v8594_v59, %v8600_v51  ;;  %v2857_v14 = vpack.c.bf16 %v8615_v11, %v8621_v15 }
 0x49b   :  { %v6446_v6 = vld [vmem:[#allocation2 + $0x1b8] sm:$0xff]   ;;  %5863 = vmatprep.subr.bf16.mxu0 %v6445_v30  ;;  %v6448_v7 = vld [vmem:[#allocation2 + $0x1b0] sm:$0xff]   ;;  %v6449_v2 = vld [vmem:[#allocation2 + $0x1e8] sm:$0xff]   ;;  %v2849_v30 = vpack.c.bf16 %v8567_v22, %v8555_v50  ;;  %v2855_v50 = vpack.c.bf16 %v8603_v52, %v8609_v45  ;;  %v2858_v22 = vpack.c.bf16 %v8618_v9, %v8624_v33 }
 0x49c   :  { %3023 = vmatprep.mubr.bf16.mxu0 %v2848_v34  ;;  %5864 = vmatpush3.bf16.msra.mxu0 %v6446_v6  ;;  %v6450_v25 = vld [vmem:[#allocation2 + $0x1a8] sm:$0xff]   ;;  %v6451_v49 = vld [vmem:[#allocation2 + $0x1e0] sm:$0xff]   ;;  %v6453_v60 = vld [vmem:[#allocation2 + $0x1d8] sm:$0xff]   ;;  %v2850_v34 = vpack.c.bf16 %v8570_v28, %v8558_v5  ;;  %v2852_v6 = vpack.c.bf16 %v8582_v1, %v8588_v31  ;;  %v2853_v5 = vpack.c.bf16 %v8591_v29, %v8597_v40 }
 0x49d   :  { %5865 = vmatprep.subr.bf16.mxu0 %v6447_v58  ;;  %v6452_v47 = vld [vmem:[#allocation2 + $0x1a0] sm:$0xff]   ;;  %v6454_v43 = vld [vmem:[#allocation2 + $0x198] sm:$0xff]   ;;  %v6455_v41 = vld [vmem:[#allocation2 + $0x1d0] sm:$0xff]   ;;  %v2851_v58 = vpack.c.bf16 %v8579_v42, %v8585_v57  ;;  %v2856_v28 = vpack.c.bf16 %v8606_v36, %v8612_v10  ;;  %v2860_v42 = vpack.c.bf16 %v8630_v0, %v8636_v55  ;;  %v2859_v1 = vpack.c.bf16 %v8627_v35, %v8633_v3 }
 0x49e   :  { %v6456_v21 = vld [vmem:[#allocation2 + $0x190] sm:$0xff]   ;;  %v6457_v23 = vld [vmem:[#allocation2 + $0x1c8] sm:$0xff]   ;;  %v6459_v24 = vld [vmem:[#allocation2 + $0x1c0] sm:$0xff]   ;;  %v2862_v57 = vpack.c.bf16 %v8642_v16, %v8648_v12  ;;  %v2861_v31 = vpack.c.bf16 %v8639_v4, %v8645_v26 }
 0x49f   :  { %v6458_v53 = vld [vmem:[#allocation2 + $0x188] sm:$0xff]   ;;  %v6460_v8 = vld [vmem:[#allocation2 + $0x180] sm:$0xff]  }
 0x4a0   :  { %5866 = vmatpush3.bf16.msra.mxu0 %v6448_v7 }
 0x4a1   :  { %5867 = vmatprep.subr.bf16.mxu0 %v6449_v2 }
 0x4a4   :  { %5868 = vmatpush3.bf16.msra.mxu0 %v6450_v25 }
 0x4a5   :  { %5869 = vmatprep.subr.bf16.mxu0 %v6451_v49 }
 0x4a8   :  { %5870 = vmatpush3.bf16.msra.mxu0 %v6452_v47 }
 0x4a9   :  { %5871 = vmatprep.subr.bf16.mxu0 %v6453_v60 }
 0x4ac   :  { %5872 = vmatpush3.bf16.msra.mxu0 %v6454_v43 }
 0x4ad   :  { %5873 = vmatprep.subr.bf16.mxu0 %v6455_v41 }
 0x4b0   :  { %5874 = vmatpush3.bf16.msra.mxu0 %v6456_v21 }
 0x4b1   :  { %5875 = vmatprep.subr.bf16.mxu0 %v6457_v23 }
 0x4b4   :  { %5876 = vmatpush3.bf16.msra.mxu0 %v6458_v53 }
 0x4b5   :  { %5877 = vmatprep.subr.bf16.mxu0 %v6459_v24 }
 0x4b8   :  { %5878 = vmatpush3.bf16.msra.mxu0 %v6460_v8 }
 0x4bb   :  { %3024 = vmatmul.mubr.bf16.vlgmr.msra.gmra.mxu0 %v2847_v32 }
 0x4bc   :  { %3031 = vmatprep.mubr.bf16.mxu0 %v2850_v34 }
 0x4c3   :  { %3032 = vmatmul.mubr.bf16.gmra.mxu0 %v2849_v30 }
 0x4c4   :  { %3039 = vmatprep.mubr.bf16.mxu0 %v2852_v6 }
 0x4cb   :  { %3040 = vmatmul.mubr.bf16.gmra.mxu0 %v2851_v58 }
 0x4cc   :  { %3047 = vmatprep.mubr.bf16.mxu0 %v2854_v56 }
 0x4d3   :  { %3048 = vmatmul.mubr.bf16.gmra.mxu0 %v2853_v5 }
 0x4d4   :  { %3055 = vmatprep.mubr.bf16.mxu0 %v2856_v28 }
 0x4db   :  { %3056 = vmatmul.mubr.bf16.gmra.mxu0 %v2855_v50 }
 0x4dc   :  { %3063 = vmatprep.mubr.bf16.mxu0 %v2858_v22 }
 0x4e3   :  { %3064 = vmatmul.mubr.bf16.gmra.mxu0 %v2857_v14 }
 0x4e4   :  { %3071 = vmatprep.mubr.bf16.mxu0 %v2860_v42 }
 0x4eb   :  { %3072 = vmatmul.mubr.bf16.gmra.mxu0 %v2859_v1 }
 0x4ec   :  { %3079 = vmatprep.mubr.bf16.mxu0 %v2862_v57 }
 0x4f3   :  { %3080 = vmatmul.mubr.bf16.gmra.mxu0 %v2861_v31 }
 0x57b   :  { %v5879_v29 = vpop.f32.mrf.mxu0 }
 0x57d   :  { %v5880_v59 = vpop.f32.mrf.mxu0 }
 0x57e   :  { %v5881_v40 = vadd.f32 %v5880_v59, %v5879_v29 }
 0x57f   :  { %v5882_v51 = vpop.f32.mrf.mxu0 }
 0x580   :  { %v8731_v0 = vadd.f32 %v5881_v40, %v8651_v48 }
 0x581   :  { %v5883_v52 = vpop.f32.mrf.mxu0 }
 0x582   :  { %v5884_v36 = vadd.f32 %v5883_v52, %v5882_v51 }
 0x583   :  { %v5885_v45 = vpop.f32.mrf.mxu0 }
 0x584   :  { %v8734_v35 = vadd.f32 %v5884_v36, %v8654_v61 }
 0x585   :  { %v5886_v10 = vpop.f32.mrf.mxu0 }
 0x586   :  { %v5887_v3 = vadd.f32 %v5886_v10, %v5885_v45 }
 0x587   :  { %v5888_v11 = vpop.f32.mrf.mxu0 }
 0x588   :  { %v8737_v9 = vadd.f32 %v5887_v3, %v8657_v17 }
 0x589   :  { %v5889_v26 = vpop.f32.mrf.mxu0 }
 0x58a   :  { %v5890_v4 = vadd.f32 %v5889_v26, %v5888_v11 }
 0x58b   :  { %v5891_v15 = vpop.f32.mrf.mxu0 }
 0x58c   :  { %v8740_v16 = vadd.f32 %v5890_v4, %v8660_v18 }
 0x58d   :  { %v5892_v33 = vpop.f32.mrf.mxu0 }
 0x58e   :  { %v5893_v55 = vadd.f32 %v5892_v33, %v5891_v15 }
 0x58f   :  { %v5894_v12 = vpop.f32.mrf.mxu0 }
 0x590   :  { %v8743_v48 = vadd.f32 %v5893_v55, %v8663_v37 }
 0x591   :  { %v5895_v61 = vpop.f32.mrf.mxu0 }
 0x592   :  { %v5896_v7 = vadd.f32 %v5895_v61, %v5894_v12 }
 0x593   :  { %v5897_v2 = vpop.f32.mrf.mxu0 }
 0x594   :  { %v8746_v25 = vadd.f32 %v5896_v7, %v8666_v19 }
 0x595   :  { %v5898_v17 = vpop.f32.mrf.mxu0 }
 0x596   :  { %v5899_v49 = vadd.f32 %v5898_v17, %v5897_v2 }
 0x597   :  { %v5900_v47 = vpop.f32.mrf.mxu0 }
 0x598   :  { %v8749_v60 = vadd.f32 %v5899_v49, %v8669_v13 }
 0x599   :  { %v5901_v18 = vpop.f32.mrf.mxu0 }
 0x59a   :  { %v5902_v43 = vadd.f32 %v5901_v18, %v5900_v47 }
 0x59b   :  { %v5903_v41 = vpop.f32.mrf.mxu0 }
 0x59c   :  { %v8752_v21 = vadd.f32 %v5902_v43, %v8672_v44 }
 0x59d   :  { %v5904_v37 = vpop.f32.mrf.mxu0 }
 0x59e   :  { %v5905_v23 = vadd.f32 %v5904_v37, %v5903_v41 }
 0x59f   :  { %v5906_v53 = vpop.f32.mrf.mxu0 }
 0x5a0   :  { %v8755_v24 = vadd.f32 %v5905_v23, %v8675_v39 }
 0x5a1   :  { %v5907_v19 = vpop.f32.mrf.mxu0 }
 0x5a2   :  { %v5908_v8 = vadd.f32 %v5907_v19, %v5906_v53 }
 0x5a3   :  { %v5909_v32 = vpop.f32.mrf.mxu0 }
 0x5a4   :  { %v8758_v34 = vadd.f32 %v5908_v8, %v8678_v20 }
 0x5a5   :  { %v5910_v13 = vpop.f32.mrf.mxu0 }
 0x5a6   :  { %v5911_v30 = vadd.f32 %v5910_v13, %v5909_v32 }
 0x5a7   :  { %v5912_v6 = vpop.f32.mrf.mxu0 }
 0x5a8   :  { %v8761_v58 = vadd.f32 %v5911_v30, %v8681_v27 }
 0x5a9   :  { %v5913_v44 = vpop.f32.mrf.mxu0 }
 0x5aa   :  { %v5914_v56 = vadd.f32 %v5913_v44, %v5912_v6 }
 0x5ab   :  { %v5915_v5 = vpop.f32.mrf.mxu0 }
 0x5ac   :  { %v8764_v28 = vadd.f32 %v5914_v56, %v8684_v54 }
 0x5ad   :  { %v5916_v39 = vpop.f32.mrf.mxu0 }
 0x5ae   :  { %v5917_v50 = vadd.f32 %v5916_v39, %v5915_v5 }
 0x5af   :  { %v5918_v22 = vpop.f32.mrf.mxu0 }
 0x5b0   :  { %v8767_v14 = vadd.f32 %v5917_v50, %v8687_v63 }
 0x5b1   :  { %v5919_v20 = vpop.f32.mrf.mxu0 }
 0x5b2   :  { %v5920_v42 = vadd.f32 %v5919_v20, %v5918_v22 }
 0x5b3   :  { %v5921_v1 = vpop.f32.mrf.mxu0 }
 0x5b4   :  { %v8770_v57 = vadd.f32 %v5920_v42, %v8690_v62 }
 0x5b5   :  { %v5922_v27 = vpop.f32.mrf.mxu0 }
 0x5b6   :  { %v5923_v31 = vadd.f32 %v5922_v27, %v5921_v1 }
 0x5b7   :  { %v5924_v29 = vpop.f32.mrf.mxu0 }
 0x5b8   :  { %v8773_v59 = vadd.f32 %v5923_v31, %v8693_v38 }
 0x5b9   :  { %v5925_v54 = vpop.f32.mrf.mxu0 }
 0x5ba   :  { %v5926_v40 = vadd.f32 %v5925_v54, %v5924_v29 }
 0x5bc   :  { %v8776_v51 = vadd.f32 %v5926_v40, %v8696_v46 }
 0x5bd   :  { %6565 = dma.done.wait [#allocation3 + $0x4], 2048 }
 0x5be   :  { %6566 = vsyncadd [#allocation3 + $0x4], 4294965248  ;;  %v10350_v63 = vld [vmem:[#allocation24_spill] sm:$0xff]  ;;  %v10351_v52 = vld [vmem:[#allocation26_spill] sm:$0xff]  ;;  %v6579_v45 = vmov 5  }
 0x5bf   :  { %v3107_v36 = vpack.c.bf16 %v10351_v52, %v10350_v63  ;;  %6462 = vset.pattern.permute.xlu1 %v6579_v45  ;;  %6461 = vset.pattern.permute.xlu0 %v6579_v45  ;;  %v6463_v62 = vld [vmem:[#allocation2 + $0x278] sm:$0xff]   ;;  %v6465_v3 = vld [vmem:[#allocation2 + $0x270] sm:$0xff]   ;;  %v6467_v11 = vld [vmem:[#allocation2 + $0x268] sm:$0xff]  }
 0x5c0   :  { %v6464_v10 = vld [vmem:[#allocation2 + $0x238] sm:$0xff]   ;;  %5927 = vmatprep.subr.bf16.mxu1 %v6463_v62  ;;  %v6466_v38 = vld [vmem:[#allocation2 + $0x230] sm:$0xff]   ;;  %v6468_v46 = vld [vmem:[#allocation2 + $0x228] sm:$0xff]  }
 0x5c1   :  { %3282 = vmatprep.mubr.bf16.mxu1 %v3107_v36  ;;  %5928 = vmatpush3.bf16.msra.mxu1 %v6464_v10  ;;  %v6469_v26 = vld [vmem:[#allocation2 + $0x260] sm:$0xff]   ;;  %v6471_v15 = vld [vmem:[#allocation2 + $0x258] sm:$0xff]   ;;  %v6473_v55 = vld [vmem:[#allocation2 + $0x250] sm:$0xff]  }
 0x5c2   :  { %5929 = vmatprep.subr.bf16.mxu1 %v6465_v3  ;;  %v6470_v4 = vld [vmem:[#allocation2 + $0x220] sm:$0xff]   ;;  %v6472_v33 = vld [vmem:[#allocation2 + $0x218] sm:$0xff]   ;;  %v3365_v12 = vld [vmem:[%s9848_s9 + $0x10] sm:$0xff] }
 0x5c3   :  { %v3363_v61 = vld [vmem:[%s9848_s9] sm:$0xff]  ;;  %3391 = vperm.xlu1 %6462, %v3365_v12   ;;  %v3366_v7 = vld [vmem:[%s9848_s9 + $0x18] sm:$0xff]  ;;  %v3364_v2 = vld [vmem:[%s9848_s9 + $0x8] sm:$0xff] }
 0x5c4   :  { %3381 = vperm.xlu0 %6461, %v3363_v61   ;;  %v6474_v17 = vld [vmem:[#allocation2 + $0x210] sm:$0xff]   ;;  %v6475_v49 = vld [vmem:[#allocation2 + $0x248] sm:$0xff]   ;;  %v3367_v18 = vld [vmem:[%s9848_s9 + $0x20] sm:$0xff] }
 0x5c5   :  { %5930 = vmatpush3.bf16.msra.mxu1 %v6466_v38  ;;  %v3368_v47 = vld [vmem:[%s9848_s9 + $0x28] sm:$0xff]  ;;  %v6477_v41 = vld [vmem:[#allocation2 + $0x240] sm:$0xff]   ;;  %v3370_v37 = vld [vmem:[%s9848_s9 + $0x38] sm:$0xff] }
 0x5c6   :  { %5931 = vmatprep.subr.bf16.mxu1 %v6467_v11  ;;  %v6476_v43 = vld [vmem:[#allocation2 + $0x208] sm:$0xff]   ;;  %v3369_v23 = vld [vmem:[%s9848_s9 + $0x30] sm:$0xff]  ;;  %v6478_v53 = vld [vmem:[#allocation2 + $0x200] sm:$0xff]  }
 0x5c7   :  { %3396 = vperm.xlu1 %6462, %v3366_v7   ;;  %v10352_v19 = vld [vmem:[#allocation23_spill] sm:$0xff]  ;;  %v10353_v8 = vld [vmem:[#allocation25_spill] sm:$0xff]  ;;  %v3371_v30 = vld [vmem:[%s9848_s9 + $0x40] sm:$0xff] }
 0x5c8   :  { %3386 = vperm.xlu0 %6461, %v3364_v2   ;;  %v3106_v32 = vpack.c.bf16 %v10353_v8, %v10352_v19  ;;  %v3372_v13 = vld [vmem:[%s9848_s9 + $0x48] sm:$0xff]  ;;  %v10354_v6 = vld [vmem:[#allocation29_spill] sm:$0xff]  ;;  %v10355_v44 = vld [vmem:[#allocation34_spill] sm:$0xff] }
 0x5c9   :  { %5932 = vmatpush3.bf16.msra.mxu1 %v6468_v46  ;;  %v3109_v56 = vpack.c.bf16 %v10355_v44, %v10354_v6  ;;  %v3374_v5 = vld [vmem:[%s9848_s9 + $0x58] sm:$0xff]  ;;  %v3373_v39 = vld [vmem:[%s9848_s9 + $0x50] sm:$0xff]  ;;  %v10356_v50 = vld [vmem:[#allocation27_spill] sm:$0xff] }
 0x5ca   :  { %5933 = vmatprep.subr.bf16.mxu1 %v6469_v26  ;;  %v10357_v22 = vld [vmem:[#allocation32_spill] sm:$0xff]  ;;  %v3376_v42 = vld [vmem:[%s9848_s9 + $0x68] sm:$0xff]  ;;  %v3375_v1 = vld [vmem:[%s9848_s9 + $0x60] sm:$0xff] }
 0x5cb   :  { %3406 = vperm.xlu1 %6462, %v3368_v47   ;;  %v3108_v20 = vpack.c.bf16 %v10357_v22, %v10356_v50  ;;  %v10358_v27 = vld [vmem:[#allocation38_spill] sm:$0xff]  ;;  %v3378_v54 = vld [vmem:[%s9848_s9 + $0x78] sm:$0xff]  ;;  %v3377_v40 = vld [vmem:[%s9848_s9 + $0x70] sm:$0xff] }
 0x5cc   :  { %3401 = vperm.xlu0 %6461, %v3367_v18   ;;  %v10359_v31 = vld [vmem:[#allocation42_spill] sm:$0xff]  ;;  %v10360_v36 = vld [vmem:[#allocation37_spill] sm:$0xff]  ;;  %v10361_v45 = vld [vmem:[#allocation40_spill] sm:$0xff] }
 0x5cd   :  { %5934 = vmatpush3.bf16.msra.mxu1 %v6470_v4  ;;  %v3111_v29 = vpack.c.bf16 %v10359_v31, %v10358_v27  ;;  %v3110_v62 = vpack.c.bf16 %v10361_v45, %v10360_v36  ;;  %v10362_v10 = vld [vmem:[#allocation47_spill] sm:$0xff]  ;;  %v10363_v3 = vld [vmem:[#allocation50_spill] sm:$0xff]  ;;  %v10364_v11 = vld [vmem:[#allocation44_spill] sm:$0xff] }
 0x5ce   :  { %5935 = vmatprep.subr.bf16.mxu1 %v6471_v15  ;;  %v3113_v38 = vpack.c.bf16 %v10363_v3, %v10362_v10  ;;  %v10365_v46 = vld [vmem:[#allocation49_spill] sm:$0xff]  ;;  %v10366_v4 = vld [vmem:[#allocation55_spill] sm:$0xff]  ;;  %v10369_v12 = vld [vmem:[#allocation56_spill] sm:$0xff] }
 0x5cf   :  { %3416 = vperm.xlu1 %6462, %v3370_v37   ;;  %v3112_v26 = vpack.c.bf16 %v10365_v46, %v10364_v11  ;;  %v10367_v15 = vld [vmem:[#allocation59_spill] sm:$0xff]  ;;  %v10371_v2 = vld [vmem:[#allocation69_spill] sm:$0xff]  ;;  %v10373_v47 = vld [vmem:[#allocation66_spill] sm:$0xff] }
 0x5d0   :  { %3411 = vperm.xlu0 %6461, %v3369_v23   ;;  %v10370_v7 = vld [vmem:[#allocation63_spill] sm:$0xff]  ;;  %v10376_v23 = vld [vmem:[#allocation70_spill] sm:$0xff]  ;;  %v10390_v63 = vld [vmem:[#allocation104_spill] sm:$0xff] }
 0x5d1   :  { %5936 = vmatpush3.bf16.msra.mxu1 %v6472_v33  ;;  %v3115_v33 = vpack.c.bf16 %v10367_v15, %v10366_v4  ;;  %v10400_v15 = vld [vmem:[#allocation116_spill] sm:$0xff]  ;;  %v10404_v3 = vld [vmem:[#allocation114_spill] sm:$0xff]  ;;  %v10405_v46 = vld [vmem:[#allocation101_spill] sm:$0xff] }
 0x5d2   :  { %5937 = vmatprep.subr.bf16.mxu1 %v6473_v55  ;;  %v10368_v55 = vld [vmem:[#allocation52_spill] sm:$0xff]  ;;  %v10406_v4 = vld [vmem:[#allocation67_spill] sm:$0xff]  ;;  %v10410_v10 = vld [vmem:[#allocation110_spill] sm:$0xff] }
 0x5d3   :  { %3426 = vperm.xlu1 %6462, %v3372_v13   ;;  %v3114_v61 = vpack.c.bf16 %v10369_v12, %v10368_v55  ;;  %v10378_v13 = vld [vmem:[#allocation86_spill] sm:$0xff]  ;;  %v10401_v12 = vld [vmem:[#allocation103_spill] sm:$0xff]  ;;  %v10408_v31 = vld [vmem:[#allocation112_spill] sm:$0xff] }
 0x5d4   :  { %3421 = vperm.xlu0 %6461, %v3371_v30   ;;  %v10379_v30 = vld [vmem:[#allocation93_spill] sm:$0xff]  ;;  %v10409_v45 = vld [vmem:[#allocation99_spill] sm:$0xff] }
 0x5d5   :  { %5938 = vmatpush3.bf16.msra.mxu1 %v6474_v17  ;;  %v3117_v17 = vpack.c.bf16 %v10371_v2, %v10370_v7  ;;  %v10396_v2 = vld [vmem:[#allocation118_spill] sm:$0xff]  ;;  %v10412_v6 = vld [vmem:[#allocation125_spill] sm:$0xff]  ;;  %v10413_v50 = vld [vmem:[#allocation127_spill] sm:$0xff] }
 0x5d6   :  { %5939 = vmatprep.subr.bf16.mxu1 %v6475_v49  ;;  %v10372_v49 = vld [vmem:[#allocation62_spill] sm:$0xff] }
 0x5d7   :  { %3436 = vperm.xlu1 %6462, %v3374_v5   ;;  %v3116_v18 = vpack.c.bf16 %v10373_v47, %v10372_v49  ;;  %v10380_v5 = vld [vmem:[#allocation83_spill] sm:$0xff]  ;;  %v10397_v47 = vld [vmem:[#allocation105_spill] sm:$0xff]  ;;  %v10402_v7 = vld [vmem:[#allocation98_spill] sm:$0xff] }
 0x5d8   :  { %3431 = vperm.xlu0 %6461, %v3373_v39   ;;  %v10381_v39 = vld [vmem:[#allocation88_spill] sm:$0xff] }
 0x5d9   :  { %5940 = vmatpush3.bf16.msra.mxu1 %v6476_v43  ;;  %v10374_v43 = vld [vmem:[#allocation75_spill] sm:$0xff] }
 0x5da   :  { %5941 = vmatprep.subr.bf16.mxu1 %v6477_v41  ;;  %v10375_v41 = vld [vmem:[#allocation79_spill] sm:$0xff] }
 0x5db   :  { %3446 = vperm.xlu1 %6462, %v3376_v42   ;;  %v3119_v37 = vpack.c.bf16 %v10375_v41, %v10374_v43  ;;  %v10392_v41 = vld [vmem:[#allocation120_spill] sm:$0xff] }
 0x5dc   :  { %3441 = vperm.xlu0 %6461, %v3375_v1   ;;  %v10398_v43 = vld [vmem:[#allocation100_spill] sm:$0xff] }
 0x5dd   :  { %5942 = vmatpush3.bf16.msra.mxu1 %v6478_v53  ;;  %v10377_v53 = vld [vmem:[#allocation78_spill] sm:$0xff] }
 0x5df   :  { %3456 = vperm.xlu1 %6462, %v3378_v54  }
 0x5e0   :  { %3283 = vmatmul.mubr.bf16.vlgmr.msra.gmra.mxu1 %v3106_v32  ;;  %3451 = vperm.xlu0 %6461, %v3377_v40   ;;  %v3118_v32 = vpack.c.bf16 %v10377_v53, %v10376_v23  ;;  %v10383_v40 = vld [vmem:[#allocation109_spill] sm:$0xff]  ;;  %v10393_v53 = vld [vmem:[#allocation107_spill] sm:$0xff] }
 0x5e1   :  { %3290 = vmatprep.mubr.bf16.mxu1 %v3109_v56  ;;  %v3121_v56 = vpack.c.bf16 %v10379_v30, %v10378_v13  ;;  %v10388_v30 = vld [vmem:[#allocation124_spill] sm:$0xff]  ;;  %v10394_v13 = vld [vmem:[#allocation102_spill] sm:$0xff] }
 0x5e8   :  { %3291 = vmatmul.mubr.bf16.gmra.mxu1 %v3108_v20  ;;  %v3120_v20 = vpack.c.bf16 %v10381_v39, %v10380_v5  ;;  %v10389_v39 = vld [vmem:[#allocation111_spill] sm:$0xff] }
 0x5e9   :  { %3298 = vmatprep.mubr.bf16.mxu1 %v3111_v29  ;;  %v10382_v29 = vld [vmem:[#allocation122_spill] sm:$0xff] }
 0x5f0   :  { %3299 = vmatmul.mubr.bf16.gmra.mxu1 %v3110_v62 }
 0x5f1   :  { %3306 = vmatprep.mubr.bf16.mxu1 %v3113_v38  ;;  %v10384_v38 = vld [vmem:[#allocation108_spill] sm:$0xff] }
 0x5f8   :  { %3307 = vmatmul.mubr.bf16.gmra.mxu1 %v3112_v26 }
 0x5f9   :  { %3314 = vmatprep.mubr.bf16.mxu1 %v3115_v33  ;;  %v10385_v33 = vld [vmem:[#allocation121_spill] sm:$0xff] }
 0x600   :  { %3315 = vmatmul.mubr.bf16.gmra.mxu1 %v3114_v61 }
 0x601   :  { %3322 = vmatprep.mubr.bf16.mxu1 %v3117_v17 }
 0x608   :  { %3323 = vmatmul.mubr.bf16.gmra.mxu1 %v3116_v18 }
 0x609   :  { %3330 = vmatprep.mubr.bf16.mxu1 %v3119_v37  ;;  %v10386_v37 = vld [vmem:[#allocation106_spill] sm:$0xff] }
 0x610   :  { %3331 = vmatmul.mubr.bf16.gmra.mxu1 %v3118_v32 }
 0x611   :  { %3338 = vmatprep.mubr.bf16.mxu1 %v3121_v56  ;;  %v10387_v56 = vld [vmem:[#allocation119_spill] sm:$0xff] }
 0x618   :  { %3339 = vmatmul.mubr.bf16.gmra.mxu1 %v3120_v20 }
 0x63e   :  { %v3392_v42 = vpop.permute.xlu1 %3391 }
 0x63f   :  { %v3382_v1 = vpop.permute.xlu0 %3381  ;;  %v8859_v54 = vmul.f32 %v3392_v42, %v10382_v29  ;;  %v8862_v62 = vmul.f32 %v3392_v42, %v10383_v40 }
 0x640   :  { %v8865_v26 = vmul.f32 %v3382_v1, %v10384_v38  ;;  %v8868_v61 = vmul.f32 %v3382_v1, %v10385_v33  ;;  %v10391_v1 = vld [vmem:[#allocation117_spill] sm:$0xff] }
 0x642   :  { %v3397_v17 = vpop.permute.xlu1 %3396 }
 0x643   :  { %v3387_v18 = vpop.permute.xlu0 %3386  ;;  %v8871_v32 = vmul.f32 %v3397_v17, %v10386_v37  ;;  %v8874_v20 = vmul.f32 %v3397_v17, %v10387_v56 }
 0x644   :  { %v8877_v29 = vmul.f32 %v3387_v18, %v10388_v30  ;;  %v8880_v42 = vmul.f32 %v3387_v18, %v10389_v39  ;;  %v10395_v18 = vld [vmem:[#allocation115_spill] sm:$0xff] }
 0x646   :  { %v3407_v40 = vpop.permute.xlu1 %3406 }
 0x647   :  { %v3402_v38 = vpop.permute.xlu0 %3401  ;;  %v8883_v19 = vmul.f32 %v3407_v40, %v10390_v63  ;;  %v8886_v33 = vmul.f32 %v3407_v40, %v10391_v1 }
 0x648   :  { %v8889_v37 = vmul.f32 %v3402_v38, %v10392_v41  ;;  %v8892_v17 = vmul.f32 %v3402_v38, %v10393_v53  ;;  %v10399_v38 = vld [vmem:[#allocation113_spill] sm:$0xff] }
 0x64a   :  { %v3417_v56 = vpop.permute.xlu1 %3416 }
 0x64b   :  { %v3412_v30 = vpop.permute.xlu0 %3411  ;;  %v8895_v5 = vmul.f32 %v3417_v56, %v10394_v13  ;;  %v8898_v39 = vmul.f32 %v3417_v56, %v10395_v18 }
 0x64c   :  { %v8901_v63 = vmul.f32 %v3412_v30, %v10396_v2  ;;  %v8904_v40 = vmul.f32 %v3412_v30, %v10397_v47  ;;  %v10403_v30 = vld [vmem:[#allocation31_spill] sm:$0xff] }
 0x64e   :  { %v3427_v1 = vpop.permute.xlu1 %3426 }
 0x64f   :  { %v3422_v41 = vpop.permute.xlu0 %3421  ;;  %v8907_v23 = vmul.f32 %v3427_v1, %v10398_v43  ;;  %v8910_v53 = vmul.f32 %v3427_v1, %v10399_v38 }
 0x650   :  { %v8913_v13 = vmul.f32 %v3422_v41, %v10400_v15  ;;  %v8916_v56 = vmul.f32 %v3422_v41, %v10401_v12  ;;  %v10407_v41 = vld [vmem:[#allocation61_spill] sm:$0xff] }
 0x652   :  { %v3437_v18 = vpop.permute.xlu1 %3436 }
 0x653   :  { %v3432_v2 = vpop.permute.xlu0 %3431  ;;  %v8919_v49 = vmul.f32 %v3437_v18, %v10402_v7  ;;  %v8922_v47 = vmul.f32 %v3437_v18, %v10403_v30 }
 0x654   :  { %v8925_v43 = vmul.f32 %v3432_v2, %v10404_v3  ;;  %v8928_v1 = vmul.f32 %v3432_v2, %v10405_v46  ;;  %v10411_v2 = vld [vmem:[#allocation123_spill] sm:$0xff] }
 0x656   :  { %v3447_v38 = vpop.permute.xlu1 %3446 }
 0x657   :  { %v3442_v15 = vpop.permute.xlu0 %3441  ;;  %v8931_v55 = vmul.f32 %v3447_v38, %v10406_v4  ;;  %v8934_v12 = vmul.f32 %v3447_v38, %v10407_v41 }
 0x658   :  { %v8937_v7 = vmul.f32 %v3442_v15, %v10408_v31  ;;  %v8940_v18 = vmul.f32 %v3442_v15, %v10409_v45 }
 0x65a   :  { %v3457_v30 = vpop.permute.xlu1 %3456 }
 0x65b   :  { %v3452_v3 = vpop.permute.xlu0 %3451  ;;  %v8943_v11 = vmul.f32 %v3457_v30, %v10410_v10  ;;  %v8946_v46 = vmul.f32 %v3457_v30, %v10411_v2 }
 0x65c   :  { %v8949_v4 = vmul.f32 %v3452_v3, %v10412_v6  ;;  %v8952_v38 = vmul.f32 %v3452_v3, %v10413_v50 }
 0x6a0   :  { %v5943_v41 = vpop.f32.mrf.mxu1 }
 0x6a2   :  { %v5944_v31 = vpop.f32.mrf.mxu1 }
 0x6a3   :  { %v5945_v27 = vadd.f32 %v5944_v31, %v5943_v41 }
 0x6a4   :  { %v5946_v36 = vpop.f32.mrf.mxu1 }
 0x6a5   :  { %v8955_v15 = vadd.f32 %v5945_v27, %v8731_v0 }
 0x6a6   :  { %v5947_v45 = vpop.f32.mrf.mxu1 }
 0x6a7   :  { %v5948_v52 = vadd.f32 %v5947_v45, %v5946_v36 }
 0x6a8   :  { %v5949_v10 = vpop.f32.mrf.mxu1 }
 0x6a9   :  { %v8958_v8 = vadd.f32 %v5948_v52, %v8734_v35 }
 0x6aa   :  { %v5950_v30 = vpop.f32.mrf.mxu1 }
 0x6ab   :  { %v5951_v2 = vadd.f32 %v5950_v30, %v5949_v10 }
 0x6ac   :  { %v5952_v6 = vpop.f32.mrf.mxu1 }
 0x6ad   :  { %v8961_v44 = vadd.f32 %v5951_v2, %v8737_v9 }
 0x6ae   :  { %v5953_v3 = vpop.f32.mrf.mxu1 }
 0x6af   :  { %v5954_v50 = vadd.f32 %v5953_v3, %v5952_v6 }
 0x6b0   :  { %v5955_v22 = vpop.f32.mrf.mxu1 }
 0x6b1   :  { %v8964_v31 = vadd.f32 %v5954_v50, %v8740_v16 }
 0x6b2   :  { %v5956_v0 = vpop.f32.mrf.mxu1 }
 0x6b3   :  { %v5957_v27 = vadd.f32 %v5956_v0, %v5955_v22 }
 0x6b4   :  { %v5958_v41 = vpop.f32.mrf.mxu1 }
 0x6b5   :  { %v8967_v36 = vadd.f32 %v5957_v27, %v8743_v48 }
 0x6b6   :  { %v5959_v35 = vpop.f32.mrf.mxu1 }
 0x6b7   :  { %v5960_v52 = vadd.f32 %v5959_v35, %v5958_v41 }
 0x6b8   :  { %v5961_v45 = vpop.f32.mrf.mxu1 }
 0x6b9   :  { %v8970_v10 = vadd.f32 %v5960_v52, %v8746_v25 }
 0x6ba   :  { %v5962_v9 = vpop.f32.mrf.mxu1 }
 0x6bb   :  { %v5963_v2 = vadd.f32 %v5962_v9, %v5961_v45 }
 0x6bc   :  { %v5964_v30 = vpop.f32.mrf.mxu1 }
 0x6bd   :  { %v8973_v6 = vadd.f32 %v5963_v2, %v8749_v60 }
 0x6be   :  { %v5965_v16 = vpop.f32.mrf.mxu1 }
 0x6bf   :  { %v5966_v50 = vadd.f32 %v5965_v16, %v5964_v30 }
 0x6c0   :  { %v5967_v3 = vpop.f32.mrf.mxu1 }
 0x6c1   :  { %v8976_v22 = vadd.f32 %v5966_v50, %v8752_v21 }
 0x6c2   :  { %v5968_v48 = vpop.f32.mrf.mxu1 }
 0x6c3   :  { %v5969_v0 = vadd.f32 %v5968_v48, %v5967_v3 }
 0x6c4   :  { %v5970_v27 = vpop.f32.mrf.mxu1 }
 0x6c5   :  { %v8979_v41 = vadd.f32 %v5969_v0, %v8755_v24 }
 0x6c6   :  { %v5971_v25 = vpop.f32.mrf.mxu1 }
 0x6c7   :  { %v5972_v35 = vadd.f32 %v5971_v25, %v5970_v27 }
 0x6c8   :  { %v5973_v52 = vpop.f32.mrf.mxu1 }
 0x6c9   :  { %v8982_v45 = vadd.f32 %v5972_v35, %v8758_v34 }
 0x6ca   :  { %v5974_v60 = vpop.f32.mrf.mxu1 }
 0x6cb   :  { %v5975_v9 = vadd.f32 %v5974_v60, %v5973_v52 }
 0x6cc   :  { %v5976_v2 = vpop.f32.mrf.mxu1 }
 0x6cd   :  { %v8985_v30 = vadd.f32 %v5975_v9, %v8761_v58 }
 0x6ce   :  { %v5977_v21 = vpop.f32.mrf.mxu1 }
 0x6cf   :  { %v5978_v16 = vadd.f32 %v5977_v21, %v5976_v2 }
 0x6d0   :  { %v5979_v50 = vpop.f32.mrf.mxu1 }
 0x6d1   :  { %v8988_v3 = vadd.f32 %v5978_v16, %v8764_v28 }
 0x6d2   :  { %v5980_v24 = vpop.f32.mrf.mxu1 }
 0x6d3   :  { %v5981_v48 = vadd.f32 %v5980_v24, %v5979_v50 }
 0x6d4   :  { %v5982_v0 = vpop.f32.mrf.mxu1 }
 0x6d5   :  { %v8991_v27 = vadd.f32 %v5981_v48, %v8767_v14 }
 0x6d6   :  { %v5983_v34 = vpop.f32.mrf.mxu1 }
 0x6d7   :  { %v5984_v25 = vadd.f32 %v5983_v34, %v5982_v0 }
 0x6d8   :  { %v5985_v35 = vpop.f32.mrf.mxu1 }
 0x6d9   :  { %v8994_v52 = vadd.f32 %v5984_v25, %v8770_v57 }
 0x6da   :  { %v5986_v58 = vpop.f32.mrf.mxu1 }
 0x6db   :  { %v5987_v60 = vadd.f32 %v5986_v58, %v5985_v35 }
 0x6dc   :  { %v5988_v9 = vpop.f32.mrf.mxu1 }
 0x6dd   :  { %v8997_v2 = vadd.f32 %v5987_v60, %v8773_v59 }
 0x6de   :  { %v5989_v28 = vpop.f32.mrf.mxu1 }
 0x6df   :  { %v5990_v21 = vadd.f32 %v5989_v28, %v5988_v9 }
 0x6e1   :  { %v9000_v16 = vadd.f32 %v5990_v21, %v8776_v51 }
 0x6e2   :  { %6567 = dma.done.wait [#allocation3 + $0x5], 2048 }
 0x6e3   :  { %6568 = vsyncadd [#allocation3 + $0x5], 4294965248  ;;  %v3494_v14 = vpack.c.bf16 %v8880_v42, %v8868_v61  ;;  %v6580_v50 = vmov 6   ;;  %v6481_v57 = vld [vmem:[#allocation2 + $0x2f8] sm:$0xff]   ;;  %v6483_v48 = vld [vmem:[#allocation2 + $0x2f0] sm:$0xff]  }
 0x6e4   :  { %6480 = vset.pattern.permute.xlu1 %v6580_v50  ;;  %6479 = vset.pattern.permute.xlu0 %v6580_v50  ;;  %v6482_v24 = vld [vmem:[#allocation2 + $0x2b8] sm:$0xff]   ;;  %v6484_v59 = vld [vmem:[#allocation2 + $0x2b0] sm:$0xff]   ;;  %v6485_v0 = vld [vmem:[#allocation2 + $0x2e8] sm:$0xff]  }
 0x6e5   :  { %3669 = vmatprep.mubr.bf16.mxu0 %v3494_v14  ;;  %5991 = vmatprep.subr.bf16.mxu0 %v6481_v57  ;;  %v6486_v51 = vld [vmem:[#allocation2 + $0x2a8] sm:$0xff]   ;;  %v6487_v34 = vld [vmem:[#allocation2 + $0x2e0] sm:$0xff]   ;;  %v6489_v61 = vld [vmem:[#allocation2 + $0x2d8] sm:$0xff]  }
 0x6e6   :  { %5992 = vmatpush3.bf16.msra.mxu0 %v6482_v24  ;;  %v6488_v25 = vld [vmem:[#allocation2 + $0x2a0] sm:$0xff]   ;;  %v6490_v42 = vld [vmem:[#allocation2 + $0x298] sm:$0xff]   ;;  %v6491_v35 = vld [vmem:[#allocation2 + $0x2d0] sm:$0xff]  }
 0x6e7   :  { %5993 = vmatprep.subr.bf16.mxu0 %v6483_v48  ;;  %v3752_v58 = vld [vmem:[%s9848_s9 + $0x10] sm:$0xff]  ;;  %v3750_v60 = vld [vmem:[%s9848_s9] sm:$0xff]  ;;  %v3753_v9 = vld [vmem:[%s9848_s9 + $0x18] sm:$0xff] }
 0x6e8   :  { %3778 = vperm.xlu1 %6480, %v3752_v58   ;;  %3768 = vperm.xlu0 %6479, %v3750_v60   ;;  %v3751_v28 = vld [vmem:[%s9848_s9 + $0x8] sm:$0xff]  ;;  %v6492_v21 = vld [vmem:[#allocation2 + $0x290] sm:$0xff]   ;;  %v3754_v57 = vld [vmem:[%s9848_s9 + $0x20] sm:$0xff]  ;;  %v3498_v58 = vpack.c.bf16 %v8886_v33, %v8892_v17  ;;  %v3500_v33 = vpack.c.bf16 %v8898_v39, %v8904_v40  ;;  %v3499_v17 = vpack.c.bf16 %v8895_v5, %v8901_v63 }
 0x6e9   :  { %v6493_v14 = vld [vmem:[#allocation2 + $0x2c8] sm:$0xff]   ;;  %v6495_v48 = vld [vmem:[#allocation2 + $0x2c0] sm:$0xff]   ;;  %v3765_v60 = vld [vmem:[%s9848_s9 + $0x78] sm:$0xff]  ;;  %v3506_v39 = vpack.c.bf16 %v8934_v12, %v8940_v18  ;;  %v3505_v63 = vpack.c.bf16 %v8931_v55, %v8937_v7 }
 0x6ea   :  { %5994 = vmatpush3.bf16.msra.mxu0 %v6484_v59  ;;  %v3755_v50 = vld [vmem:[%s9848_s9 + $0x28] sm:$0xff]  ;;  %v3757_v59 = vld [vmem:[%s9848_s9 + $0x38] sm:$0xff]  ;;  %v10417_v55 = vld [vmem:[#allocation30_spill] sm:$0xff] }
 0x6eb   :  { %5995 = vmatprep.subr.bf16.mxu0 %v6485_v0  ;;  %v6494_v24 = vld [vmem:[#allocation2 + $0x288] sm:$0xff]   ;;  %v3756_v0 = vld [vmem:[%s9848_s9 + $0x30] sm:$0xff] }
 0x6ec   :  { %3783 = vperm.xlu1 %6480, %v3753_v9   ;;  %3773 = vperm.xlu0 %6479, %v3751_v28   ;;  %v3502_v9 = vpack.c.bf16 %v8910_v53, %v8916_v56  ;;  %v3501_v28 = vpack.c.bf16 %v8907_v23, %v8913_v13  ;;  %v3508_v53 = vpack.c.bf16 %v8946_v46, %v8952_v38  ;;  %v10415_v12 = vld [vmem:[#allocation39_spill] sm:$0xff]  ;;  %v10420_v38 = vld [vmem:[#allocation33_spill] sm:$0xff] }
 0x6ee   :  { %5996 = vmatpush3.bf16.msra.mxu0 %v6486_v51  ;;  %v6496_v51 = vld [vmem:[#allocation2 + $0x280] sm:$0xff]  }
 0x6ef   :  { %5997 = vmatprep.subr.bf16.mxu0 %v6487_v34  ;;  %v3493_v34 = vpack.c.bf16 %v8877_v29, %v8865_v26  ;;  %v3760_v29 = vld [vmem:[%s9848_s9 + $0x50] sm:$0xff]  ;;  %v3495_v26 = vpack.c.bf16 %v8871_v32, %v8859_v54  ;;  %v3497_v32 = vpack.c.bf16 %v8883_v19, %v8889_v37  ;;  %v3503_v19 = vpack.c.bf16 %v8919_v49, %v8925_v43 }
 0x6f0   :  { %3793 = vperm.xlu1 %6480, %v3755_v50   ;;  %3788 = vperm.xlu0 %6479, %v3754_v57   ;;  %v3764_v54 = vld [vmem:[%s9848_s9 + $0x70] sm:$0xff]  ;;  %v10421_v50 = vld [vmem:[#allocation35_spill] sm:$0xff] }
 0x6f1   :  { %v10414_v49 = vld [vmem:[#allocation36_spill] sm:$0xff] }
 0x6f2   :  { %5998 = vmatpush3.bf16.msra.mxu0 %v6488_v25  ;;  %v3759_v25 = vld [vmem:[%s9848_s9 + $0x48] sm:$0xff]  ;;  %v10416_v37 = vld [vmem:[#allocation28_spill] sm:$0xff] }
 0x6f3   :  { %5999 = vmatprep.subr.bf16.mxu0 %v6489_v61  ;;  %v3758_v61 = vld [vmem:[%s9848_s9 + $0x40] sm:$0xff] }
 0x6f4   :  { %3803 = vperm.xlu1 %6480, %v3757_v59   ;;  %3798 = vperm.xlu0 %6479, %v3756_v0   ;;  %v10422_v59 = vld [vmem:[#allocation48_spill] sm:$0xff] }
 0x6f6   :  { %6000 = vmatpush3.bf16.msra.mxu0 %v6490_v42  ;;  %v3496_v42 = vpack.c.bf16 %v8874_v20, %v8862_v62  ;;  %v3763_v62 = vld [vmem:[%s9848_s9 + $0x68] sm:$0xff]  ;;  %v3762_v20 = vld [vmem:[%s9848_s9 + $0x60] sm:$0xff] }
 0x6f7   :  { %6001 = vmatprep.subr.bf16.mxu0 %v6491_v35  ;;  %v3761_v35 = vld [vmem:[%s9848_s9 + $0x58] sm:$0xff] }
 0x6f8   :  { %3813 = vperm.xlu1 %6480, %v3759_v25   ;;  %3808 = vperm.xlu0 %6479, %v3758_v61   ;;  %v10424_v25 = vld [vmem:[#allocation45_spill] sm:$0xff] }
 0x6fa   :  { %6002 = vmatpush3.bf16.msra.mxu0 %v6492_v21  ;;  %v3504_v21 = vpack.c.bf16 %v8922_v47, %v8928_v1  ;;  %v3507_v47 = vpack.c.bf16 %v8943_v11, %v8949_v4  ;;  %v10418_v1 = vld [vmem:[#allocation41_spill] sm:$0xff]  ;;  %v10419_v11 = vld [vmem:[#allocation43_spill] sm:$0xff] }
 0x6fb   :  { %6003 = vmatprep.subr.bf16.mxu0 %v6493_v14 }
 0x6fc   :  { %3823 = vperm.xlu1 %6480, %v3761_v35   ;;  %3818 = vperm.xlu0 %6479, %v3760_v29  }
 0x6fe   :  { %6004 = vmatpush3.bf16.msra.mxu0 %v6494_v24 }
 0x6ff   :  { %6005 = vmatprep.subr.bf16.mxu0 %v6495_v48 }
 0x700   :  { %3833 = vperm.xlu1 %6480, %v3763_v62   ;;  %3828 = vperm.xlu0 %6479, %v3762_v20   ;;  %v10426_v62 = vld [vmem:[#allocation57_spill] sm:$0xff] }
 0x702   :  { %6006 = vmatpush3.bf16.msra.mxu0 %v6496_v51  ;;  %v10423_v51 = vld [vmem:[#allocation51_spill] sm:$0xff] }
 0x704   :  { %3843 = vperm.xlu1 %6480, %v3765_v60   ;;  %3838 = vperm.xlu0 %6479, %v3764_v54   ;;  %v10428_v54 = vld [vmem:[#allocation53_spill] sm:$0xff] }
 0x705   :  { %3670 = vmatmul.mubr.bf16.vlgmr.msra.gmra.mxu0 %v3493_v34 }
 0x706   :  { %3677 = vmatprep.mubr.bf16.mxu0 %v3496_v42  ;;  %v10425_v42 = vld [vmem:[#allocation46_spill] sm:$0xff] }
 0x70d   :  { %3678 = vmatmul.mubr.bf16.gmra.mxu0 %v3495_v26 }
 0x70e   :  { %3685 = vmatprep.mubr.bf16.mxu0 %v3498_v58  ;;  %v10427_v58 = vld [vmem:[#allocation58_spill] sm:$0xff] }
 0x715   :  { %3686 = vmatmul.mubr.bf16.gmra.mxu0 %v3497_v32 }
 0x716   :  { %3693 = vmatprep.mubr.bf16.mxu0 %v3500_v33  ;;  %v10429_v33 = vld [vmem:[#allocation54_spill] sm:$0xff] }
 0x71d   :  { %3694 = vmatmul.mubr.bf16.gmra.mxu0 %v3499_v17 }
 0x71e   :  { %3701 = vmatprep.mubr.bf16.mxu0 %v3502_v9 }
 0x725   :  { %3702 = vmatmul.mubr.bf16.gmra.mxu0 %v3501_v28 }
 0x726   :  { %3709 = vmatprep.mubr.bf16.mxu0 %v3504_v21  ;;  %v10430_v21 = vld [vmem:[#allocation65_spill] sm:$0xff] }
 0x72d   :  { %3710 = vmatmul.mubr.bf16.gmra.mxu0 %v3503_v19 }
 0x72e   :  { %3717 = vmatprep.mubr.bf16.mxu0 %v3506_v39  ;;  %v10431_v39 = vld [vmem:[#allocation68_spill] sm:$0xff] }
 0x735   :  { %3718 = vmatmul.mubr.bf16.gmra.mxu0 %v3505_v63 }
 0x736   :  { %3725 = vmatprep.mubr.bf16.mxu0 %v3508_v53  ;;  %v10432_v53 = vld [vmem:[#allocation60_spill] sm:$0xff] }
 0x73d   :  { %3726 = vmatmul.mubr.bf16.gmra.mxu0 %v3507_v47 }
 0x763   :  { %v3779_v23 = vpop.permute.xlu1 %3778  ;;  %v3769_v13 = vpop.permute.xlu0 %3768 }
 0x764   :  { %v9083_v43 = vmul.f32 %v3779_v23, %v10414_v49  ;;  %v9086_v5 = vmul.f32 %v3779_v23, %v10415_v12  ;;  %v9089_v40 = vmul.f32 %v3769_v13, %v10416_v37  ;;  %v9092_v7 = vmul.f32 %v3769_v13, %v10417_v55  ;;  %v10433_v23 = vld [vmem:[#allocation64_spill] sm:$0xff] }
 0x765   :  { %v10434_v37 = vld [vmem:[#allocation76_spill] sm:$0xff] }
 0x767   :  { %v3784_v46 = vpop.permute.xlu1 %3783  ;;  %v3774_v56 = vpop.permute.xlu0 %3773 }
 0x768   :  { %v9095_v18 = vmul.f32 %v3784_v46, %v10418_v1  ;;  %v9098_v4 = vmul.f32 %v3784_v46, %v10419_v11  ;;  %v9101_v14 = vmul.f32 %v3774_v56, %v10420_v38  ;;  %v9104_v57 = vmul.f32 %v3774_v56, %v10421_v50  ;;  %v10435_v46 = vld [vmem:[#allocation80_spill] sm:$0xff]  ;;  %v10436_v1 = vld [vmem:[#allocation71_spill] sm:$0xff]  ;;  %v10437_v38 = vld [vmem:[#allocation73_spill] sm:$0xff] }
 0x76b   :  { %v3794_v24 = vpop.permute.xlu1 %3793  ;;  %v3789_v48 = vpop.permute.xlu0 %3788 }
 0x76c   :  { %v9107_v0 = vmul.f32 %v3794_v24, %v10422_v59  ;;  %v9110_v34 = vmul.f32 %v3794_v24, %v10423_v51  ;;  %v9113_v61 = vmul.f32 %v3789_v48, %v10424_v25  ;;  %v9116_v35 = vmul.f32 %v3789_v48, %v10425_v42  ;;  %v10438_v59 = vld [vmem:[#allocation89_spill] sm:$0xff]  ;;  %v10439_v25 = vld [vmem:[#allocation91_spill] sm:$0xff] }
 0x76f   :  { %v3804_v29 = vpop.permute.xlu1 %3803  ;;  %v3799_v26 = vpop.permute.xlu0 %3798 }
 0x770   :  { %v9119_v20 = vmul.f32 %v3804_v29, %v10426_v62  ;;  %v9122_v60 = vmul.f32 %v3804_v29, %v10427_v58  ;;  %v9125_v32 = vmul.f32 %v3799_v26, %v10428_v54  ;;  %v9128_v17 = vmul.f32 %v3799_v26, %v10429_v33  ;;  %v10440_v29 = vld [vmem:[#allocation82_spill] sm:$0xff]  ;;  %v10441_v62 = vld [vmem:[#allocation85_spill] sm:$0xff] }
 0x773   :  { %v3814_v9 = vpop.permute.xlu1 %3813  ;;  %v3809_v28 = vpop.permute.xlu0 %3808 }
 0x774   :  { %v9131_v19 = vmul.f32 %v3814_v9, %v10430_v21  ;;  %v9134_v63 = vmul.f32 %v3814_v9, %v10431_v39  ;;  %v9137_v47 = vmul.f32 %v3809_v28, %v10432_v53  ;;  %v9140_v13 = vmul.f32 %v3809_v28, %v10433_v23  ;;  %v10442_v9 = vld [vmem:[#allocation95_spill] sm:$0xff]  ;;  %v10443_v21 = vld [vmem:[#allocation97_spill] sm:$0xff]  ;;  %v10444_v53 = vld [vmem:[#allocation94_spill] sm:$0xff] }
 0x777   :  { %v3824_v49 = vpop.permute.xlu1 %3823  ;;  %v3819_v12 = vpop.permute.xlu0 %3818 }
 0x778   :  { %v9143_v55 = vmul.f32 %v3824_v49, %v10434_v37  ;;  %v9146_v56 = vmul.f32 %v3824_v49, %v10435_v46  ;;  %v9149_v11 = vmul.f32 %v3819_v12, %v10436_v1  ;;  %v9152_v50 = vmul.f32 %v3819_v12, %v10437_v38  ;;  %v10445_v49 = vld [vmem:[#allocation96_spill] sm:$0xff] }
 0x77b   :  { %v3834_v24 = vpop.permute.xlu1 %3833  ;;  %v3829_v48 = vpop.permute.xlu0 %3828 }
 0x77c   :  { %v9155_v51 = vmul.f32 %v3834_v24, %v10438_v59  ;;  %v9158_v42 = vmul.f32 %v3834_v24, %v10439_v25  ;;  %v9161_v26 = vmul.f32 %v3829_v48, %v10440_v29  ;;  %v9164_v58 = vmul.f32 %v3829_v48, %v10441_v62 }
 0x77f   :  { %v3844_v54 = vpop.permute.xlu1 %3843  ;;  %v3839_v33 = vpop.permute.xlu0 %3838 }
 0x780   :  { %v9167_v28 = vmul.f32 %v3844_v54, %v10442_v9  ;;  %v9170_v39 = vmul.f32 %v3844_v54, %v10443_v21  ;;  %v9173_v23 = vmul.f32 %v3839_v33, %v10444_v53  ;;  %v9176_v12 = vmul.f32 %v3839_v33, %v10445_v49 }
 0x7c5   :  { %v6007_v37 = vpop.f32.mrf.mxu0 }
 0x7c7   :  { %v6008_v46 = vpop.f32.mrf.mxu0 }
 0x7c8   :  { %v6009_v1 = vadd.f32 %v6008_v46, %v6007_v37 }
 0x7c9   :  { %v6010_v38 = vpop.f32.mrf.mxu0 }
 0x7ca   :  { %v9179_v24 = vadd.f32 %v6009_v1, %v8955_v15 }
 0x7cb   :  { %v6011_v48 = vpop.f32.mrf.mxu0 }
 0x7cc   :  { %v6012_v59 = vadd.f32 %v6011_v48, %v6010_v38 }
 0x7cd   :  { %v6013_v25 = vpop.f32.mrf.mxu0 }
 0x7ce   :  { %v9182_v29 = vadd.f32 %v6012_v59, %v8958_v8 }
 0x7cf   :  { %v6014_v62 = vpop.f32.mrf.mxu0 }
 0x7d0   :  { %v6015_v54 = vadd.f32 %v6014_v62, %v6013_v25 }
 0x7d1   :  { %v6016_v9 = vpop.f32.mrf.mxu0 }
 0x7d2   :  { %v9185_v21 = vadd.f32 %v6015_v54, %v8961_v44 }
 0x7d3   :  { %v6017_v33 = vpop.f32.mrf.mxu0 }
 0x7d4   :  { %v6018_v53 = vadd.f32 %v6017_v33, %v6016_v9 }
 0x7d5   :  { %v6019_v49 = vpop.f32.mrf.mxu0 }
 0x7d6   :  { %v9188_v37 = vadd.f32 %v6018_v53, %v8964_v31 }
 0x7d7   :  { %v6020_v15 = vpop.f32.mrf.mxu0 }
 0x7d8   :  { %v6021_v46 = vadd.f32 %v6020_v15, %v6019_v49 }
 0x7d9   :  { %v6022_v1 = vpop.f32.mrf.mxu0 }
 0x7da   :  { %v9191_v38 = vadd.f32 %v6021_v46, %v8967_v36 }
 0x7db   :  { %v6023_v8 = vpop.f32.mrf.mxu0 }
 0x7dc   :  { %v6024_v48 = vadd.f32 %v6023_v8, %v6022_v1 }
 0x7dd   :  { %v6025_v59 = vpop.f32.mrf.mxu0 }
 0x7de   :  { %v9194_v25 = vadd.f32 %v6024_v48, %v8970_v10 }
 0x7df   :  { %v6026_v44 = vpop.f32.mrf.mxu0 }
 0x7e0   :  { %v6027_v62 = vadd.f32 %v6026_v44, %v6025_v59 }
 0x7e1   :  { %v6028_v54 = vpop.f32.mrf.mxu0 }
 0x7e2   :  { %v9197_v9 = vadd.f32 %v6027_v62, %v8973_v6 }
 0x7e3   :  { %v6029_v31 = vpop.f32.mrf.mxu0 }
 0x7e4   :  { %v6030_v33 = vadd.f32 %v6029_v31, %v6028_v54 }
 0x7e5   :  { %v6031_v53 = vpop.f32.mrf.mxu0 }
 0x7e6   :  { %v9200_v49 = vadd.f32 %v6030_v33, %v8976_v22 }
 0x7e7   :  { %v6032_v36 = vpop.f32.mrf.mxu0 }
 0x7e8   :  { %v6033_v15 = vadd.f32 %v6032_v36, %v6031_v53 }
 0x7e9   :  { %v6034_v46 = vpop.f32.mrf.mxu0 }
 0x7ea   :  { %v9203_v1 = vadd.f32 %v6033_v15, %v8979_v41 }
 0x7eb   :  { %v6035_v10 = vpop.f32.mrf.mxu0 }
 0x7ec   :  { %v6036_v8 = vadd.f32 %v6035_v10, %v6034_v46 }
 0x7ed   :  { %v6037_v48 = vpop.f32.mrf.mxu0 }
 0x7ee   :  { %v9206_v59 = vadd.f32 %v6036_v8, %v8982_v45 }
 0x7ef   :  { %v6038_v6 = vpop.f32.mrf.mxu0 }
 0x7f0   :  { %v6039_v44 = vadd.f32 %v6038_v6, %v6037_v48 }
 0x7f1   :  { %v6040_v62 = vpop.f32.mrf.mxu0 }
 0x7f2   :  { %v9209_v54 = vadd.f32 %v6039_v44, %v8985_v30 }
 0x7f3   :  { %v6041_v22 = vpop.f32.mrf.mxu0 }
 0x7f4   :  { %v6042_v31 = vadd.f32 %v6041_v22, %v6040_v62 }
 0x7f5   :  { %v6043_v33 = vpop.f32.mrf.mxu0 }
 0x7f6   :  { %v9212_v53 = vadd.f32 %v6042_v31, %v8988_v3 }
 0x7f7   :  { %v6044_v41 = vpop.f32.mrf.mxu0 }
 0x7f8   :  { %v6045_v36 = vadd.f32 %v6044_v41, %v6043_v33 }
 0x7f9   :  { %v6046_v15 = vpop.f32.mrf.mxu0 }
 0x7fa   :  { %v9215_v46 = vadd.f32 %v6045_v36, %v8991_v27 }
 0x7fb   :  { %v6047_v45 = vpop.f32.mrf.mxu0 }
 0x7fc   :  { %v6048_v10 = vadd.f32 %v6047_v45, %v6046_v15 }
 0x7fd   :  { %v6049_v8 = vpop.f32.mrf.mxu0 }
 0x7fe   :  { %v9218_v48 = vadd.f32 %v6048_v10, %v8994_v52 }
 0x7ff   :  { %v6050_v30 = vpop.f32.mrf.mxu0 }
 0x800   :  { %v6051_v6 = vadd.f32 %v6050_v30, %v6049_v8 }
 0x801   :  { %v6052_v44 = vpop.f32.mrf.mxu0 }
 0x802   :  { %v9221_v62 = vadd.f32 %v6051_v6, %v8997_v2 }
 0x803   :  { %v6053_v3 = vpop.f32.mrf.mxu0 }
 0x804   :  { %v6054_v22 = vadd.f32 %v6053_v3, %v6052_v44 }
 0x806   :  { %v9224_v31 = vadd.f32 %v6054_v22, %v9000_v16 }
 0x807   :  { %6569 = dma.done.wait [#allocation3 + $0x6], 2048 }
 0x808   :  { %6570 = vsyncadd [#allocation3 + $0x6], 4294965248  ;;  %v3881_v27 = vpack.c.bf16 %v9104_v57, %v9092_v7  ;;  %v6581_v33 = vmov 7   ;;  %v6499_v52 = vld [vmem:[#allocation2 + $0x378] sm:$0xff]   ;;  %v6501_v36 = vld [vmem:[#allocation2 + $0x370] sm:$0xff]  }
 0x809   :  { %6498 = vset.pattern.permute.xlu1 %v6581_v33  ;;  %6497 = vset.pattern.permute.xlu0 %v6581_v33  ;;  %v6500_v41 = vld [vmem:[#allocation2 + $0x338] sm:$0xff]   ;;  %v6502_v2 = vld [vmem:[#allocation2 + $0x330] sm:$0xff]   ;;  %v6503_v15 = vld [vmem:[#allocation2 + $0x368] sm:$0xff]  }
 0x80a   :  { %4056 = vmatprep.mubr.bf16.mxu1 %v3881_v27  ;;  %6055 = vmatprep.subr.bf16.mxu1 %v6499_v52  ;;  %v6504_v16 = vld [vmem:[#allocation2 + $0x328] sm:$0xff]   ;;  %v6505_v45 = vld [vmem:[#allocation2 + $0x360] sm:$0xff]   ;;  %v6507_v7 = vld [vmem:[#allocation2 + $0x358] sm:$0xff]  }
 0x80b   :  { %6056 = vmatpush3.bf16.msra.mxu1 %v6500_v41  ;;  %v6506_v10 = vld [vmem:[#allocation2 + $0x320] sm:$0xff]   ;;  %v6508_v57 = vld [vmem:[#allocation2 + $0x318] sm:$0xff]   ;;  %v6509_v8 = vld [vmem:[#allocation2 + $0x350] sm:$0xff]  }
 0x80c   :  { %6057 = vmatprep.subr.bf16.mxu1 %v6501_v36  ;;  %v4139_v30 = vld [vmem:[%s9848_s9 + $0x10] sm:$0xff]  ;;  %v4137_v6 = vld [vmem:[%s9848_s9] sm:$0xff]  ;;  %v4140_v44 = vld [vmem:[%s9848_s9 + $0x18] sm:$0xff] }
 0x80d   :  { %4165 = vperm.xlu1 %6498, %v4139_v30   ;;  %4155 = vperm.xlu0 %6497, %v4137_v6   ;;  %v4138_v3 = vld [vmem:[%s9848_s9 + $0x8] sm:$0xff]  ;;  %v6510_v22 = vld [vmem:[#allocation2 + $0x310] sm:$0xff]   ;;  %v4141_v52 = vld [vmem:[%s9848_s9 + $0x20] sm:$0xff]  ;;  %v3885_v30 = vpack.c.bf16 %v9110_v34, %v9116_v35  ;;  %v3887_v34 = vpack.c.bf16 %v9122_v60, %v9128_v17  ;;  %v3886_v35 = vpack.c.bf16 %v9119_v20, %v9125_v32 }
 0x80e   :  { %v6511_v27 = vld [vmem:[#allocation2 + $0x348] sm:$0xff]   ;;  %v6513_v36 = vld [vmem:[#allocation2 + $0x340] sm:$0xff]   ;;  %v4152_v6 = vld [vmem:[%s9848_s9 + $0x78] sm:$0xff]  ;;  %v3892_v20 = vpack.c.bf16 %v9155_v51, %v9161_v26  ;;  %v3895_v60 = vpack.c.bf16 %v9170_v39, %v9176_v12  ;;  %v3894_v32 = vpack.c.bf16 %v9167_v28, %v9173_v23 }
 0x80f   :  { %6058 = vmatpush3.bf16.msra.mxu1 %v6502_v2  ;;  %v4142_v33 = vld [vmem:[%s9848_s9 + $0x28] sm:$0xff]  ;;  %v4144_v2 = vld [vmem:[%s9848_s9 + $0x38] sm:$0xff]  ;;  %v10451_v28 = vld [vmem:[#allocation38_spill] sm:$0xff] }
 0x810   :  { %6059 = vmatprep.subr.bf16.mxu1 %v6503_v15  ;;  %v6512_v41 = vld [vmem:[#allocation2 + $0x308] sm:$0xff]   ;;  %v4143_v15 = vld [vmem:[%s9848_s9 + $0x30] sm:$0xff] }
 0x811   :  { %4170 = vperm.xlu1 %6498, %v4140_v44   ;;  %4160 = vperm.xlu0 %6497, %v4138_v3   ;;  %v3889_v44 = vpack.c.bf16 %v9134_v63, %v9140_v13  ;;  %v3888_v3 = vpack.c.bf16 %v9131_v19, %v9137_v47  ;;  %v10446_v63 = vld [vmem:[#allocation32_spill] sm:$0xff]  ;;  %v10447_v13 = vld [vmem:[#allocation34_spill] sm:$0xff]  ;;  %v10452_v12 = vld [vmem:[#allocation27_spill] sm:$0xff] }
 0x813   :  { %6060 = vmatpush3.bf16.msra.mxu1 %v6504_v16  ;;  %v6514_v16 = vld [vmem:[#allocation2 + $0x300] sm:$0xff]  }
 0x814   :  { %6061 = vmatprep.subr.bf16.mxu1 %v6505_v45  ;;  %v3880_v45 = vpack.c.bf16 %v9101_v14, %v9089_v40  ;;  %v4147_v40 = vld [vmem:[%s9848_s9 + $0x50] sm:$0xff]  ;;  %v3882_v14 = vpack.c.bf16 %v9095_v18, %v9083_v43  ;;  %v3884_v18 = vpack.c.bf16 %v9107_v0, %v9113_v61  ;;  %v3890_v0 = vpack.c.bf16 %v9143_v55, %v9149_v11 }
 0x815   :  { %4180 = vperm.xlu1 %6498, %v4142_v33   ;;  %4175 = vperm.xlu0 %6497, %v4141_v52   ;;  %v4151_v43 = vld [vmem:[%s9848_s9 + $0x70] sm:$0xff]  ;;  %v3893_v61 = vpack.c.bf16 %v9158_v42, %v9164_v58  ;;  %v10450_v58 = vld [vmem:[#allocation37_spill] sm:$0xff] }
 0x816   :  { %v10453_v33 = vld [vmem:[#allocation29_spill] sm:$0xff] }
 0x817   :  { %6062 = vmatpush3.bf16.msra.mxu1 %v6506_v10  ;;  %v4146_v10 = vld [vmem:[%s9848_s9 + $0x48] sm:$0xff] }
 0x818   :  { %6063 = vmatprep.subr.bf16.mxu1 %v6507_v7  ;;  %v4145_v7 = vld [vmem:[%s9848_s9 + $0x40] sm:$0xff] }
 0x819   :  { %4190 = vperm.xlu1 %6498, %v4144_v2   ;;  %4185 = vperm.xlu0 %6497, %v4143_v15   ;;  %v10454_v2 = vld [vmem:[#allocation44_spill] sm:$0xff] }
 0x81b   :  { %6064 = vmatpush3.bf16.msra.mxu1 %v6508_v57  ;;  %v3883_v57 = vpack.c.bf16 %v9098_v4, %v9086_v5  ;;  %v4150_v5 = vld [vmem:[%s9848_s9 + $0x68] sm:$0xff]  ;;  %v4149_v4 = vld [vmem:[%s9848_s9 + $0x60] sm:$0xff] }
 0x81c   :  { %6065 = vmatprep.subr.bf16.mxu1 %v6509_v8  ;;  %v4148_v8 = vld [vmem:[%s9848_s9 + $0x58] sm:$0xff] }
 0x81d   :  { %4200 = vperm.xlu1 %6498, %v4146_v10   ;;  %4195 = vperm.xlu0 %6497, %v4145_v7   ;;  %v10456_v10 = vld [vmem:[#allocation40_spill] sm:$0xff] }
 0x81f   :  { %6066 = vmatpush3.bf16.msra.mxu1 %v6510_v22  ;;  %v3891_v22 = vpack.c.bf16 %v9146_v56, %v9152_v50  ;;  %v10448_v56 = vld [vmem:[#allocation25_spill] sm:$0xff]  ;;  %v10449_v50 = vld [vmem:[#allocation26_spill] sm:$0xff] }
 0x820   :  { %6067 = vmatprep.subr.bf16.mxu1 %v6511_v27 }
 0x821   :  { %4210 = vperm.xlu1 %6498, %v4148_v8   ;;  %4205 = vperm.xlu0 %6497, %v4147_v40  }
 0x823   :  { %6068 = vmatpush3.bf16.msra.mxu1 %v6512_v41 }
 0x824   :  { %6069 = vmatprep.subr.bf16.mxu1 %v6513_v36 }
 0x825   :  { %4220 = vperm.xlu1 %6498, %v4150_v5   ;;  %4215 = vperm.xlu0 %6497, %v4149_v4   ;;  %v10458_v5 = vld [vmem:[#allocation52_spill] sm:$0xff] }
 0x827   :  { %6070 = vmatpush3.bf16.msra.mxu1 %v6514_v16  ;;  %v10455_v16 = vld [vmem:[#allocation47_spill] sm:$0xff] }
 0x829   :  { %4230 = vperm.xlu1 %6498, %v4152_v6   ;;  %4225 = vperm.xlu0 %6497, %v4151_v43   ;;  %v10460_v43 = vld [vmem:[#allocation49_spill] sm:$0xff] }
 0x82a   :  { %4057 = vmatmul.mubr.bf16.vlgmr.msra.gmra.mxu1 %v3880_v45 }
 0x82b   :  { %4064 = vmatprep.mubr.bf16.mxu1 %v3883_v57  ;;  %v10457_v57 = vld [vmem:[#allocation42_spill] sm:$0xff] }
 0x832   :  { %4065 = vmatmul.mubr.bf16.gmra.mxu1 %v3882_v14 }
 0x833   :  { %4072 = vmatprep.mubr.bf16.mxu1 %v3885_v30  ;;  %v10459_v30 = vld [vmem:[#allocation55_spill] sm:$0xff] }
 0x83a   :  { %4073 = vmatmul.mubr.bf16.gmra.mxu1 %v3884_v18 }
 0x83b   :  { %4080 = vmatprep.mubr.bf16.mxu1 %v3887_v34  ;;  %v10461_v34 = vld [vmem:[#allocation50_spill] sm:$0xff] }
 0x842   :  { %4081 = vmatmul.mubr.bf16.gmra.mxu1 %v3886_v35 }
 0x843   :  { %4088 = vmatprep.mubr.bf16.mxu1 %v3889_v44 }
 0x84a   :  { %4089 = vmatmul.mubr.bf16.gmra.mxu1 %v3888_v3 }
 0x84b   :  { %4096 = vmatprep.mubr.bf16.mxu1 %v3891_v22  ;;  %v10462_v22 = vld [vmem:[#allocation62_spill] sm:$0xff] }
 0x852   :  { %4097 = vmatmul.mubr.bf16.gmra.mxu1 %v3890_v0 }
 0x853   :  { %4104 = vmatprep.mubr.bf16.mxu1 %v3893_v61  ;;  %v10463_v61 = vld [vmem:[#allocation63_spill] sm:$0xff] }
 0x85a   :  { %4105 = vmatmul.mubr.bf16.gmra.mxu1 %v3892_v20 }
 0x85b   :  { %4112 = vmatprep.mubr.bf16.mxu1 %v3895_v60  ;;  %v10464_v60 = vld [vmem:[#allocation56_spill] sm:$0xff] }
 0x862   :  { %4113 = vmatmul.mubr.bf16.gmra.mxu1 %v3894_v32 }
 0x888   :  { %v4166_v17 = vpop.permute.xlu1 %4165  ;;  %v4156_v19 = vpop.permute.xlu0 %4155 }
 0x889   :  { %v9307_v47 = vmul.f32 %v4166_v17, %v10446_v63  ;;  %v9310_v55 = vmul.f32 %v4166_v17, %v10447_v13  ;;  %v9313_v11 = vmul.f32 %v4156_v19, %v10448_v56  ;;  %v9316_v51 = vmul.f32 %v4156_v19, %v10449_v50  ;;  %v10465_v17 = vld [vmem:[#allocation59_spill] sm:$0xff]  ;;  %v10466_v56 = vld [vmem:[#allocation70_spill] sm:$0xff] }
 0x88c   :  { %v4171_v42 = vpop.permute.xlu1 %4170  ;;  %v4161_v26 = vpop.permute.xlu0 %4160 }
 0x88d   :  { %v9319_v39 = vmul.f32 %v4171_v42, %v10450_v58  ;;  %v9322_v23 = vmul.f32 %v4171_v42, %v10451_v28  ;;  %v9325_v27 = vmul.f32 %v4161_v26, %v10452_v12  ;;  %v9328_v52 = vmul.f32 %v4161_v26, %v10453_v33  ;;  %v10467_v42 = vld [vmem:[#allocation75_spill] sm:$0xff]  ;;  %v10468_v58 = vld [vmem:[#allocation66_spill] sm:$0xff]  ;;  %v10469_v12 = vld [vmem:[#allocation69_spill] sm:$0xff] }
 0x890   :  { %v4181_v41 = vpop.permute.xlu1 %4180  ;;  %v4176_v36 = vpop.permute.xlu0 %4175 }
 0x891   :  { %v9331_v15 = vmul.f32 %v4181_v41, %v10454_v2  ;;  %v9334_v45 = vmul.f32 %v4181_v41, %v10455_v16  ;;  %v9337_v7 = vmul.f32 %v4176_v36, %v10456_v10  ;;  %v9340_v8 = vmul.f32 %v4176_v36, %v10457_v57  ;;  %v10470_v2 = vld [vmem:[#allocation83_spill] sm:$0xff]  ;;  %v10471_v10 = vld [vmem:[#allocation86_spill] sm:$0xff] }
 0x894   :  { %v4191_v40 = vpop.permute.xlu1 %4190  ;;  %v4186_v14 = vpop.permute.xlu0 %4185 }
 0x895   :  { %v9343_v4 = vmul.f32 %v4191_v40, %v10458_v5  ;;  %v9346_v6 = vmul.f32 %v4191_v40, %v10459_v30  ;;  %v9349_v18 = vmul.f32 %v4186_v14, %v10460_v43  ;;  %v9352_v35 = vmul.f32 %v4186_v14, %v10461_v34  ;;  %v10472_v40 = vld [vmem:[#allocation78_spill] sm:$0xff]  ;;  %v10473_v5 = vld [vmem:[#allocation79_spill] sm:$0xff] }
 0x898   :  { %v4201_v44 = vpop.permute.xlu1 %4200  ;;  %v4196_v3 = vpop.permute.xlu0 %4195 }
 0x899   :  { %v9355_v0 = vmul.f32 %v4201_v44, %v10462_v22  ;;  %v9358_v20 = vmul.f32 %v4201_v44, %v10463_v61  ;;  %v9361_v32 = vmul.f32 %v4196_v3, %v10464_v60  ;;  %v9364_v19 = vmul.f32 %v4196_v3, %v10465_v17  ;;  %v10474_v44 = vld [vmem:[#allocation23_spill] sm:$0xff]  ;;  %v10475_v22 = vld [vmem:[#allocation24_spill] sm:$0xff] }
 0x89a   :  { %v10476_v60 = vld [vmem:[#allocation88_spill] sm:$0xff] }
 0x89c   :  { %v4211_v63 = vpop.permute.xlu1 %4210  ;;  %v4206_v13 = vpop.permute.xlu0 %4205 }
 0x89d   :  { %v9367_v50 = vmul.f32 %v4211_v63, %v10466_v56  ;;  %v9370_v26 = vmul.f32 %v4211_v63, %v10467_v42  ;;  %v9373_v28 = vmul.f32 %v4206_v13, %v10468_v58  ;;  %v9376_v33 = vmul.f32 %v4206_v13, %v10469_v12  ;;  %v10477_v63 = vld [vmem:[#allocation93_spill] sm:$0xff] }
 0x8a0   :  { %v4221_v41 = vpop.permute.xlu1 %4220  ;;  %v4216_v36 = vpop.permute.xlu0 %4215 }
 0x8a1   :  { %v9379_v16 = vmul.f32 %v4221_v41, %v10470_v2  ;;  %v9382_v57 = vmul.f32 %v4221_v41, %v10471_v10  ;;  %v9385_v14 = vmul.f32 %v4216_v36, %v10472_v40  ;;  %v9388_v30 = vmul.f32 %v4216_v36, %v10473_v5 }
 0x8a4   :  { %v4231_v43 = vpop.permute.xlu1 %4230  ;;  %v4226_v34 = vpop.permute.xlu0 %4225 }
 0x8a5   :  { %v9391_v3 = vmul.f32 %v4231_v43, %v10474_v44  ;;  %v9394_v61 = vmul.f32 %v4231_v43, %v10475_v22  ;;  %v9397_v17 = vmul.f32 %v4226_v34, %v10476_v60  ;;  %v9400_v13 = vmul.f32 %v4226_v34, %v10477_v63 }
 0x8ea   :  { %v6071_v56 = vpop.f32.mrf.mxu1 }
 0x8ec   :  { %v6072_v42 = vpop.f32.mrf.mxu1 }
 0x8ed   :  { %v6073_v58 = vadd.f32 %v6072_v42, %v6071_v56 }
 0x8ee   :  { %v6074_v12 = vpop.f32.mrf.mxu1 }
 0x8ef   :  { %v9403_v41 = vadd.f32 %v6073_v58, %v9179_v24 }
 0x8f0   :  { %v6075_v36 = vpop.f32.mrf.mxu1 }
 0x8f1   :  { %v6076_v2 = vadd.f32 %v6075_v36, %v6074_v12 }
 0x8f2   :  { %v6077_v10 = vpop.f32.mrf.mxu1 }
 0x8f3   :  { %v9406_v40 = vadd.f32 %v6076_v2, %v9182_v29 }
 0x8f4   :  { %v6078_v5 = vpop.f32.mrf.mxu1 }
 0x8f5   :  { %v6079_v43 = vadd.f32 %v6078_v5, %v6077_v10 }
 0x8f6   :  { %v6080_v44 = vpop.f32.mrf.mxu1 }
 0x8f7   :  { %v9409_v22 = vadd.f32 %v6079_v43, %v9185_v21 }
 0x8f8   :  { %v6081_v34 = vpop.f32.mrf.mxu1 }
 0x8f9   :  { %v6082_v60 = vadd.f32 %v6081_v34, %v6080_v44 }
 0x8fa   :  { %v6083_v63 = vpop.f32.mrf.mxu1 }
 0x8fb   :  { %v9412_v56 = vadd.f32 %v6082_v60, %v9188_v37 }
 0x8fc   :  { %v6084_v24 = vpop.f32.mrf.mxu1 }
 0x8fd   :  { %v6085_v42 = vadd.f32 %v6084_v24, %v6083_v63 }
 0x8fe   :  { %v6086_v58 = vpop.f32.mrf.mxu1 }
 0x8ff   :  { %v9415_v12 = vadd.f32 %v6085_v42, %v9191_v38 }
 0x900   :  { %v6087_v29 = vpop.f32.mrf.mxu1 }
 0x901   :  { %v6088_v36 = vadd.f32 %v6087_v29, %v6086_v58 }
 0x902   :  { %v6089_v2 = vpop.f32.mrf.mxu1 }
 0x903   :  { %v9418_v10 = vadd.f32 %v6088_v36, %v9194_v25 }
 0x904   :  { %v6090_v21 = vpop.f32.mrf.mxu1 }
 0x905   :  { %v6091_v5 = vadd.f32 %v6090_v21, %v6089_v2 }
 0x906   :  { %v6092_v43 = vpop.f32.mrf.mxu1 }
 0x907   :  { %v9421_v44 = vadd.f32 %v6091_v5, %v9197_v9 }
 0x908   :  { %v6093_v37 = vpop.f32.mrf.mxu1 }
 0x909   :  { %v6094_v34 = vadd.f32 %v6093_v37, %v6092_v43 }
 0x90a   :  { %v6095_v60 = vpop.f32.mrf.mxu1 }
 0x90b   :  { %v9424_v63 = vadd.f32 %v6094_v34, %v9200_v49 }
 0x90c   :  { %v6096_v38 = vpop.f32.mrf.mxu1 }
 0x90d   :  { %v6097_v24 = vadd.f32 %v6096_v38, %v6095_v60 }
 0x90e   :  { %v6098_v42 = vpop.f32.mrf.mxu1 }
 0x90f   :  { %v9427_v58 = vadd.f32 %v6097_v24, %v9203_v1 }
 0x910   :  { %v6099_v25 = vpop.f32.mrf.mxu1 }
 0x911   :  { %v6100_v29 = vadd.f32 %v6099_v25, %v6098_v42 }
 0x912   :  { %v6101_v36 = vpop.f32.mrf.mxu1 }
 0x913   :  { %v9430_v2 = vadd.f32 %v6100_v29, %v9206_v59 }
 0x914   :  { %v6102_v9 = vpop.f32.mrf.mxu1 }
 0x915   :  { %v6103_v21 = vadd.f32 %v6102_v9, %v6101_v36 }
 0x916   :  { %v6104_v5 = vpop.f32.mrf.mxu1 }
 0x917   :  { %v9433_v43 = vadd.f32 %v6103_v21, %v9209_v54 }
 0x918   :  { %v6105_v49 = vpop.f32.mrf.mxu1 }
 0x919   :  { %v6106_v37 = vadd.f32 %v6105_v49, %v6104_v5 }
 0x91a   :  { %v6107_v34 = vpop.f32.mrf.mxu1 }
 0x91b   :  { %v9436_v60 = vadd.f32 %v6106_v37, %v9212_v53 }
 0x91c   :  { %v6108_v1 = vpop.f32.mrf.mxu1 }
 0x91d   :  { %v6109_v38 = vadd.f32 %v6108_v1, %v6107_v34 }
 0x91e   :  { %v6110_v24 = vpop.f32.mrf.mxu1 }
 0x91f   :  { %v9439_v42 = vadd.f32 %v6109_v38, %v9215_v46 }
 0x920   :  { %v6111_v59 = vpop.f32.mrf.mxu1 }
 0x921   :  { %v6112_v25 = vadd.f32 %v6111_v59, %v6110_v24 }
 0x922   :  { %v6113_v29 = vpop.f32.mrf.mxu1 }
 0x923   :  { %v9442_v36 = vadd.f32 %v6112_v25, %v9218_v48 }
 0x924   :  { %v6114_v54 = vpop.f32.mrf.mxu1 }
 0x925   :  { %v6115_v9 = vadd.f32 %v6114_v54, %v6113_v29 }
 0x926   :  { %v6116_v21 = vpop.f32.mrf.mxu1 }
 0x927   :  { %v9445_v5 = vadd.f32 %v6115_v9, %v9221_v62 }
 0x928   :  { %v6117_v53 = vpop.f32.mrf.mxu1 }
 0x929   :  { %v6118_v49 = vadd.f32 %v6117_v53, %v6116_v21 }
 0x92b   :  { %v9448_v37 = vadd.f32 %v6118_v49, %v9224_v31 }
 0x92c   :  { %6571 = dma.done.wait [#allocation3 + $0x7], 2048 }
 0x92d   :  { %6572 = vsyncadd [#allocation3 + $0x7], 4294965248  ;;  %v4268_v46 = vpack.c.bf16 %v9328_v52, %v9316_v51  ;;  %v6582_v34 = vmov 8   ;;  %v6517_v48 = vld [vmem:[#allocation2 + $0x3f8] sm:$0xff]   ;;  %v6519_v38 = vld [vmem:[#allocation2 + $0x3f0] sm:$0xff]  }
 0x92e   :  { %6516 = vset.pattern.permute.xlu1 %v6582_v34  ;;  %6515 = vset.pattern.permute.xlu0 %v6582_v34  ;;  %v6518_v1 = vld [vmem:[#allocation2 + $0x3b8] sm:$0xff]   ;;  %v6520_v62 = vld [vmem:[#allocation2 + $0x3b0] sm:$0xff]   ;;  %v6521_v24 = vld [vmem:[#allocation2 + $0x3e8] sm:$0xff]  }
 0x92f   :  { %4443 = vmatprep.mubr.bf16.mxu0 %v4268_v46  ;;  %6119 = vmatprep.subr.bf16.mxu0 %v6517_v48  ;;  %v6522_v31 = vld [vmem:[#allocation2 + $0x3a8] sm:$0xff]   ;;  %v6523_v59 = vld [vmem:[#allocation2 + $0x3e0] sm:$0xff]   ;;  %v6525_v51 = vld [vmem:[#allocation2 + $0x3d8] sm:$0xff]  }
 0x930   :  { %6120 = vmatpush3.bf16.msra.mxu0 %v6518_v1  ;;  %v6524_v25 = vld [vmem:[#allocation2 + $0x3a0] sm:$0xff]   ;;  %v6526_v52 = vld [vmem:[#allocation2 + $0x398] sm:$0xff]   ;;  %v6527_v29 = vld [vmem:[#allocation2 + $0x3d0] sm:$0xff]  }
 0x931   :  { %6121 = vmatprep.subr.bf16.mxu0 %v6519_v38  ;;  %v4526_v54 = vld [vmem:[%s9848_s9 + $0x10] sm:$0xff]  ;;  %v4524_v9 = vld [vmem:[%s9848_s9] sm:$0xff]  ;;  %v4527_v21 = vld [vmem:[%s9848_s9 + $0x18] sm:$0xff] }
 0x932   :  { %4552 = vperm.xlu1 %6516, %v4526_v54   ;;  %4542 = vperm.xlu0 %6515, %v4524_v9   ;;  %v4525_v53 = vld [vmem:[%s9848_s9 + $0x8] sm:$0xff]  ;;  %v6528_v49 = vld [vmem:[#allocation2 + $0x390] sm:$0xff]   ;;  %v4528_v48 = vld [vmem:[%s9848_s9 + $0x20] sm:$0xff]  ;;  %v4272_v54 = vpack.c.bf16 %v9334_v45, %v9340_v8  ;;  %v4274_v45 = vpack.c.bf16 %v9346_v6, %v9352_v35  ;;  %v4273_v8 = vpack.c.bf16 %v9343_v4, %v9349_v18 }
 0x933   :  { %v6529_v46 = vld [vmem:[#allocation2 + $0x3c8] sm:$0xff]   ;;  %v6531_v38 = vld [vmem:[#allocation2 + $0x3c0] sm:$0xff]   ;;  %v4539_v9 = vld [vmem:[%s9848_s9 + $0x78] sm:$0xff]  ;;  %v4279_v4 = vpack.c.bf16 %v9379_v16, %v9385_v14  ;;  %v4282_v6 = vpack.c.bf16 %v9394_v61, %v9400_v13  ;;  %v4281_v18 = vpack.c.bf16 %v9391_v3, %v9397_v17 }
 0x934   :  { %6122 = vmatpush3.bf16.msra.mxu0 %v6520_v62  ;;  %v4529_v34 = vld [vmem:[%s9848_s9 + $0x28] sm:$0xff]  ;;  %v4531_v62 = vld [vmem:[%s9848_s9 + $0x38] sm:$0xff]  ;;  %v10484_v13 = vld [vmem:[#allocation122_spill] sm:$0xff] }
 0x935   :  { %6123 = vmatprep.subr.bf16.mxu0 %v6521_v24  ;;  %v6530_v1 = vld [vmem:[#allocation2 + $0x388] sm:$0xff]   ;;  %v4530_v24 = vld [vmem:[%s9848_s9 + $0x30] sm:$0xff] }
 0x936   :  { %4557 = vperm.xlu1 %6516, %v4527_v21   ;;  %4547 = vperm.xlu0 %6515, %v4525_v53   ;;  %v4276_v21 = vpack.c.bf16 %v9358_v20, %v9364_v19  ;;  %v4275_v53 = vpack.c.bf16 %v9355_v0, %v9361_v32  ;;  %v10478_v20 = vld [vmem:[#allocation106_spill] sm:$0xff]  ;;  %v10479_v19 = vld [vmem:[#allocation119_spill] sm:$0xff] }
 0x937   :  { %v10483_v3 = vld [vmem:[#allocation107_spill] sm:$0xff] }
 0x938   :  { %6124 = vmatpush3.bf16.msra.mxu0 %v6522_v31  ;;  %v6532_v31 = vld [vmem:[#allocation2 + $0x380] sm:$0xff]  }
 0x939   :  { %6125 = vmatprep.subr.bf16.mxu0 %v6523_v59  ;;  %v4267_v59 = vpack.c.bf16 %v9325_v27, %v9313_v11  ;;  %v4534_v11 = vld [vmem:[%s9848_s9 + $0x50] sm:$0xff]  ;;  %v4269_v27 = vpack.c.bf16 %v9319_v39, %v9307_v47  ;;  %v4271_v39 = vpack.c.bf16 %v9331_v15, %v9337_v7  ;;  %v4277_v15 = vpack.c.bf16 %v9367_v50, %v9373_v28 }
 0x93a   :  { %4567 = vperm.xlu1 %6516, %v4529_v34   ;;  %4562 = vperm.xlu0 %6515, %v4528_v48   ;;  %v4538_v47 = vld [vmem:[%s9848_s9 + $0x70] sm:$0xff]  ;;  %v4280_v7 = vpack.c.bf16 %v9382_v57, %v9388_v30  ;;  %v10485_v34 = vld [vmem:[#allocation109_spill] sm:$0xff] }
 0x93b   :  { %v10482_v30 = vld [vmem:[#allocation120_spill] sm:$0xff] }
 0x93c   :  { %6126 = vmatpush3.bf16.msra.mxu0 %v6524_v25  ;;  %v4533_v25 = vld [vmem:[%s9848_s9 + $0x48] sm:$0xff] }
 0x93d   :  { %6127 = vmatprep.subr.bf16.mxu0 %v6525_v51  ;;  %v4532_v51 = vld [vmem:[%s9848_s9 + $0x40] sm:$0xff] }
 0x93e   :  { %4577 = vperm.xlu1 %6516, %v4531_v62   ;;  %4572 = vperm.xlu0 %6515, %v4530_v24   ;;  %v10486_v62 = vld [vmem:[#allocation118_spill] sm:$0xff] }
 0x940   :  { %6128 = vmatpush3.bf16.msra.mxu0 %v6526_v52  ;;  %v4270_v52 = vpack.c.bf16 %v9322_v23, %v9310_v55  ;;  %v4537_v55 = vld [vmem:[%s9848_s9 + $0x68] sm:$0xff]  ;;  %v4536_v23 = vld [vmem:[%s9848_s9 + $0x60] sm:$0xff] }
 0x941   :  { %6129 = vmatprep.subr.bf16.mxu0 %v6527_v29  ;;  %v4535_v29 = vld [vmem:[%s9848_s9 + $0x58] sm:$0xff] }
 0x942   :  { %4587 = vperm.xlu1 %6516, %v4533_v25   ;;  %4582 = vperm.xlu0 %6515, %v4532_v51   ;;  %v10488_v25 = vld [vmem:[#allocation104_spill] sm:$0xff] }
 0x944   :  { %6130 = vmatpush3.bf16.msra.mxu0 %v6528_v49  ;;  %v4278_v49 = vpack.c.bf16 %v9370_v26, %v9376_v33  ;;  %v10480_v26 = vld [vmem:[#allocation124_spill] sm:$0xff]  ;;  %v10481_v33 = vld [vmem:[#allocation111_spill] sm:$0xff] }
 0x945   :  { %6131 = vmatprep.subr.bf16.mxu0 %v6529_v46 }
 0x946   :  { %4597 = vperm.xlu1 %6516, %v4535_v29   ;;  %4592 = vperm.xlu0 %6515, %v4534_v11  }
 0x948   :  { %6132 = vmatpush3.bf16.msra.mxu0 %v6530_v1 }
 0x949   :  { %6133 = vmatprep.subr.bf16.mxu0 %v6531_v38 }
 0x94a   :  { %4607 = vperm.xlu1 %6516, %v4537_v55   ;;  %4602 = vperm.xlu0 %6515, %v4536_v23   ;;  %v10490_v55 = vld [vmem:[#allocation116_spill] sm:$0xff] }
 0x94c   :  { %6134 = vmatpush3.bf16.msra.mxu0 %v6532_v31  ;;  %v10487_v31 = vld [vmem:[#allocation105_spill] sm:$0xff] }
 0x94e   :  { %4617 = vperm.xlu1 %6516, %v4539_v9   ;;  %4612 = vperm.xlu0 %6515, %v4538_v47   ;;  %v10492_v47 = vld [vmem:[#allocation102_spill] sm:$0xff] }
 0x94f   :  { %4444 = vmatmul.mubr.bf16.vlgmr.msra.gmra.mxu0 %v4267_v59 }
 0x950   :  { %4451 = vmatprep.mubr.bf16.mxu0 %v4270_v52  ;;  %v10489_v52 = vld [vmem:[#allocation117_spill] sm:$0xff] }
 0x957   :  { %4452 = vmatmul.mubr.bf16.gmra.mxu0 %v4269_v27 }
 0x958   :  { %4459 = vmatprep.mubr.bf16.mxu0 %v4272_v54  ;;  %v10491_v54 = vld [vmem:[#allocation103_spill] sm:$0xff] }
 0x95f   :  { %4460 = vmatmul.mubr.bf16.gmra.mxu0 %v4271_v39 }
 0x960   :  { %4467 = vmatprep.mubr.bf16.mxu0 %v4274_v45  ;;  %v10493_v45 = vld [vmem:[#allocation115_spill] sm:$0xff] }
 0x967   :  { %4468 = vmatmul.mubr.bf16.gmra.mxu0 %v4273_v8 }
 0x968   :  { %4475 = vmatprep.mubr.bf16.mxu0 %v4276_v21 }
 0x96f   :  { %4476 = vmatmul.mubr.bf16.gmra.mxu0 %v4275_v53 }
 0x970   :  { %4483 = vmatprep.mubr.bf16.mxu0 %v4278_v49  ;;  %v10494_v49 = vld [vmem:[#allocation114_spill] sm:$0xff] }
 0x977   :  { %4484 = vmatmul.mubr.bf16.gmra.mxu0 %v4277_v15 }
 0x978   :  { %4491 = vmatprep.mubr.bf16.mxu0 %v4280_v7  ;;  %v10495_v7 = vld [vmem:[#allocation101_spill] sm:$0xff] }
 0x97f   :  { %4492 = vmatmul.mubr.bf16.gmra.mxu0 %v4279_v4 }
 0x980   :  { %4499 = vmatprep.mubr.bf16.mxu0 %v4282_v6  ;;  %v10496_v6 = vld [vmem:[#allocation100_spill] sm:$0xff] }
 0x987   :  { %4500 = vmatmul.mubr.bf16.gmra.mxu0 %v4281_v18 }
 0x9ad   :  { %v4553_v35 = vpop.permute.xlu1 %4552  ;;  %v4543_v0 = vpop.permute.xlu0 %4542 }
 0x9ae   :  { %v9531_v32 = vmul.f32 %v4553_v35, %v10478_v20  ;;  %v9534_v50 = vmul.f32 %v4553_v35, %v10479_v19  ;;  %v9537_v28 = vmul.f32 %v4543_v0, %v10480_v26  ;;  %v9540_v16 = vmul.f32 %v4543_v0, %v10481_v33  ;;  %v10497_v35 = vld [vmem:[#allocation113_spill] sm:$0xff]  ;;  %v10498_v26 = vld [vmem:[#allocation112_spill] sm:$0xff] }
 0x9b1   :  { %v4558_v57 = vpop.permute.xlu1 %4557  ;;  %v4548_v14 = vpop.permute.xlu0 %4547 }
 0x9b2   :  { %v9543_v61 = vmul.f32 %v4558_v57, %v10482_v30  ;;  %v9546_v17 = vmul.f32 %v4558_v57, %v10483_v3  ;;  %v9549_v46 = vmul.f32 %v4548_v14, %v10484_v13  ;;  %v9552_v48 = vmul.f32 %v4548_v14, %v10485_v34  ;;  %v10499_v57 = vld [vmem:[#allocation99_spill] sm:$0xff]  ;;  %v10500_v30 = vld [vmem:[#allocation98_spill] sm:$0xff] }
 0x9b3   :  { %v10501_v13 = vld [vmem:[#allocation31_spill] sm:$0xff] }
 0x9b5   :  { %v4568_v1 = vpop.permute.xlu1 %4567  ;;  %v4563_v38 = vpop.permute.xlu0 %4562 }
 0x9b6   :  { %v9555_v24 = vmul.f32 %v4568_v1, %v10486_v62  ;;  %v9558_v59 = vmul.f32 %v4568_v1, %v10487_v31  ;;  %v9561_v51 = vmul.f32 %v4563_v38, %v10488_v25  ;;  %v9564_v29 = vmul.f32 %v4563_v38, %v10489_v52  ;;  %v10502_v62 = vld [vmem:[#allocation125_spill] sm:$0xff]  ;;  %v10503_v25 = vld [vmem:[#allocation127_spill] sm:$0xff] }
 0x9b9   :  { %v4578_v11 = vpop.permute.xlu1 %4577  ;;  %v4573_v27 = vpop.permute.xlu0 %4572 }
 0x9ba   :  { %v9567_v23 = vmul.f32 %v4578_v11, %v10490_v55  ;;  %v9570_v9 = vmul.f32 %v4578_v11, %v10491_v54  ;;  %v9573_v39 = vmul.f32 %v4573_v27, %v10492_v47  ;;  %v9576_v8 = vmul.f32 %v4573_v27, %v10493_v45  ;;  %v10504_v11 = vld [vmem:[#allocation67_spill] sm:$0xff]  ;;  %v10505_v55 = vld [vmem:[#allocation61_spill] sm:$0xff] }
 0x9bd   :  { %v4588_v21 = vpop.permute.xlu1 %4587  ;;  %v4583_v53 = vpop.permute.xlu0 %4582 }
 0x9be   :  { %v9579_v15 = vmul.f32 %v4588_v21, %v10494_v49  ;;  %v9582_v4 = vmul.f32 %v4588_v21, %v10495_v7  ;;  %v9585_v18 = vmul.f32 %v4583_v53, %v10496_v6  ;;  %v9588_v0 = vmul.f32 %v4583_v53, %v10497_v35  ;;  %v10506_v21 = vld [vmem:[#allocation108_spill] sm:$0xff]  ;;  %v10507_v49 = vld [vmem:[#allocation121_spill] sm:$0xff]  ;;  %v10508_v6 = vld [vmem:[#allocation110_spill] sm:$0xff] }
 0x9c1   :  { %v4598_v20 = vpop.permute.xlu1 %4597  ;;  %v4593_v19 = vpop.permute.xlu0 %4592 }
 0x9c2   :  { %v9591_v33 = vmul.f32 %v4598_v20, %v10498_v26  ;;  %v9594_v14 = vmul.f32 %v4598_v20, %v10499_v57  ;;  %v9597_v3 = vmul.f32 %v4593_v19, %v10500_v30  ;;  %v9600_v34 = vmul.f32 %v4593_v19, %v10501_v13  ;;  %v10509_v20 = vld [vmem:[#allocation123_spill] sm:$0xff] }
 0x9c5   :  { %v4608_v1 = vpop.permute.xlu1 %4607  ;;  %v4603_v38 = vpop.permute.xlu0 %4602 }
 0x9c6   :  { %v9603_v31 = vmul.f32 %v4608_v1, %v10502_v62  ;;  %v9606_v52 = vmul.f32 %v4608_v1, %v10503_v25  ;;  %v9609_v27 = vmul.f32 %v4603_v38, %v10504_v11  ;;  %v9612_v54 = vmul.f32 %v4603_v38, %v10505_v55 }
 0x9c9   :  { %v4618_v47 = vpop.permute.xlu1 %4617  ;;  %v4613_v45 = vpop.permute.xlu0 %4612 }
 0x9ca   :  { %v9615_v53 = vmul.f32 %v4618_v47, %v10506_v21  ;;  %v9618_v7 = vmul.f32 %v4618_v47, %v10507_v49  ;;  %v9621_v35 = vmul.f32 %v4613_v45, %v10508_v6  ;;  %v9624_v19 = vmul.f32 %v4613_v45, %v10509_v20 }
 0xa0f   :  { %v6135_v26 = vpop.f32.mrf.mxu0 }
 0xa11   :  { %v6136_v57 = vpop.f32.mrf.mxu0 }
 0xa12   :  { %v6137_v30 = vadd.f32 %v6136_v57, %v6135_v26 }
 0xa13   :  { %v6138_v13 = vpop.f32.mrf.mxu0 }
 0xa14   :  { %v9627_v1 = vadd.f32 %v6137_v30, %v9403_v41 }
 0xa15   :  { %v6139_v38 = vpop.f32.mrf.mxu0 }
 0xa16   :  { %v6140_v62 = vadd.f32 %v6139_v38, %v6138_v13 }
 0xa17   :  { %v6141_v25 = vpop.f32.mrf.mxu0 }
 0xa18   :  { %v9630_v11 = vadd.f32 %v6140_v62, %v9406_v40 }
 0xa19   :  { %v6142_v55 = vpop.f32.mrf.mxu0 }
 0xa1a   :  { %v6143_v47 = vadd.f32 %v6142_v55, %v6141_v25 }
 0xa1b   :  { %v6144_v21 = vpop.f32.mrf.mxu0 }
 0xa1c   :  { %v9633_v49 = vadd.f32 %v6143_v47, %v9409_v22 }
 0xa1d   :  { %v6145_v45 = vpop.f32.mrf.mxu0 }
 0xa1e   :  { %v6146_v6 = vadd.f32 %v6145_v45, %v6144_v21 }
 0xa1f   :  { %v6147_v20 = vpop.f32.mrf.mxu0 }
 0xa20   :  { %v9636_v26 = vadd.f32 %v6146_v6, %v9412_v56 }
 0xa21   :  { %v6148_v41 = vpop.f32.mrf.mxu0 }
 0xa22   :  { %v6149_v57 = vadd.f32 %v6148_v41, %v6147_v20 }
 0xa23   :  { %v6150_v30 = vpop.f32.mrf.mxu0 }
 0xa24   :  { %v9639_v13 = vadd.f32 %v6149_v57, %v9415_v12 }
 0xa25   :  { %v6151_v40 = vpop.f32.mrf.mxu0 }
 0xa26   :  { %v6152_v38 = vadd.f32 %v6151_v40, %v6150_v30 }
 0xa27   :  { %v6153_v62 = vpop.f32.mrf.mxu0 }
 0xa28   :  { %v9642_v25 = vadd.f32 %v6152_v38, %v9418_v10 }
 0xa29   :  { %v6154_v22 = vpop.f32.mrf.mxu0 }
 0xa2a   :  { %v6155_v55 = vadd.f32 %v6154_v22, %v6153_v62 }
 0xa2b   :  { %v6156_v47 = vpop.f32.mrf.mxu0 }
 0xa2c   :  { %v9645_v21 = vadd.f32 %v6155_v55, %v9421_v44 }
 0xa2d   :  { %v6157_v56 = vpop.f32.mrf.mxu0 }
 0xa2e   :  { %v6158_v45 = vadd.f32 %v6157_v56, %v6156_v47 }
 0xa2f   :  { %v6159_v6 = vpop.f32.mrf.mxu0 }
 0xa30   :  { %v9648_v20 = vadd.f32 %v6158_v45, %v9424_v63 }
 0xa31   :  { %v6160_v12 = vpop.f32.mrf.mxu0 }
 0xa32   :  { %v6161_v41 = vadd.f32 %v6160_v12, %v6159_v6 }
 0xa33   :  { %v6162_v57 = vpop.f32.mrf.mxu0 }
 0xa34   :  { %v9651_v30 = vadd.f32 %v6161_v41, %v9427_v58 }
 0xa35   :  { %v6163_v10 = vpop.f32.mrf.mxu0 }
 0xa36   :  { %v6164_v40 = vadd.f32 %v6163_v10, %v6162_v57 }
 0xa37   :  { %v6165_v38 = vpop.f32.mrf.mxu0 }
 0xa38   :  { %v9654_v62 = vadd.f32 %v6164_v40, %v9430_v2 }
 0xa39   :  { %v6166_v44 = vpop.f32.mrf.mxu0 }
 0xa3a   :  { %v6167_v22 = vadd.f32 %v6166_v44, %v6165_v38 }
 0xa3b   :  { %v6168_v55 = vpop.f32.mrf.mxu0 }
 0xa3c   :  { %v9657_v47 = vadd.f32 %v6167_v22, %v9433_v43 }
 0xa3d   :  { %v6169_v63 = vpop.f32.mrf.mxu0 }
 0xa3e   :  { %v6170_v56 = vadd.f32 %v6169_v63, %v6168_v55 }
 0xa3f   :  { %v6171_v45 = vpop.f32.mrf.mxu0 }
 0xa40   :  { %v9660_v6 = vadd.f32 %v6170_v56, %v9436_v60 }
 0xa41   :  { %v6172_v58 = vpop.f32.mrf.mxu0 }
 0xa42   :  { %v6173_v12 = vadd.f32 %v6172_v58, %v6171_v45 }
 0xa43   :  { %v6174_v41 = vpop.f32.mrf.mxu0 }
 0xa44   :  { %v9663_v57 = vadd.f32 %v6173_v12, %v9439_v42 }
 0xa45   :  { %v6175_v2 = vpop.f32.mrf.mxu0 }
 0xa46   :  { %v6176_v10 = vadd.f32 %v6175_v2, %v6174_v41 }
 0xa47   :  { %v6177_v40 = vpop.f32.mrf.mxu0 }
 0xa48   :  { %v9666_v38 = vadd.f32 %v6176_v10, %v9442_v36 }
 0xa49   :  { %v6178_v43 = vpop.f32.mrf.mxu0 }
 0xa4a   :  { %v6179_v44 = vadd.f32 %v6178_v43, %v6177_v40 }
 0xa4b   :  { %v6180_v22 = vpop.f32.mrf.mxu0 }
 0xa4c   :  { %v9669_v55 = vadd.f32 %v6179_v44, %v9445_v5 }
 0xa4d   :  { %v6181_v60 = vpop.f32.mrf.mxu0 }
 0xa4e   :  { %v6182_v63 = vadd.f32 %v6181_v60, %v6180_v22 }
 0xa50   :  { %v9672_v56 = vadd.f32 %v6182_v63, %v9448_v37 }
 0xa51   :  { %6573 = dma.done.wait [#allocation3 + $0x8], 2048 }
 0xa52   :  { %6574 = vsyncadd [#allocation3 + $0x8], 4294965248  ;;  %v4655_v42 = vpack.c.bf16 %v9552_v48, %v9540_v16  ;;  %v6533_v45 = vld [vmem:[#allocation2 + $0x478] sm:$0xff]   ;;  %v6535_v58 = vld [vmem:[#allocation2 + $0x470] sm:$0xff]  }
 0xa53   :  { %v6534_v36 = vld [vmem:[#allocation2 + $0x438] sm:$0xff]   ;;  %6183 = vmatprep.subr.bf16.mxu1 %v6533_v45  ;;  %v6536_v12 = vld [vmem:[#allocation2 + $0x430] sm:$0xff]   ;;  %v6537_v5 = vld [vmem:[#allocation2 + $0x468] sm:$0xff]   ;;  %v4654_v45 = vpack.c.bf16 %v9549_v46, %v9537_v28  ;;  %v4658_v28 = vpack.c.bf16 %v9555_v24, %v9561_v51  ;;  %v4665_v46 = vpack.c.bf16 %v9594_v14, %v9600_v34  ;;  %v4664_v24 = vpack.c.bf16 %v9591_v33, %v9597_v3 }
 0xa54   :  { %4830 = vmatprep.mubr.bf16.mxu1 %v4655_v42  ;;  %6184 = vmatpush3.bf16.msra.mxu1 %v6534_v36  ;;  %v6538_v41 = vld [vmem:[#allocation2 + $0x428] sm:$0xff]   ;;  %v6539_v2 = vld [vmem:[#allocation2 + $0x460] sm:$0xff]   ;;  %v6541_v10 = vld [vmem:[#allocation2 + $0x458] sm:$0xff]   ;;  %v4657_v36 = vpack.c.bf16 %v9546_v17, %v9534_v50  ;;  %v4661_v50 = vpack.c.bf16 %v9570_v9, %v9576_v8  ;;  %v4660_v17 = vpack.c.bf16 %v9567_v23, %v9573_v39 }
 0xa55   :  { %6185 = vmatprep.subr.bf16.mxu1 %v6535_v58  ;;  %v6540_v37 = vld [vmem:[#allocation2 + $0x420] sm:$0xff]   ;;  %v6542_v40 = vld [vmem:[#allocation2 + $0x418] sm:$0xff]   ;;  %v6543_v16 = vld [vmem:[#allocation2 + $0x450] sm:$0xff]   ;;  %v4656_v58 = vpack.c.bf16 %v9543_v61, %v9531_v32  ;;  %v4663_v32 = vpack.c.bf16 %v9582_v4, %v9588_v0  ;;  %v4662_v61 = vpack.c.bf16 %v9579_v15, %v9585_v18  ;;  %v4666_v51 = vpack.c.bf16 %v9603_v31, %v9609_v27 }
 0xa56   :  { %v6549_v48 = vld [vmem:[%s9846_s7 + $0x38] sm:$0xff]   ;;  %v6544_v43 = vld [vmem:[#allocation2 + $0x410] sm:$0xff]   ;;  %v6545_v22 = vld [vmem:[#allocation2 + $0x448] sm:$0xff]   ;;  %v4668_v23 = vpack.c.bf16 %v9615_v53, %v9621_v35 }
 0xa57   :  { %v6550_v44 = vld [vmem:[%s9846_s7 + $0x30] sm:$0xff]   ;;  %6263 = vmatprep.subr.bf16.mxu0 %v6549_v48  ;;  %v6546_v60 = vld [vmem:[#allocation2 + $0x408] sm:$0xff]   ;;  %v6547_v63 = vld [vmem:[#allocation2 + $0x440] sm:$0xff]  }
 0xa58   :  { %6186 = vmatpush3.bf16.msra.mxu1 %v6536_v12  ;;  %6264 = vmatpush3.bf16.msra.mxu0 %v6549_v48  ;;  %v6548_v42 = vld [vmem:[#allocation2 + $0x400] sm:$0xff]   ;;  %v4659_v12 = vpack.c.bf16 %v9558_v59, %v9564_v29  ;;  %v4667_v59 = vpack.c.bf16 %v9606_v52, %v9612_v54  ;;  %v4669_v29 = vpack.c.bf16 %v9618_v7, %v9624_v19  ;;  %v6551_v9 = vld [vmem:[%s9846_s7 + $0x28] sm:$0xff]   ;;  %v6553_v8 = vld [vmem:[%s9846_s7 + $0x18] sm:$0xff]  }
 0xa59   :  { %6187 = vmatprep.subr.bf16.mxu1 %v6537_v5  ;;  %6265 = vmatprep.subr.bf16.mxu0 %v6550_v44  ;;  %v6552_v39 = vld [vmem:[%s9846_s7 + $0x20] sm:$0xff]   ;;  %v6554_v15 = vld [vmem:[%s9846_s7 + $0x10] sm:$0xff]   ;;  %v6555_v4 = vld [vmem:[%s9846_s7 + $0x8] sm:$0xff]  }
 0xa5a   :  { %v6556_v18 = vld [vmem:[%s9846_s7] sm:$0xff]  }
 0xa5b   :  { %v9733_v3 = vld [vmem:[%s9844_s5] ss:$0 sm:$0xff] }
 0xa5c   :  { %6188 = vmatpush3.bf16.msra.mxu1 %v6538_v41  ;;  %6266 = vmatpush3.bf16.msra.mxu0 %v6550_v44  ;;  %v9740_v7 = vld [vmem:[%s9845_s6] ss:$0 sm:$0xff] }
 0xa5d   :  { %6189 = vmatprep.subr.bf16.mxu1 %v6539_v2  ;;  %6267 = vmatprep.subr.bf16.mxu0 %v6551_v9 }
 0xa60   :  { %6190 = vmatpush3.bf16.msra.mxu1 %v6540_v37  ;;  %6268 = vmatpush3.bf16.msra.mxu0 %v6551_v9 }
 0xa61   :  { %6191 = vmatprep.subr.bf16.mxu1 %v6541_v10  ;;  %6269 = vmatprep.subr.bf16.mxu0 %v6552_v39 }
 0xa64   :  { %6192 = vmatpush3.bf16.msra.mxu1 %v6542_v40  ;;  %6270 = vmatpush3.bf16.msra.mxu0 %v6552_v39 }
 0xa65   :  { %6193 = vmatprep.subr.bf16.mxu1 %v6543_v16  ;;  %6271 = vmatprep.subr.bf16.mxu0 %v6553_v8 }
 0xa68   :  { %6194 = vmatpush3.bf16.msra.mxu1 %v6544_v43  ;;  %6272 = vmatpush3.bf16.msra.mxu0 %v6553_v8 }
 0xa69   :  { %6195 = vmatprep.subr.bf16.mxu1 %v6545_v22  ;;  %6273 = vmatprep.subr.bf16.mxu0 %v6554_v15 }
 0xa6c   :  { %6196 = vmatpush3.bf16.msra.mxu1 %v6546_v60  ;;  %6274 = vmatpush3.bf16.msra.mxu0 %v6554_v15 }
 0xa6d   :  { %6197 = vmatprep.subr.bf16.mxu1 %v6547_v63  ;;  %6275 = vmatprep.subr.bf16.mxu0 %v6555_v4 }
 0xa70   :  { %6198 = vmatpush3.bf16.msra.mxu1 %v6548_v42  ;;  %6276 = vmatpush3.bf16.msra.mxu0 %v6555_v4 }
 0xa71   :  { %6295 = vmatprep.subr.bf16.mxu1 %v6549_v48  ;;  %6277 = vmatprep.subr.bf16.mxu0 %v6556_v18 }
 0xa73   :  { %4831 = vmatmul.mubr.bf16.vlgmr.msra.gmra.mxu1 %v4654_v45 }
 0xa74   :  { %4838 = vmatprep.mubr.bf16.mxu1 %v4657_v36  ;;  %6303 = vmatpush3.bf16.msra.mxu1 %v6549_v48 }
 0xa75   :  { %6296 = vmatprep.subr.bf16.mxu1 %v6550_v44  ;;  %6278 = vmatpush3.bf16.msra.mxu0 %v6556_v18 }
 0xa78   :  { %6304 = vmatpush3.bf16.msra.mxu1 %v6550_v44 }
 0xa79   :  { %6297 = vmatprep.subr.bf16.mxu1 %v6551_v9 }
 0xa7b   :  { %4839 = vmatmul.mubr.bf16.gmra.mxu1 %v4656_v58 }
 0xa7c   :  { %4846 = vmatprep.mubr.bf16.mxu1 %v4659_v12  ;;  %6305 = vmatpush3.bf16.msra.mxu1 %v6551_v9 }
 0xa7d   :  { %6298 = vmatprep.subr.bf16.mxu1 %v6552_v39 }
 0xa80   :  { %6306 = vmatpush3.bf16.msra.mxu1 %v6552_v39 }
 0xa81   :  { %6299 = vmatprep.subr.bf16.mxu1 %v6553_v8 }
 0xa83   :  { %4847 = vmatmul.mubr.bf16.gmra.mxu1 %v4658_v28 }
 0xa84   :  { %4854 = vmatprep.mubr.bf16.mxu1 %v4661_v50  ;;  %6307 = vmatpush3.bf16.msra.mxu1 %v6553_v8 }
 0xa85   :  { %6300 = vmatprep.subr.bf16.mxu1 %v6554_v15 }
 0xa88   :  { %6308 = vmatpush3.bf16.msra.mxu1 %v6554_v15 }
 0xa89   :  { %6301 = vmatprep.subr.bf16.mxu1 %v6555_v4 }
 0xa8b   :  { %4855 = vmatmul.mubr.bf16.gmra.mxu1 %v4660_v17 }
 0xa8c   :  { %4862 = vmatprep.mubr.bf16.mxu1 %v4663_v32  ;;  %6309 = vmatpush3.bf16.msra.mxu1 %v6555_v4 }
 0xa8d   :  { %6302 = vmatprep.subr.bf16.mxu1 %v6556_v18 }
 0xa90   :  { %6310 = vmatpush3.bf16.msra.mxu1 %v6556_v18 }
 0xa93   :  { %4863 = vmatmul.mubr.bf16.gmra.mxu1 %v4662_v61 }
 0xa94   :  { %4870 = vmatprep.mubr.bf16.mxu1 %v4665_v46 }
 0xa9b   :  { %4871 = vmatmul.mubr.bf16.gmra.mxu1 %v4664_v24 }
 0xa9c   :  { %4878 = vmatprep.mubr.bf16.mxu1 %v4667_v59 }
 0xaa3   :  { %4879 = vmatmul.mubr.bf16.gmra.mxu1 %v4666_v51 }
 0xaa4   :  { %4886 = vmatprep.mubr.bf16.mxu1 %v4669_v29 }
 0xaab   :  { %4887 = vmatmul.mubr.bf16.gmra.mxu1 %v4668_v23 }
 0xb33   :  { %v6199_v0 = vpop.f32.mrf.mxu1 }
 0xb35   :  { %v6200_v33 = vpop.f32.mrf.mxu1 }
 0xb36   :  { %v6201_v14 = vadd.f32 %v6200_v33, %v6199_v0 }
 0xb37   :  { %v6202_v34 = vpop.f32.mrf.mxu1 }
 0xb38   :  { %v4895_v31 = vadd.f32 %v6201_v14, %v9627_v1 }
 0xb39   :  { %v6203_v52 = vpop.f32.mrf.mxu1 }
 0xb3a   :  { %v4918_v27 = vmul.f32 %v9733_v3, %v4895_v31  ;;  %v6204_v54 = vadd.f32 %v6203_v52, %v6202_v34 }
 0xb3b   :  { %v6205_v53 = vpop.f32.mrf.mxu1 }
 0xb3c   :  { %v4896_v35 = vadd.f32 %v6204_v54, %v9630_v11  ;;  %v4941_v2 = vadd.f32 %v9740_v7, %v4918_v27 }
 0xb3d   :  { %v6206_v19 = vpop.f32.mrf.mxu1 }
 0xb3e   :  { %v4919_v5 = vmul.f32 %v9733_v3, %v4896_v35  ;;  %v6207_v41 = vadd.f32 %v6206_v19, %v6205_v53  ;;  %v4957_v43 = vmax.f32 %v4941_v2, 0.0 }
 0xb3f   :  { %v6208_v37 = vpop.f32.mrf.mxu1 }
 0xb40   :  { %v4897_v1 = vadd.f32 %v6207_v41, %v9633_v49  ;;  %v4942_v10 = vadd.f32 %v9740_v7, %v4919_v5 }
 0xb41   :  { %v6209_v40 = vpop.f32.mrf.mxu1 }
 0xb42   :  { %v4920_v16 = vmul.f32 %v9733_v3, %v4897_v1  ;;  %v6210_v48 = vadd.f32 %v6209_v40, %v6208_v37  ;;  %v4958_v44 = vmax.f32 %v4942_v10, 0.0 }
 0xb43   :  { %v6211_v22 = vpop.f32.mrf.mxu1 }
 0xb44   :  { %v4898_v11 = vadd.f32 %v6210_v48, %v9636_v26  ;;  %v4973_v60 = vpack.c.bf16 %v4958_v44, %v4957_v43  ;;  %v4943_v42 = vadd.f32 %v9740_v7, %v4920_v16 }
 0xb45   :  { %v6212_v63 = vpop.f32.mrf.mxu1 }
 0xb46   :  { %v4921_v45 = vmul.f32 %v9733_v3, %v4898_v11  ;;  %v6213_v36 = vadd.f32 %v6212_v63, %v6211_v22  ;;  %6279 = vmatprep.mubr.bf16.mxu0 %v4973_v60  ;;  %v4959_v50 = vmax.f32 %v4943_v42, 0.0 }
 0xb47   :  { %v6214_v49 = vpop.f32.mrf.mxu1 }
 0xb48   :  { %v4944_v58 = vadd.f32 %v9740_v7, %v4921_v45  ;;  %v4899_v12 = vadd.f32 %v6213_v36, %v9639_v13 }
 0xb49   :  { %v6215_v28 = vpop.f32.mrf.mxu1 }
 0xb4a   :  { %v4960_v17 = vmax.f32 %v4944_v58, 0.0  ;;  %v4922_v32 = vmul.f32 %v9733_v3, %v4899_v12  ;;  %v6216_v61 = vadd.f32 %v6215_v28, %v6214_v49 }
 0xb4b   :  { %v6217_v26 = vpop.f32.mrf.mxu1 }
 0xb4c   :  { %v4900_v46 = vadd.f32 %v6216_v61, %v9642_v25  ;;  %v4974_v24 = vpack.c.bf16 %v4960_v17, %v4959_v50  ;;  %v4945_v51 = vadd.f32 %v9740_v7, %v4922_v32 }
 0xb4d   :  { %v6218_v59 = vpop.f32.mrf.mxu1 }
 0xb4e   :  { %v4923_v29 = vmul.f32 %v9733_v3, %v4900_v46  ;;  %v6219_v23 = vadd.f32 %v6218_v59, %v6217_v26  ;;  %6280 = vmatmul.mubr.bf16.vlgmr.msra.gmra.mxu0 %v4974_v24  ;;  %v4961_v15 = vmax.f32 %v4945_v51, 0.0 }
 0xb4f   :  { %v6220_v9 = vpop.f32.mrf.mxu1 }
 0xb50   :  { %v4946_v13 = vadd.f32 %v9740_v7, %v4923_v29  ;;  %v4901_v39 = vadd.f32 %v6219_v23, %v9645_v21 }
 0xb51   :  { %v6221_v8 = vpop.f32.mrf.mxu1 }
 0xb52   :  { %v4962_v4 = vmax.f32 %v4946_v13, 0.0  ;;  %v4924_v18 = vmul.f32 %v9733_v3, %v4901_v39  ;;  %v6222_v0 = vadd.f32 %v6221_v8, %v6220_v9 }
 0xb53   :  { %v6223_v25 = vpop.f32.mrf.mxu1 }
 0xb54   :  { %v4902_v33 = vadd.f32 %v6222_v0, %v9648_v20  ;;  %v4975_v14 = vpack.c.bf16 %v4962_v4, %v4961_v15  ;;  %v4947_v31 = vadd.f32 %v9740_v7, %v4924_v18 }
 0xb55   :  { %v6224_v34 = vpop.f32.mrf.mxu1 }
 0xb56   :  { %v4925_v52 = vmul.f32 %v9733_v3, %v4902_v33  ;;  %v6225_v27 = vadd.f32 %v6224_v34, %v6223_v25  ;;  %6283 = vmatprep.mubr.bf16.mxu0 %v4975_v14  ;;  %v4963_v19 = vmax.f32 %v4947_v31, 0.0 }
 0xb57   :  { %v6226_v54 = vpop.f32.mrf.mxu1 }
 0xb58   :  { %v4948_v21 = vadd.f32 %v9740_v7, %v4925_v52  ;;  %v4903_v53 = vadd.f32 %v6225_v27, %v9651_v30 }
 0xb59   :  { %v6227_v35 = vpop.f32.mrf.mxu1 }
 0xb5a   :  { %v4964_v5 = vmax.f32 %v4948_v21, 0.0  ;;  %v4926_v41 = vmul.f32 %v9733_v3, %v4903_v53  ;;  %v6228_v2 = vadd.f32 %v6227_v35, %v6226_v54 }
 0xb5b   :  { %v6229_v20 = vpop.f32.mrf.mxu1 }
 0xb5c   :  { %v4904_v37 = vadd.f32 %v6228_v2, %v9654_v62  ;;  %v4976_v1 = vpack.c.bf16 %v4964_v5, %v4963_v19  ;;  %v4949_v40 = vadd.f32 %v9740_v7, %v4926_v41 }
 0xb5d   :  { %v6230_v10 = vpop.f32.mrf.mxu1 }
 0xb5e   :  { %v4927_v16 = vmul.f32 %v9733_v3, %v4904_v37  ;;  %v6231_v48 = vadd.f32 %v6230_v10, %v6229_v20  ;;  %6284 = vmatmul.mubr.bf16.gmra.mxu0 %v4976_v1  ;;  %v4965_v11 = vmax.f32 %v4949_v40, 0.0 }
 0xb5f   :  { %v6232_v43 = vpop.f32.mrf.mxu1 }
 0xb60   :  { %v4950_v30 = vadd.f32 %v9740_v7, %v4927_v16  ;;  %v4905_v44 = vadd.f32 %v6231_v48, %v9657_v47 }
 0xb61   :  { %v6233_v22 = vpop.f32.mrf.mxu1 }
 0xb62   :  { %v4966_v60 = vmax.f32 %v4950_v30, 0.0  ;;  %v4928_v63 = vmul.f32 %v9733_v3, %v4905_v44  ;;  %v6234_v42 = vadd.f32 %v6233_v22, %v6232_v43 }
 0xb63   :  { %v6235_v62 = vpop.f32.mrf.mxu1 }
 0xb64   :  { %v4906_v45 = vadd.f32 %v6234_v42, %v9660_v6  ;;  %v4977_v36 = vpack.c.bf16 %v4966_v60, %v4965_v11  ;;  %v4951_v58 = vadd.f32 %v9740_v7, %v4928_v63 }
 0xb65   :  { %v6236_v49 = vpop.f32.mrf.mxu1 }
 0xb66   :  { %v4929_v12 = vmul.f32 %v9733_v3, %v4906_v45  ;;  %v6237_v28 = vadd.f32 %v6236_v49, %v6235_v62  ;;  %6287 = vmatprep.mubr.bf16.mxu0 %v4977_v36  ;;  %v4967_v61 = vmax.f32 %v4951_v58, 0.0 }
 0xb67   :  { %v6238_v50 = vpop.f32.mrf.mxu1 }
 0xb68   :  { %v4952_v47 = vadd.f32 %v9740_v7, %v4929_v12  ;;  %v4907_v17 = vadd.f32 %v6237_v28, %v9663_v57 }
 0xb69   :  { %v6239_v32 = vpop.f32.mrf.mxu1 }
 0xb6a   :  { %v4968_v26 = vmax.f32 %v4952_v47, 0.0  ;;  %v4930_v46 = vmul.f32 %v9733_v3, %v4907_v17  ;;  %v6240_v24 = vadd.f32 %v6239_v32, %v6238_v50 }
 0xb6b   :  { %v6241_v6 = vpop.f32.mrf.mxu1 }
 0xb6c   :  { %v4908_v59 = vadd.f32 %v6240_v24, %v9666_v38  ;;  %v4978_v51 = vpack.c.bf16 %v4968_v26, %v4967_v61  ;;  %v4953_v23 = vadd.f32 %v9740_v7, %v4930_v46 }
 0xb6d   :  { %v6242_v29 = vpop.f32.mrf.mxu1 }
 0xb6e   :  { %v4931_v9 = vmul.f32 %v9733_v3, %v4908_v59  ;;  %v6243_v13 = vadd.f32 %v6242_v29, %v6241_v6  ;;  %6288 = vmatmul.mubr.bf16.gmra.mxu0 %v4978_v51  ;;  %v4969_v4 = vmax.f32 %v4953_v23, 0.0 }
 0xb6f   :  { %v6244_v39 = vpop.f32.mrf.mxu1 }
 0xb70   :  { %v4954_v57 = vadd.f32 %v9740_v7, %v4931_v9  ;;  %v4909_v8 = vadd.f32 %v6243_v13, %v9669_v55  ;;  %v5653_v55 = vld [vmem:[%s9847_s8] ss:$0 sm:$0xff] }
 0xb71   :  { %v6245_v15 = vpop.f32.mrf.mxu1 }
 0xb72   :  { %v4970_v18 = vmax.f32 %v4954_v57, 0.0  ;;  %v4932_v0 = vmul.f32 %v9733_v3, %v4909_v8  ;;  %v6246_v25 = vadd.f32 %v6245_v15, %v6244_v39 }
 0xb74   :  { %v4910_v38 = vadd.f32 %v6246_v25, %v9672_v56  ;;  %v4979_v33 = vpack.c.bf16 %v4970_v18, %v4969_v4  ;;  %v4955_v14 = vadd.f32 %v9740_v7, %v4932_v0 }
 0xb76   :  { %v4933_v34 = vmul.f32 %v9733_v3, %v4910_v38  ;;  %6291 = vmatprep.mubr.bf16.mxu1 %v4979_v33  ;;  %v4971_v52 = vmax.f32 %v4955_v14, 0.0 }
 0xb78   :  { %v4956_v31 = vadd.f32 %v9740_v7, %v4933_v34 }
 0xb7a   :  { %v4972_v27 = vmax.f32 %v4956_v31, 0.0 }
 0xb7c   :  { %v4980_v54 = vpack.c.bf16 %v4972_v27, %v4971_v52 }
 0xb7e   :  { %6292 = vmatmul.mubr.bf16.vlgmr.msra.gmra.mxu1 %v4980_v54 }
 0xc0e   :  { %v6281_v21 = vpop.f32.mrf.mxu0 }
 0xc0f   :  { %v5095_v53 = vadd.f32 %v6281_v21, %v5653_v55 }
 0xc10   :  { %v5086_v35 = vpop.f32.mrf.mxu0 }
 0xc11   :  { %5151 = vst [vmem:[%s9849_s10 + $0x10] sm:$0xff] %v5095_v53  ;;  %v5087_v56 = vadd.f32 %v5653_v55, %v5086_v35 }
 0xc12   :  { %v6282_v3 = vpop.f32.mrf.mxu0 }
 0xc13   :  { %5149 = vst [vmem:[%s9849_s10] sm:$0xff] %v5087_v56  ;;  %v5098_v7 = vadd.f32 %v6282_v3, %v5653_v55 }
 0xc14   :  { %v5089_v19 = vpop.f32.mrf.mxu0 }
 0xc15   :  { %5152 = vst [vmem:[%s9849_s10 + $0x18] sm:$0xff] %v5098_v7  ;;  %v5090_v5 = vadd.f32 %v5653_v55, %v5089_v19 }
 0xc17   :  { %5150 = vst [vmem:[%s9849_s10 + $0x8] sm:$0xff] %v5090_v5 }
 0xc1e   :  { %v6285_v41 = vpop.f32.mrf.mxu0 }
 0xc1f   :  { %v5111_v2 = vadd.f32 %v6285_v41, %v5653_v55 }
 0xc20   :  { %v5102_v20 = vpop.f32.mrf.mxu0 }
 0xc21   :  { %5155 = vst [vmem:[%s9849_s10 + $0x30] sm:$0xff] %v5111_v2  ;;  %v5103_v37 = vadd.f32 %v5653_v55, %v5102_v20 }
 0xc22   :  { %v6286_v1 = vpop.f32.mrf.mxu0 }
 0xc23   :  { %5153 = vst [vmem:[%s9849_s10 + $0x20] sm:$0xff] %v5103_v37  ;;  %v5114_v10 = vadd.f32 %v6286_v1, %v5653_v55 }
 0xc24   :  { %v5105_v40 = vpop.f32.mrf.mxu0 }
 0xc25   :  { %5156 = vst [vmem:[%s9849_s10 + $0x38] sm:$0xff] %v5114_v10  ;;  %v5106_v16 = vadd.f32 %v5653_v55, %v5105_v40 }
 0xc27   :  { %5154 = vst [vmem:[%s9849_s10 + $0x28] sm:$0xff] %v5106_v16 }
 0xc2e   :  { %v6289_v48 = vpop.f32.mrf.mxu0 }
 0xc2f   :  { %v5127_v43 = vadd.f32 %v6289_v48, %v5653_v55 }
 0xc30   :  { %v5118_v30 = vpop.f32.mrf.mxu0 }
 0xc31   :  { %5159 = vst [vmem:[%s9849_s10 + $0x50] sm:$0xff] %v5127_v43  ;;  %v5119_v44 = vadd.f32 %v5653_v55, %v5118_v30 }
 0xc32   :  { %v6290_v22 = vpop.f32.mrf.mxu0 }
 0xc33   :  { %5157 = vst [vmem:[%s9849_s10 + $0x40] sm:$0xff] %v5119_v44  ;;  %v5130_v11 = vadd.f32 %v6290_v22, %v5653_v55 }
 0xc34   :  { %v5121_v60 = vpop.f32.mrf.mxu0 }
 0xc35   :  { %5160 = vst [vmem:[%s9849_s10 + $0x58] sm:$0xff] %v5130_v11  ;;  %v5122_v63 = vadd.f32 %v5653_v55, %v5121_v60 }
 0xc37   :  { %5158 = vst [vmem:[%s9849_s10 + $0x48] sm:$0xff] %v5122_v63 }
 0xc3e   :  { %v6293_v42 = vpop.f32.mrf.mxu1 }
 0xc3f   :  { %v5143_v62 = vadd.f32 %v6293_v42, %v5653_v55 }
 0xc40   :  { %v5134_v45 = vpop.f32.mrf.mxu1 }
 0xc41   :  { %5163 = vst [vmem:[%s9849_s10 + $0x70] sm:$0xff] %v5143_v62  ;;  %v5135_v36 = vadd.f32 %v5653_v55, %v5134_v45 }
 0xc42   :  { %v6294_v49 = vpop.f32.mrf.mxu1 }
 0xc43   :  { %5161 = vst [vmem:[%s9849_s10 + $0x60] sm:$0xff] %v5135_v36  ;;  %v5146_v58 = vadd.f32 %v6294_v49, %v5653_v55 }
 0xc44   :  { %v5137_v12 = vpop.f32.mrf.mxu1 }
 0xc45   :  { %5164 = vst [vmem:[%s9849_s10 + $0x78] sm:$0xff] %v5146_v58  ;;  %v5138_v28 = vadd.f32 %v5653_v55, %v5137_v12 }
 0xc47   :  { %5162 = vst [vmem:[%s9849_s10 + $0x68] sm:$0xff] %v5138_v28 }
 0xc48   :  { %5169 = vsyncmov [#allocation3] }
 0xc4b   :  { %s5170_s22 = vpop.sfrf %5169 }
 0xc4c   :  { %p5662_p0 = scmp.ne.s32.totalorder %s5170_s22, 0 }
 0xc4e   :  { %5174 = shalt.err (%p5662_p0)  }
 0xc4f   :  { %5176 = vsyncmov [#allocation3 + $0x1] }
 0xc52   :  { %s5177_s23 = vpop.sfrf %5176 }
 0xc53   :  { %p5663_p1 = scmp.ne.s32.totalorder %s5177_s23, 0 }
 0xc55   :  { %5181 = shalt.err (%p5663_p1)  }
 0xc56   :  { %5183 = vsyncmov [#allocation3 + $0x2] }
 0xc59   :  { %s5184_s0 = vpop.sfrf %5183 }
 0xc5a   :  { %p5664_p2 = scmp.ne.s32.totalorder %s5184_s0, 0 }
 0xc5c   :  { %5188 = shalt.err (%p5664_p2)  }
 0xc5d   :  { %5190 = vsyncmov [#allocation3 + $0x3] }
 0xc60   :  { %s5191_s24 = vpop.sfrf %5190 }
 0xc61   :  { %p5665_p3 = scmp.ne.s32.totalorder %s5191_s24, 0 }
 0xc63   :  { %5195 = shalt.err (%p5665_p3)  }
 0xc64   :  { %5197 = vsyncmov [#allocation3 + $0x4] }
 0xc67   :  { %s5198_s8 = vpop.sfrf %5197 }
 0xc68   :  { %p5666_p4 = scmp.ne.s32.totalorder %s5198_s8, 0 }
 0xc6a   :  { %5202 = shalt.err (%p5666_p4)  }
 0xc6b   :  { %5204 = vsyncmov [#allocation3 + $0x5] }
 0xc6e   :  { %s5205_s10 = vpop.sfrf %5204 }
 0xc6f   :  { %p5667_p5 = scmp.ne.s32.totalorder %s5205_s10, 0 }
 0xc71   :  { %5209 = shalt.err (%p5667_p5)  }
 0xc72   :  { %5211 = vsyncmov [#allocation3 + $0x6] }
 0xc75   :  { %s5212_s25 = vpop.sfrf %5211 }
 0xc76   :  { %p5668_p6 = scmp.ne.s32.totalorder %s5212_s25, 0 }
 0xc78   :  { %5216 = shalt.err (%p5668_p6)  }
 0xc79   :  { %5218 = vsyncmov [#allocation3 + $0x7] }
 0xc7c   :  { %s5219_s9 = vpop.sfrf %5218 }
 0xc7d   :  { %p5669_p7 = scmp.ne.s32.totalorder %s5219_s9, 0 }
 0xc7f   :  { %5223 = shalt.err (%p5669_p7)  }
 0xc80   :  { %5225 = vsyncmov [#allocation3 + $0x8] }
 0xc83   :  { %s5226_s1 = vpop.sfrf %5225 }
 0xc84   :  { %p5670_p8 = scmp.ne.s32.totalorder %s5226_s1, 0 }
 0xc86   :  { %5230 = shalt.err (%p5670_p8)  }

</bundles_post_ra>
